<compile_context>
chip_gen: v7x
topology: tpu7x:2x2x1
jax: 0.10.0
libtpu: 0.0.40
codegen_flags: <defaults>
</compile_context>

<pallas_src>
import jax
import jax.numpy as jnp
from jax import lax
from jax.experimental import pallas as pl
from jax.experimental.pallas import tpu as pltpu

# ---------------------------------------------------------------- settings ---
CODE_LEN = 512      # settings.CODE_LEN
EVENT    = 8        # settings.event
BATCH    = 8        # settings.BATCH_SIZE
ALPHA    = 0.9      # settings.ALPHA
K_CONST  = 1.5      # settings.K
ETA      = 0.1      # settings.ETA
BN_EPS   = 1e-5
NORM_EPS = 1e-12    # F.normalize eps

CLS_PAD   = 128     # classifier_corre hidden/output padded to a full lane tile
LOSS_LANE = 2       # lane of the output slab that carries the scalar loss


# --------------------------------------------------- packed-bias layout ------
def _pad128(n):
    return ((n + 127) // 128) * 128


# (segment name, true width).  Each segment starts on a 128-lane boundary.
_BIAS_LAYOUT = [
    ("bI1", 256), ("bI2", 128), ("bI3", CODE_LEN),
    ("bTf", 512), ("bT1", 256), ("bT2", 128), ("bT3", CODE_LEN),
    ("attw", CODE_LEN), ("attb", 1),
    ("bc1", CLS_PAD), ("bc2", CLS_PAD), ("bc3", CLS_PAD),
]
_BIAS_OFF = {}
_off = 0
for _name, _w in _BIAS_LAYOUT:
    _BIAS_OFF[_name] = (_off, _w)
    _off += _pad128(_w)
_BIAS_TOTAL = _off      # 3328 lanes


# ----------------------------------------------------------- fused kernel ----
def _sum_all(x):
    # Full reduce kept as a (1,1) array so it combines/stores cleanly in VMEM.
    return jnp.sum(jnp.sum(x, axis=1, keepdims=True), axis=0, keepdims=True)


def _fused_forward_kernel(
    img_ref, txt_ref, lab_ref,
    wI1, wI2, wI3, wTf, wT1, wT2, wT3,
    wc1, wc2, wc3,
    bias_ref,
    out_ref,
):
    img = img_ref[0].astype(jnp.float32)          # (B, 512)
    txt = txt_ref[0].astype(jnp.float32)          # (B, 768)
    B = img.shape[0]

    def bseg(name):
        off, w = _BIAS_OFF[name]
        return bias_ref[:, off:off + w]           # (1, w), lane-aligned slice

    def lin(x, w_ref, b, act=None):
        # Weights are pre-transposed to (in, out); MXU consumes them directly.
        w = w_ref[...]
        y = jnp.dot(x.astype(w.dtype), w, preferred_element_type=jnp.float32) + b
        if act == "relu":
            y = jnp.maximum(y, 0.0)
        return y

    # --- VIB_I bottleneck (its classifier head is dead code in the reference).
    h = lin(img, wI1, bseg("bI1"), "relu")
    h = lin(h, wI2, bseg("bI2"), "relu")
    code_I = lin(h, wI3, bseg("bI3"))

    # --- VIB_T: fc(768->512) then bottleneck (classifier head is dead code).
    txt_v = lin(txt, wTf, bseg("bTf"))
    h = lin(txt_v, wT1, bseg("bT1"), "relu")
    h = lin(h, wT2, bseg("bT2"), "relu")
    code_T = lin(h, wT3, bseg("bT3"))

    # --- Attention_ast x2 -> 2-way softmax -> weighted fusion.
    # Width-1 scores computed on the VPU (multiply + row-reduce), not the MXU.
    aw = bseg("attw")                                              # (1, CODE_LEN)
    ab = bseg("attb")                                              # (1, 1)
    a1 = jax.nn.sigmoid(jnp.sum(code_I * aw, axis=1, keepdims=True) + ab)
    a2 = jax.nn.sigmoid(jnp.sum(code_T * aw, axis=1, keepdims=True) + ab)
    m = jnp.maximum(a1, a2)
    e1 = jnp.exp(a1 - m)
    e2 = jnp.exp(a2 - m)
    inv = 1.0 / (e1 + e2)
    F_A = (e1 * inv) * code_I + (e2 * inv) * code_T

    # --- fcModal.classifier_corre -> label_pred, lane-dense 128-wide padded
    #     head (real logits in lanes 0:2, padded lanes are exact zeros).
    #     (domain_classifier / event_pred branch is dead code; skipped).
    h = lin(F_A, wc1, bseg("bc1"), "relu")
    h = lin(h, wc2, bseg("bc2"), "relu")
    lp_pad = lin(h, wc3, bseg("bc3"))                              # (B, 128)
    label_pred = lp_pad[:, 0:2]                                    # (B, 2)

    # --- normalized Gram matrices: dot_general contracts dim 1 of BOTH
    #     operands, so no explicit in-kernel transpose / relayout is needed.
    def norm_gram(x):
        x = x.astype(jnp.float32)
        n = jnp.sqrt(jnp.sum(x * x, axis=1, keepdims=True))
        xn = x / jnp.maximum(n, NORM_EPS)
        return lax.dot_general(
            xn, xn, dimension_numbers=(((1,), (1,)), ((), ())),
            preferred_element_type=jnp.float32)

    S_I   = norm_gram(img)
    S_T   = norm_gram(txt_v)
    BI_BI = norm_gram(code_I)
    BT_BT = norm_gram(code_T)
    B_F_A = norm_gram(F_A)
    S = ALPHA * S_I + (1.0 - ALPHA) * S_T

    def mse(a, b):
        d = a - b
        return _sum_all(d * d) / d.size

    def kl_softmax(x, z):
        # Reproduces the PyTorch reference exactly, including its bug of
        # passing probabilities (not log-probs) as KLDivLoss input:
        #   mean( softmax(z) * (log softmax(z) - softmax(x)) )
        x = x.astype(jnp.float32)
        z = z.astype(jnp.float32)
        mx = jnp.max(x, axis=1, keepdims=True)
        ex = jnp.exp(x - mx)
        p = ex / jnp.sum(ex, axis=1, keepdims=True)
        mz = jnp.max(z, axis=1, keepdims=True)
        ez = jnp.exp(z - mz)
        q = ez / jnp.sum(ez, axis=1, keepdims=True)
        pw = q * (jnp.log(q) - p)
        return _sum_all(pw) / pw.size

    # --- cross-entropy with one-hot built in-kernel via broadcasted_iota.
    lab = lab_ref[0]                                               # (B, 1) int32
    cls = lax.broadcasted_iota(jnp.int32, (B, 2), 1)               # (B, 2)
    oh = (cls == lab).astype(jnp.float32)
    ml = jnp.max(label_pred, axis=1, keepdims=True)
    zl = label_pred - ml
    lse = jnp.log(jnp.sum(jnp.exp(zl), axis=1, keepdims=True))
    nll = -jnp.sum(oh * (zl - lse), axis=1, keepdims=True)         # (B, 1)
    tri_loss = _sum_all(nll) / B

    vsd_loss = kl_softmax(img, code_I) + kl_softmax(txt_v, code_T)
    loss3  = mse(B_F_A, S)
    loss31 = mse(BI_BI, K_CONST * S_I)
    loss32 = mse(BT_BT, K_CONST * S_T)
    loss7  = mse(BI_BI, BT_BT)
    loss = tri_loss + vsd_loss + loss3 + loss7 + ETA * (loss31 + loss32)  # (1,1)

    # --- single lane-dense output slab: logits in lanes 0:2, loss in lane 2.
    lane = lax.broadcasted_iota(jnp.int32, (B, CLS_PAD), 1)
    loss_mask = (lane == LOSS_LANE).astype(jnp.float32)
    out_ref[0] = lp_pad + loss * loss_mask


# ----------------------------------------------------------------- params ----
def init_params(key):
    """PyTorch-layout (out_features, in_features) weights + (out,) biases."""
    def lin(k, out_f, in_f, std=0.05):
        w = std * jax.random.normal(k, (out_f, in_f), jnp.float32)
        b = jnp.zeros((out_f,), jnp.float32)
        return w, b

    keys = jax.random.split(key, 11)
    H1, H2 = 256, 128   # ChannelCompress hidden sizes (stand-in, see TODO above)
    p = {}
    p["vibI_cc1"] = lin(keys[0], H1, 512)
    p["vibI_cc2"] = lin(keys[1], H2, H1)
    p["vibI_cc3"] = lin(keys[2], CODE_LEN, H2)
    p["vibT_fc"]  = lin(keys[3], 512, 768)
    p["vibT_cc1"] = lin(keys[4], H1, 512)
    p["vibT_cc2"] = lin(keys[5], H2, H1)
    p["vibT_cc3"] = lin(keys[6], CODE_LEN, H2)
    p["att"]      = lin(keys[7], 1, CODE_LEN)
    p["cc_l1"]    = lin(keys[8], 64, CODE_LEN)
    p["cc_l2"]    = lin(keys[9], 64, 64)
    p["cc_l3"]    = lin(keys[10], 2, 64)
    # fcModal.domain_classifier (512->256->EVENT) feeds only event_pred, which
    # the reference forward discards; omitted on purpose (dead code).
    return p


def prepare_params(p, weights_dtype=jnp.float32):
    """One-time preprocessing (outside jit):
       * fold eval-mode BN scale into preceding Linear weights/biases (f32),
       * transpose weights to (in, out) so the kernel never transposes,
       * zero-pad the classifier_corre head to a lane-dense 128 width,
       * pack all biases + attention weight/bias into one (1, 3328) buffer,
       * optionally cast weight matrices to bf16 (weights_dtype=jnp.bfloat16)
         to halve the resident-weight DMA (non-bit-exact; biases stay f32)."""
    s = 1.0 / jnp.sqrt(jnp.float32(1.0 + BN_EPS))

    def wt(name, fold_bn):
        w, _ = p[name]
        w = jnp.asarray(w, jnp.float32)
        if fold_bn:
            w = w * s
        return w.T                                   # (in, out)

    def bv(name, fold_bn, pad_to=None):
        _, b = p[name]
        b = jnp.asarray(b, jnp.float32)
        if fold_bn:
            b = b * s
        if pad_to is not None and b.shape[0] < pad_to:
            b = jnp.pad(b, (0, pad_to - b.shape[0]))
        return b

    wI1 = wt("vibI_cc1", True)
    wI2 = wt("vibI_cc2", True)
    wI3 = wt("vibI_cc3", False)
    wTf = wt("vibT_fc", False)
    wT1 = wt("vibT_cc1", True)
    wT2 = wt("vibT_cc2", True)
    wT3 = wt("vibT_cc3", False)
    # classifier_corre head padded to lane-dense 128-wide hidden/output.
    wc1 = jnp.pad(wt("cc_l1", True),  ((0, 0), (0, CLS_PAD - 64)))
    wc2 = jnp.pad(wt("cc_l2", True),  ((0, CLS_PAD - 64), (0, CLS_PAD - 64)))
    wc3 = jnp.pad(wt("cc_l3", False), ((0, CLS_PAD - 64), (0, CLS_PAD - 2)))

    weights = tuple(w.astype(weights_dtype)
                    for w in (wI1, wI2, wI3, wTf, wT1, wT2, wT3, wc1, wc2, wc3))

    bias = jnp.zeros((1, _BIAS_TOTAL), jnp.float32)

    def put(buf, name, vec):
        off, _ = _BIAS_OFF[name]
        return buf.at[0, off:off + vec.shape[0]].set(vec)

    bias = put(bias, "bI1", bv("vibI_cc1", True))
    bias = put(bias, "bI2", bv("vibI_cc2", True))
    bias = put(bias, "bI3", bv("vibI_cc3", False))
    bias = put(bias, "bTf", bv("vibT_fc", False))
    bias = put(bias, "bT1", bv("vibT_cc1", True))
    bias = put(bias, "bT2", bv("vibT_cc2", True))
    bias = put(bias, "bT3", bv("vibT_cc3", False))
    bias = put(bias, "attw", jnp.asarray(p["att"][0], jnp.float32).reshape(-1))
    bias = put(bias, "attb", jnp.asarray(p["att"][1], jnp.float32).reshape(-1))
    bias = put(bias, "bc1", bv("cc_l1", True, pad_to=CLS_PAD))
    bias = put(bias, "bc2", bv("cc_l2", True, pad_to=CLS_PAD))
    bias = put(bias, "bc3", bv("cc_l3", False, pad_to=CLS_PAD))

    return weights + (bias,)


# ---------------------------------------------------------------- forward ----
@jax.jit
def model_forward_batched(prep, img, txt, label):
    """img (N,B,512), txt (N,B,768), label (N,B) -> loss (N,), pred (N,B,2).
    Weights are DMA'd once (constant index_map) and stay VMEM-resident while
    the N micro-batch chunks pipeline through the grid."""
    N, B = img.shape[0], img.shape[1]
    img = img.astype(jnp.float32)
    txt = txt.astype(jnp.float32)
    lab = label.astype(jnp.int32).reshape(N, B, 1)

    # Weights / packed biases: full-array blocks, constant block index.
    weight_specs = [pl.BlockSpec(w.shape, lambda n: (0, 0)) for w in prep]

    grid_spec = pltpu.PrefetchScalarGridSpec(
        num_scalar_prefetch=0,
        grid=(N,),
        in_specs=[
            pl.BlockSpec((1, B, img.shape[2]), lambda n: (n, 0, 0)),
            pl.BlockSpec((1, B, txt.shape[2]), lambda n: (n, 0, 0)),
            pl.BlockSpec((1, B, 1), lambda n: (n, 0, 0)),
        ] + weight_specs,
        out_specs=pl.BlockSpec((1, B, CLS_PAD), lambda n: (n, 0, 0)),
    )

    out = pl.pallas_call(
        _fused_forward_kernel,
        out_shape=jax.ShapeDtypeStruct((N, B, CLS_PAD), jnp.float32),
        grid_spec=grid_spec,
        compiler_params=pltpu.CompilerParams(
            dimension_semantics=("parallel",),        # shards chunks on v7x TCs
            vmem_limit_bytes=32 * 1024 * 1024,
        ),
    )(img, txt, lab, *prep)

    loss = out[:, 0, LOSS_LANE]          # (N,)
    label_pred = out[:, :, 0:2]          # (N, B, 2)
    return loss, label_pred


def model_forward(prep, img, txt, label):
    """Single micro-batch convenience wrapper (reference-like signature)."""
    loss, pred = model_forward_batched(prep, img[None], txt[None], label[None])
    return loss[0], pred[0]


# ------------------------------------------------------------------- main ----
if __name__ == "__main__":
    key = jax.random.PRNGKey(0)
    k_param, k_img, k_txt, k_lab = jax.random.split(key, 4)

    params = init_params(k_param)
    prep = prepare_params(params)        # once; not re-done per forward (f32)
    # Optional faster, non-bit-exact path (halves the resident-weight DMA):
    #   prep_bf16 = prepare_params(params, weights_dtype=jnp.bfloat16)

    N = 4                                # stacked micro-batches per call
    img = jax.random.normal(k_img, (N, BATCH, 512), jnp.float32)
    txt = jax.random.normal(k_txt, (N, BATCH, 768), jnp.float32)
    label = jax.random.randint(k_lab, (N, BATCH), 0, 2, jnp.int32)

    losses, preds = model_forward_batched(prep, img, txt, label)
    jax.block_until_ready((losses, preds))
    assert losses.shape == (N,)
    assert preds.shape == (N, BATCH, 2)
    assert bool(jnp.all(jnp.isfinite(losses)))

    loss0, pred0 = model_forward(prep, img[0], txt[0], label[0])
    jax.block_until_ready((loss0, pred0))
    assert loss0.shape == ()
    assert pred0.shape == (BATCH, 2)

    print("KERNEL_OK")
</pallas_src>

<mosaic_0001>
module attributes {stable_mosaic.version = 11 : i64} {
  func.func @_fused_forward_kernel(%arg0: i32, %arg1: memref<1x8x512xf32, #tpu.memory_space<vmem>>, %arg2: memref<1x8x768xf32, #tpu.memory_space<vmem>>, %arg3: memref<1x8x1xi32, #tpu.memory_space<vmem>>, %arg4: memref<512x256xf32, #tpu.memory_space<vmem>>, %arg5: memref<256x128xf32, #tpu.memory_space<vmem>>, %arg6: memref<128x512xf32, #tpu.memory_space<vmem>>, %arg7: memref<768x512xf32, #tpu.memory_space<vmem>>, %arg8: memref<512x256xf32, #tpu.memory_space<vmem>>, %arg9: memref<256x128xf32, #tpu.memory_space<vmem>>, %arg10: memref<128x512xf32, #tpu.memory_space<vmem>>, %arg11: memref<512x128xf32, #tpu.memory_space<vmem>>, %arg12: memref<128x128xf32, #tpu.memory_space<vmem>>, %arg13: memref<128x128xf32, #tpu.memory_space<vmem>>, %arg14: memref<1x3328xf32, #tpu.memory_space<vmem>>, %arg15: memref<1x8x128xf32, #tpu.memory_space<vmem>>) attributes {dimension_semantics = [#tpu.dimension_semantics<parallel>], iteration_bounds = array<i64: 4>, scalar_prefetch = 0 : i64, scratch_operands = 0 : i64, tpu.core_type = #tpu.core_type<tc>, window_params = [{transform_indices = @transform_0, window_bounds = array<i64: 1, 8, 512>}, {transform_indices = @transform_1, window_bounds = array<i64: 1, 8, 768>}, {transform_indices = @transform_2, window_bounds = array<i64: 1, 8, 1>}, {pipeline_mode = #tpu.pipeline_mode<synchronous>, transform_indices = @transform_3, window_bounds = array<i64: 512, 256>}, {pipeline_mode = #tpu.pipeline_mode<synchronous>, transform_indices = @transform_4, window_bounds = array<i64: 256, 128>}, {pipeline_mode = #tpu.pipeline_mode<synchronous>, transform_indices = @transform_5, window_bounds = array<i64: 128, 512>}, {pipeline_mode = #tpu.pipeline_mode<synchronous>, transform_indices = @transform_6, window_bounds = array<i64: 768, 512>}, {pipeline_mode = #tpu.pipeline_mode<synchronous>, transform_indices = @transform_7, window_bounds = array<i64: 512, 256>}, {pipeline_mode = #tpu.pipeline_mode<synchronous>, transform_indices = @transform_8, window_bounds = array<i64: 256, 128>}, {pipeline_mode = #tpu.pipeline_mode<synchronous>, transform_indices = @transform_9, window_bounds = array<i64: 128, 512>}, {pipeline_mode = #tpu.pipeline_mode<synchronous>, transform_indices = @transform_10, window_bounds = array<i64: 512, 128>}, {pipeline_mode = #tpu.pipeline_mode<synchronous>, transform_indices = @transform_11, window_bounds = array<i64: 128, 128>}, {pipeline_mode = #tpu.pipeline_mode<synchronous>, transform_indices = @transform_12, window_bounds = array<i64: 128, 128>}, {pipeline_mode = #tpu.pipeline_mode<synchronous>, transform_indices = @transform_13, window_bounds = array<i64: 1, 3328>}, {transform_indices = @transform_14, window_bounds = array<i64: 1, 8, 128>}]} {
    %c0 = arith.constant 0 : index
    %c0_0 = arith.constant 0 : index
    %c0_1 = arith.constant 0 : index
    %0 = vector.load %arg1[%c0, %c0_0, %c0_1] : memref<1x8x512xf32, #tpu.memory_space<vmem>>, vector<1x8x512xf32>
    %1 = vector.shape_cast %0 : vector<1x8x512xf32> to vector<8x512xf32>
    %c0_2 = arith.constant 0 : index
    %c0_3 = arith.constant 0 : index
    %c0_4 = arith.constant 0 : index
    %2 = vector.load %arg2[%c0_2, %c0_3, %c0_4] : memref<1x8x768xf32, #tpu.memory_space<vmem>>, vector<1x8x768xf32>
    %3 = vector.shape_cast %2 : vector<1x8x768xf32> to vector<8x768xf32>
    %c0_5 = arith.constant 0 : index
    %c0_6 = arith.constant 0 : index
    %4 = vector.load %arg14[%c0_5, %c0_6] : memref<1x3328xf32, #tpu.memory_space<vmem>>, vector<1x256xf32>
    %c0_7 = arith.constant 0 : index
    %c0_8 = arith.constant 0 : index
    %5 = vector.load %arg4[%c0_7, %c0_8] : memref<512x256xf32, #tpu.memory_space<vmem>>, vector<512x256xf32>
    %cst = arith.constant dense<0.000000e+00> : vector<8x256xf32>
    %6 = tpu.matmul %1, %5, %cst {dimension_numbers = #tpu.dot_dimension_numbers<[1], [0], [0], [1], [0, 0, 1, 1], [], []>} : vector<8x512xf32>, vector<512x256xf32>, vector<8x256xf32> -> vector<8x256xf32>
    %7 = vector.broadcast %4 : vector<1x256xf32> to vector<8x256xf32>
    %8 = arith.addf %6, %7 : vector<8x256xf32>
    %cst_9 = arith.constant 0.000000e+00 : f32
    %9 = vector.broadcast %cst_9 : f32 to vector<8x256xf32>
    %10 = arith.maximumf %8, %9 : vector<8x256xf32>
    %c0_10 = arith.constant 0 : index
    %c256 = arith.constant 256 : index
    %11 = vector.load %arg14[%c0_10, %c256] : memref<1x3328xf32, #tpu.memory_space<vmem>>, vector<1x128xf32>
    %c0_11 = arith.constant 0 : index
    %c0_12 = arith.constant 0 : index
    %12 = vector.load %arg5[%c0_11, %c0_12] : memref<256x128xf32, #tpu.memory_space<vmem>>, vector<256x128xf32>
    %cst_13 = arith.constant dense<0.000000e+00> : vector<8x128xf32>
    %13 = tpu.matmul %10, %12, %cst_13 {dimension_numbers = #tpu.dot_dimension_numbers<[1], [0], [0], [1], [0, 0, 1, 1], [], []>} : vector<8x256xf32>, vector<256x128xf32>, vector<8x128xf32> -> vector<8x128xf32>
    %14 = vector.broadcast %11 : vector<1x128xf32> to vector<8x128xf32>
    %15 = arith.addf %13, %14 : vector<8x128xf32>
    %cst_14 = arith.constant 0.000000e+00 : f32
    %16 = vector.broadcast %cst_14 : f32 to vector<8x128xf32>
    %17 = arith.maximumf %15, %16 : vector<8x128xf32>
    %c0_15 = arith.constant 0 : index
    %c384 = arith.constant 384 : index
    %18 = vector.load %arg14[%c0_15, %c384] : memref<1x3328xf32, #tpu.memory_space<vmem>>, vector<1x512xf32>
    %c0_16 = arith.constant 0 : index
    %c0_17 = arith.constant 0 : index
    %19 = vector.load %arg6[%c0_16, %c0_17] : memref<128x512xf32, #tpu.memory_space<vmem>>, vector<128x512xf32>
    %cst_18 = arith.constant dense<0.000000e+00> : vector<8x512xf32>
    %20 = tpu.matmul %17, %19, %cst_18 {dimension_numbers = #tpu.dot_dimension_numbers<[1], [0], [0], [1], [0, 0, 1, 1], [], []>} : vector<8x128xf32>, vector<128x512xf32>, vector<8x512xf32> -> vector<8x512xf32>
    %21 = vector.broadcast %18 : vector<1x512xf32> to vector<8x512xf32>
    %22 = arith.addf %20, %21 : vector<8x512xf32>
    %c0_19 = arith.constant 0 : index
    %c896 = arith.constant 896 : index
    %23 = vector.load %arg14[%c0_19, %c896] : memref<1x3328xf32, #tpu.memory_space<vmem>>, vector<1x512xf32>
    %c0_20 = arith.constant 0 : index
    %c0_21 = arith.constant 0 : index
    %24 = vector.load %arg7[%c0_20, %c0_21] : memref<768x512xf32, #tpu.memory_space<vmem>>, vector<768x512xf32>
    %cst_22 = arith.constant dense<0.000000e+00> : vector<8x512xf32>
    %25 = tpu.matmul %3, %24, %cst_22 {dimension_numbers = #tpu.dot_dimension_numbers<[1], [0], [0], [1], [0, 0, 1, 1], [], []>} : vector<8x768xf32>, vector<768x512xf32>, vector<8x512xf32> -> vector<8x512xf32>
    %26 = vector.broadcast %23 : vector<1x512xf32> to vector<8x512xf32>
    %27 = arith.addf %25, %26 : vector<8x512xf32>
    %c0_23 = arith.constant 0 : index
    %c1408 = arith.constant 1408 : index
    %28 = vector.load %arg14[%c0_23, %c1408] : memref<1x3328xf32, #tpu.memory_space<vmem>>, vector<1x256xf32>
    %c0_24 = arith.constant 0 : index
    %c0_25 = arith.constant 0 : index
    %29 = vector.load %arg8[%c0_24, %c0_25] : memref<512x256xf32, #tpu.memory_space<vmem>>, vector<512x256xf32>
    %cst_26 = arith.constant dense<0.000000e+00> : vector<8x256xf32>
    %30 = tpu.matmul %27, %29, %cst_26 {dimension_numbers = #tpu.dot_dimension_numbers<[1], [0], [0], [1], [0, 0, 1, 1], [], []>} : vector<8x512xf32>, vector<512x256xf32>, vector<8x256xf32> -> vector<8x256xf32>
    %31 = vector.broadcast %28 : vector<1x256xf32> to vector<8x256xf32>
    %32 = arith.addf %30, %31 : vector<8x256xf32>
    %cst_27 = arith.constant 0.000000e+00 : f32
    %33 = vector.broadcast %cst_27 : f32 to vector<8x256xf32>
    %34 = arith.maximumf %32, %33 : vector<8x256xf32>
    %c0_28 = arith.constant 0 : index
    %c1664 = arith.constant 1664 : index
    %35 = vector.load %arg14[%c0_28, %c1664] : memref<1x3328xf32, #tpu.memory_space<vmem>>, vector<1x128xf32>
    %c0_29 = arith.constant 0 : index
    %c0_30 = arith.constant 0 : index
    %36 = vector.load %arg9[%c0_29, %c0_30] : memref<256x128xf32, #tpu.memory_space<vmem>>, vector<256x128xf32>
    %cst_31 = arith.constant dense<0.000000e+00> : vector<8x128xf32>
    %37 = tpu.matmul %34, %36, %cst_31 {dimension_numbers = #tpu.dot_dimension_numbers<[1], [0], [0], [1], [0, 0, 1, 1], [], []>} : vector<8x256xf32>, vector<256x128xf32>, vector<8x128xf32> -> vector<8x128xf32>
    %38 = vector.broadcast %35 : vector<1x128xf32> to vector<8x128xf32>
    %39 = arith.addf %37, %38 : vector<8x128xf32>
    %cst_32 = arith.constant 0.000000e+00 : f32
    %40 = vector.broadcast %cst_32 : f32 to vector<8x128xf32>
    %41 = arith.maximumf %39, %40 : vector<8x128xf32>
    %c0_33 = arith.constant 0 : index
    %c1792 = arith.constant 1792 : index
    %42 = vector.load %arg14[%c0_33, %c1792] : memref<1x3328xf32, #tpu.memory_space<vmem>>, vector<1x512xf32>
    %c0_34 = arith.constant 0 : index
    %c0_35 = arith.constant 0 : index
    %43 = vector.load %arg10[%c0_34, %c0_35] : memref<128x512xf32, #tpu.memory_space<vmem>>, vector<128x512xf32>
    %cst_36 = arith.constant dense<0.000000e+00> : vector<8x512xf32>
    %44 = tpu.matmul %41, %43, %cst_36 {dimension_numbers = #tpu.dot_dimension_numbers<[1], [0], [0], [1], [0, 0, 1, 1], [], []>} : vector<8x128xf32>, vector<128x512xf32>, vector<8x512xf32> -> vector<8x512xf32>
    %45 = vector.broadcast %42 : vector<1x512xf32> to vector<8x512xf32>
    %46 = arith.addf %44, %45 : vector<8x512xf32>
    %c0_37 = arith.constant 0 : index
    %c2304 = arith.constant 2304 : index
    %47 = vector.load %arg14[%c0_37, %c2304] : memref<1x3328xf32, #tpu.memory_space<vmem>>, vector<1x512xf32>
    %c0_38 = arith.constant 0 : index
    %c2816 = arith.constant 2816 : index
    %48 = vector.load %arg14[%c0_38, %c2816] : memref<1x3328xf32, #tpu.memory_space<vmem>>, vector<1x1xf32>
    %49 = vector.broadcast %47 : vector<1x512xf32> to vector<8x512xf32>
    %50 = arith.mulf %22, %49 : vector<8x512xf32>
    %cst_39 = arith.constant dense<0.000000e+00> : vector<8xf32>
    %51 = vector.multi_reduction <add>, %50, %cst_39 [1] : vector<8x512xf32> to vector<8xf32>
    %52 = vector.shape_cast %51 : vector<8xf32> to vector<8x1xf32>
    %53 = vector.broadcast %48 : vector<1x1xf32> to vector<8x1xf32>
    %54 = arith.addf %52, %53 : vector<8x1xf32>
    %55 = arith.negf %54 : vector<8x1xf32>
    %56 = math.exp %55 : vector<8x1xf32>
    %cst_40 = arith.constant 1.000000e+00 : f32
    %57 = vector.broadcast %cst_40 : f32 to vector<8x1xf32>
    %58 = arith.addf %57, %56 : vector<8x1xf32>
    %59 = arith.divf %57, %58 : vector<8x1xf32>
    %60 = vector.broadcast %47 : vector<1x512xf32> to vector<8x512xf32>
    %61 = arith.mulf %46, %60 : vector<8x512xf32>
    %cst_41 = arith.constant dense<0.000000e+00> : vector<8xf32>
    %62 = vector.multi_reduction <add>, %61, %cst_41 [1] : vector<8x512xf32> to vector<8xf32>
    %63 = vector.shape_cast %62 : vector<8xf32> to vector<8x1xf32>
    %64 = vector.broadcast %48 : vector<1x1xf32> to vector<8x1xf32>
    %65 = arith.addf %63, %64 : vector<8x1xf32>
    %66 = arith.negf %65 : vector<8x1xf32>
    %67 = math.exp %66 : vector<8x1xf32>
    %cst_42 = arith.constant 1.000000e+00 : f32
    %68 = vector.broadcast %cst_42 : f32 to vector<8x1xf32>
    %69 = arith.addf %68, %67 : vector<8x1xf32>
    %70 = arith.divf %68, %69 : vector<8x1xf32>
    %71 = arith.maximumf %59, %70 : vector<8x1xf32>
    %72 = arith.subf %59, %71 : vector<8x1xf32>
    %73 = math.exp %72 : vector<8x1xf32>
    %74 = arith.subf %70, %71 : vector<8x1xf32>
    %75 = math.exp %74 : vector<8x1xf32>
    %76 = arith.addf %73, %75 : vector<8x1xf32>
    %cst_43 = arith.constant 1.000000e+00 : f32
    %77 = vector.broadcast %cst_43 : f32 to vector<8x1xf32>
    %78 = arith.divf %77, %76 : vector<8x1xf32>
    %79 = arith.mulf %73, %78 : vector<8x1xf32>
    %80 = vector.broadcast %79 : vector<8x1xf32> to vector<8x512xf32>
    %81 = arith.mulf %80, %22 : vector<8x512xf32>
    %82 = arith.mulf %75, %78 : vector<8x1xf32>
    %83 = vector.broadcast %82 : vector<8x1xf32> to vector<8x512xf32>
    %84 = arith.mulf %83, %46 : vector<8x512xf32>
    %85 = arith.addf %81, %84 : vector<8x512xf32>
    %c0_44 = arith.constant 0 : index
    %c2944 = arith.constant 2944 : index
    %86 = vector.load %arg14[%c0_44, %c2944] : memref<1x3328xf32, #tpu.memory_space<vmem>>, vector<1x128xf32>
    %c0_45 = arith.constant 0 : index
    %c0_46 = arith.constant 0 : index
    %87 = vector.load %arg11[%c0_45, %c0_46] : memref<512x128xf32, #tpu.memory_space<vmem>>, vector<512x128xf32>
    %cst_47 = arith.constant dense<0.000000e+00> : vector<8x128xf32>
    %88 = tpu.matmul %85, %87, %cst_47 {dimension_numbers = #tpu.dot_dimension_numbers<[1], [0], [0], [1], [0, 0, 1, 1], [], []>} : vector<8x512xf32>, vector<512x128xf32>, vector<8x128xf32> -> vector<8x128xf32>
    %89 = vector.broadcast %86 : vector<1x128xf32> to vector<8x128xf32>
    %90 = arith.addf %88, %89 : vector<8x128xf32>
    %cst_48 = arith.constant 0.000000e+00 : f32
    %91 = vector.broadcast %cst_48 : f32 to vector<8x128xf32>
    %92 = arith.maximumf %90, %91 : vector<8x128xf32>
    %c0_49 = arith.constant 0 : index
    %c3072 = arith.constant 3072 : index
    %93 = vector.load %arg14[%c0_49, %c3072] : memref<1x3328xf32, #tpu.memory_space<vmem>>, vector<1x128xf32>
    %c0_50 = arith.constant 0 : index
    %c0_51 = arith.constant 0 : index
    %94 = vector.load %arg12[%c0_50, %c0_51] : memref<128x128xf32, #tpu.memory_space<vmem>>, vector<128x128xf32>
    %cst_52 = arith.constant dense<0.000000e+00> : vector<8x128xf32>
    %95 = tpu.matmul %92, %94, %cst_52 {dimension_numbers = #tpu.dot_dimension_numbers<[1], [0], [0], [1], [0, 0, 1, 1], [], []>} : vector<8x128xf32>, vector<128x128xf32>, vector<8x128xf32> -> vector<8x128xf32>
    %96 = vector.broadcast %93 : vector<1x128xf32> to vector<8x128xf32>
    %97 = arith.addf %95, %96 : vector<8x128xf32>
    %cst_53 = arith.constant 0.000000e+00 : f32
    %98 = vector.broadcast %cst_53 : f32 to vector<8x128xf32>
    %99 = arith.maximumf %97, %98 : vector<8x128xf32>
    %c0_54 = arith.constant 0 : index
    %c3200 = arith.constant 3200 : index
    %100 = vector.load %arg14[%c0_54, %c3200] : memref<1x3328xf32, #tpu.memory_space<vmem>>, vector<1x128xf32>
    %c0_55 = arith.constant 0 : index
    %c0_56 = arith.constant 0 : index
    %101 = vector.load %arg13[%c0_55, %c0_56] : memref<128x128xf32, #tpu.memory_space<vmem>>, vector<128x128xf32>
    %cst_57 = arith.constant dense<0.000000e+00> : vector<8x128xf32>
    %102 = tpu.matmul %99, %101, %cst_57 {dimension_numbers = #tpu.dot_dimension_numbers<[1], [0], [0], [1], [0, 0, 1, 1], [], []>} : vector<8x128xf32>, vector<128x128xf32>, vector<8x128xf32> -> vector<8x128xf32>
    %103 = vector.broadcast %100 : vector<1x128xf32> to vector<8x128xf32>
    %104 = arith.addf %102, %103 : vector<8x128xf32>
    %105 = vector.extract_strided_slice %104 {offsets = [0, 0], sizes = [8, 2], strides = [1, 1]} : vector<8x128xf32> to vector<8x2xf32>
    %106 = arith.mulf %1, %1 : vector<8x512xf32>
    %cst_58 = arith.constant dense<0.000000e+00> : vector<8xf32>
    %107 = vector.multi_reduction <add>, %106, %cst_58 [1] : vector<8x512xf32> to vector<8xf32>
    %108 = vector.shape_cast %107 : vector<8xf32> to vector<8x1xf32>
    %109 = math.sqrt %108 : vector<8x1xf32>
    %cst_59 = arith.constant 9.99999996E-13 : f32
    %110 = vector.broadcast %cst_59 : f32 to vector<8x1xf32>
    %111 = arith.maximumf %109, %110 : vector<8x1xf32>
    %112 = vector.broadcast %111 : vector<8x1xf32> to vector<8x512xf32>
    %113 = arith.divf %1, %112 : vector<8x512xf32>
    %cst_60 = arith.constant dense<0.000000e+00> : vector<8x8xf32>
    %114 = tpu.matmul %113, %113, %cst_60 {dimension_numbers = #tpu.dot_dimension_numbers<[1], [1], [0], [0], [0, 0, 1, 0], [], []>} : vector<8x512xf32>, vector<8x512xf32>, vector<8x8xf32> -> vector<8x8xf32>
    %115 = arith.mulf %27, %27 : vector<8x512xf32>
    %cst_61 = arith.constant dense<0.000000e+00> : vector<8xf32>
    %116 = vector.multi_reduction <add>, %115, %cst_61 [1] : vector<8x512xf32> to vector<8xf32>
    %117 = vector.shape_cast %116 : vector<8xf32> to vector<8x1xf32>
    %118 = math.sqrt %117 : vector<8x1xf32>
    %cst_62 = arith.constant 9.99999996E-13 : f32
    %119 = vector.broadcast %cst_62 : f32 to vector<8x1xf32>
    %120 = arith.maximumf %118, %119 : vector<8x1xf32>
    %121 = vector.broadcast %120 : vector<8x1xf32> to vector<8x512xf32>
    %122 = arith.divf %27, %121 : vector<8x512xf32>
    %cst_63 = arith.constant dense<0.000000e+00> : vector<8x8xf32>
    %123 = tpu.matmul %122, %122, %cst_63 {dimension_numbers = #tpu.dot_dimension_numbers<[1], [1], [0], [0], [0, 0, 1, 0], [], []>} : vector<8x512xf32>, vector<8x512xf32>, vector<8x8xf32> -> vector<8x8xf32>
    %124 = arith.mulf %22, %22 : vector<8x512xf32>
    %cst_64 = arith.constant dense<0.000000e+00> : vector<8xf32>
    %125 = vector.multi_reduction <add>, %124, %cst_64 [1] : vector<8x512xf32> to vector<8xf32>
    %126 = vector.shape_cast %125 : vector<8xf32> to vector<8x1xf32>
    %127 = math.sqrt %126 : vector<8x1xf32>
    %cst_65 = arith.constant 9.99999996E-13 : f32
    %128 = vector.broadcast %cst_65 : f32 to vector<8x1xf32>
    %129 = arith.maximumf %127, %128 : vector<8x1xf32>
    %130 = vector.broadcast %129 : vector<8x1xf32> to vector<8x512xf32>
    %131 = arith.divf %22, %130 : vector<8x512xf32>
    %cst_66 = arith.constant dense<0.000000e+00> : vector<8x8xf32>
    %132 = tpu.matmul %131, %131, %cst_66 {dimension_numbers = #tpu.dot_dimension_numbers<[1], [1], [0], [0], [0, 0, 1, 0], [], []>} : vector<8x512xf32>, vector<8x512xf32>, vector<8x8xf32> -> vector<8x8xf32>
    %133 = arith.mulf %46, %46 : vector<8x512xf32>
    %cst_67 = arith.constant dense<0.000000e+00> : vector<8xf32>
    %134 = vector.multi_reduction <add>, %133, %cst_67 [1] : vector<8x512xf32> to vector<8xf32>
    %135 = vector.shape_cast %134 : vector<8xf32> to vector<8x1xf32>
    %136 = math.sqrt %135 : vector<8x1xf32>
    %cst_68 = arith.constant 9.99999996E-13 : f32
    %137 = vector.broadcast %cst_68 : f32 to vector<8x1xf32>
    %138 = arith.maximumf %136, %137 : vector<8x1xf32>
    %139 = vector.broadcast %138 : vector<8x1xf32> to vector<8x512xf32>
    %140 = arith.divf %46, %139 : vector<8x512xf32>
    %cst_69 = arith.constant dense<0.000000e+00> : vector<8x8xf32>
    %141 = tpu.matmul %140, %140, %cst_69 {dimension_numbers = #tpu.dot_dimension_numbers<[1], [1], [0], [0], [0, 0, 1, 0], [], []>} : vector<8x512xf32>, vector<8x512xf32>, vector<8x8xf32> -> vector<8x8xf32>
    %142 = arith.mulf %85, %85 : vector<8x512xf32>
    %cst_70 = arith.constant dense<0.000000e+00> : vector<8xf32>
    %143 = vector.multi_reduction <add>, %142, %cst_70 [1] : vector<8x512xf32> to vector<8xf32>
    %144 = vector.shape_cast %143 : vector<8xf32> to vector<8x1xf32>
    %145 = math.sqrt %144 : vector<8x1xf32>
    %cst_71 = arith.constant 9.99999996E-13 : f32
    %146 = vector.broadcast %cst_71 : f32 to vector<8x1xf32>
    %147 = arith.maximumf %145, %146 : vector<8x1xf32>
    %148 = vector.broadcast %147 : vector<8x1xf32> to vector<8x512xf32>
    %149 = arith.divf %85, %148 : vector<8x512xf32>
    %cst_72 = arith.constant dense<0.000000e+00> : vector<8x8xf32>
    %150 = tpu.matmul %149, %149, %cst_72 {dimension_numbers = #tpu.dot_dimension_numbers<[1], [1], [0], [0], [0, 0, 1, 0], [], []>} : vector<8x512xf32>, vector<8x512xf32>, vector<8x8xf32> -> vector<8x8xf32>
    %cst_73 = arith.constant 0.899999976 : f32
    %151 = vector.broadcast %cst_73 : f32 to vector<8x8xf32>
    %152 = arith.mulf %151, %114 : vector<8x8xf32>
    %cst_74 = arith.constant 1.000000e-01 : f32
    %153 = vector.broadcast %cst_74 : f32 to vector<8x8xf32>
    %154 = arith.mulf %153, %123 : vector<8x8xf32>
    %155 = arith.addf %152, %154 : vector<8x8xf32>
    %c0_75 = arith.constant 0 : index
    %c0_76 = arith.constant 0 : index
    %c0_77 = arith.constant 0 : index
    %156 = vector.load %arg3[%c0_75, %c0_76, %c0_77] : memref<1x8x1xi32, #tpu.memory_space<vmem>>, vector<1x8x1xi32>
    %157 = vector.shape_cast %156 : vector<1x8x1xi32> to vector<8x1xi32>
    %158 = tpu.iota {dimensions = array<i32: 1>} : vector<8x2xi32>
    %159 = vector.broadcast %157 : vector<8x1xi32> to vector<8x2xi32>
    %160 = arith.cmpi eq, %158, %159 : vector<8x2xi32>
    %161 = arith.extui %160 : vector<8x2xi1> to vector<8x2xi32>
    %162 = arith.sitofp %161 : vector<8x2xi32> to vector<8x2xf32>
    %cst_78 = arith.constant dense<0xFF800000> : vector<8xf32>
    %163 = vector.multi_reduction <maximumf>, %105, %cst_78 [1] : vector<8x2xf32> to vector<8xf32>
    %164 = vector.shape_cast %163 : vector<8xf32> to vector<8x1xf32>
    %165 = vector.broadcast %164 : vector<8x1xf32> to vector<8x2xf32>
    %166 = arith.subf %105, %165 : vector<8x2xf32>
    %167 = math.exp %166 : vector<8x2xf32>
    %cst_79 = arith.constant dense<0.000000e+00> : vector<8xf32>
    %168 = vector.multi_reduction <add>, %167, %cst_79 [1] : vector<8x2xf32> to vector<8xf32>
    %169 = vector.shape_cast %168 : vector<8xf32> to vector<8x1xf32>
    %170 = math.log %169 : vector<8x1xf32>
    %171 = vector.broadcast %170 : vector<8x1xf32> to vector<8x2xf32>
    %172 = arith.subf %166, %171 : vector<8x2xf32>
    %173 = arith.mulf %162, %172 : vector<8x2xf32>
    %cst_80 = arith.constant dense<0.000000e+00> : vector<8xf32>
    %174 = vector.multi_reduction <add>, %173, %cst_80 [1] : vector<8x2xf32> to vector<8xf32>
    %175 = vector.shape_cast %174 : vector<8xf32> to vector<8x1xf32>
    %cst_81 = arith.constant 0.000000e+00 : f32
    %176 = vector.broadcast %cst_81 : f32 to vector<8x1xf32>
    %177 = arith.subf %176, %175 : vector<8x1xf32>
    %cst_82 = arith.constant dense<0.000000e+00> : vector<8xf32>
    %178 = vector.multi_reduction <add>, %177, %cst_82 [1] : vector<8x1xf32> to vector<8xf32>
    %179 = vector.shape_cast %178 : vector<8xf32> to vector<8x1xf32>
    %cst_83 = arith.constant dense<0.000000e+00> : vector<1xf32>
    %180 = vector.multi_reduction <add>, %179, %cst_83 [0] : vector<8x1xf32> to vector<1xf32>
    %181 = vector.shape_cast %180 : vector<1xf32> to vector<1x1xf32>
    %cst_84 = arith.constant 8.000000e+00 : f32
    %182 = vector.broadcast %cst_84 : f32 to vector<1x1xf32>
    %183 = arith.divf %181, %182 : vector<1x1xf32>
    %cst_85 = arith.constant dense<0xFF800000> : vector<8xf32>
    %184 = vector.multi_reduction <maximumf>, %1, %cst_85 [1] : vector<8x512xf32> to vector<8xf32>
    %185 = vector.shape_cast %184 : vector<8xf32> to vector<8x1xf32>
    %186 = vector.broadcast %185 : vector<8x1xf32> to vector<8x512xf32>
    %187 = arith.subf %1, %186 : vector<8x512xf32>
    %188 = math.exp %187 : vector<8x512xf32>
    %cst_86 = arith.constant dense<0.000000e+00> : vector<8xf32>
    %189 = vector.multi_reduction <add>, %188, %cst_86 [1] : vector<8x512xf32> to vector<8xf32>
    %190 = vector.shape_cast %189 : vector<8xf32> to vector<8x1xf32>
    %191 = vector.broadcast %190 : vector<8x1xf32> to vector<8x512xf32>
    %192 = arith.divf %188, %191 : vector<8x512xf32>
    %cst_87 = arith.constant dense<0xFF800000> : vector<8xf32>
    %193 = vector.multi_reduction <maximumf>, %22, %cst_87 [1] : vector<8x512xf32> to vector<8xf32>
    %194 = vector.shape_cast %193 : vector<8xf32> to vector<8x1xf32>
    %195 = vector.broadcast %194 : vector<8x1xf32> to vector<8x512xf32>
    %196 = arith.subf %22, %195 : vector<8x512xf32>
    %197 = math.exp %196 : vector<8x512xf32>
    %cst_88 = arith.constant dense<0.000000e+00> : vector<8xf32>
    %198 = vector.multi_reduction <add>, %197, %cst_88 [1] : vector<8x512xf32> to vector<8xf32>
    %199 = vector.shape_cast %198 : vector<8xf32> to vector<8x1xf32>
    %200 = vector.broadcast %199 : vector<8x1xf32> to vector<8x512xf32>
    %201 = arith.divf %197, %200 : vector<8x512xf32>
    %202 = math.log %201 : vector<8x512xf32>
    %203 = arith.subf %202, %192 : vector<8x512xf32>
    %204 = arith.mulf %201, %203 : vector<8x512xf32>
    %cst_89 = arith.constant dense<0.000000e+00> : vector<8xf32>
    %205 = vector.multi_reduction <add>, %204, %cst_89 [1] : vector<8x512xf32> to vector<8xf32>
    %206 = vector.shape_cast %205 : vector<8xf32> to vector<8x1xf32>
    %cst_90 = arith.constant dense<0.000000e+00> : vector<1xf32>
    %207 = vector.multi_reduction <add>, %206, %cst_90 [0] : vector<8x1xf32> to vector<1xf32>
    %208 = vector.shape_cast %207 : vector<1xf32> to vector<1x1xf32>
    %cst_91 = arith.constant 4.096000e+03 : f32
    %209 = vector.broadcast %cst_91 : f32 to vector<1x1xf32>
    %210 = arith.divf %208, %209 : vector<1x1xf32>
    %cst_92 = arith.constant dense<0xFF800000> : vector<8xf32>
    %211 = vector.multi_reduction <maximumf>, %27, %cst_92 [1] : vector<8x512xf32> to vector<8xf32>
    %212 = vector.shape_cast %211 : vector<8xf32> to vector<8x1xf32>
    %213 = vector.broadcast %212 : vector<8x1xf32> to vector<8x512xf32>
    %214 = arith.subf %27, %213 : vector<8x512xf32>
    %215 = math.exp %214 : vector<8x512xf32>
    %cst_93 = arith.constant dense<0.000000e+00> : vector<8xf32>
    %216 = vector.multi_reduction <add>, %215, %cst_93 [1] : vector<8x512xf32> to vector<8xf32>
    %217 = vector.shape_cast %216 : vector<8xf32> to vector<8x1xf32>
    %218 = vector.broadcast %217 : vector<8x1xf32> to vector<8x512xf32>
    %219 = arith.divf %215, %218 : vector<8x512xf32>
    %cst_94 = arith.constant dense<0xFF800000> : vector<8xf32>
    %220 = vector.multi_reduction <maximumf>, %46, %cst_94 [1] : vector<8x512xf32> to vector<8xf32>
    %221 = vector.shape_cast %220 : vector<8xf32> to vector<8x1xf32>
    %222 = vector.broadcast %221 : vector<8x1xf32> to vector<8x512xf32>
    %223 = arith.subf %46, %222 : vector<8x512xf32>
    %224 = math.exp %223 : vector<8x512xf32>
    %cst_95 = arith.constant dense<0.000000e+00> : vector<8xf32>
    %225 = vector.multi_reduction <add>, %224, %cst_95 [1] : vector<8x512xf32> to vector<8xf32>
    %226 = vector.shape_cast %225 : vector<8xf32> to vector<8x1xf32>
    %227 = vector.broadcast %226 : vector<8x1xf32> to vector<8x512xf32>
    %228 = arith.divf %224, %227 : vector<8x512xf32>
    %229 = math.log %228 : vector<8x512xf32>
    %230 = arith.subf %229, %219 : vector<8x512xf32>
    %231 = arith.mulf %228, %230 : vector<8x512xf32>
    %cst_96 = arith.constant dense<0.000000e+00> : vector<8xf32>
    %232 = vector.multi_reduction <add>, %231, %cst_96 [1] : vector<8x512xf32> to vector<8xf32>
    %233 = vector.shape_cast %232 : vector<8xf32> to vector<8x1xf32>
    %cst_97 = arith.constant dense<0.000000e+00> : vector<1xf32>
    %234 = vector.multi_reduction <add>, %233, %cst_97 [0] : vector<8x1xf32> to vector<1xf32>
    %235 = vector.shape_cast %234 : vector<1xf32> to vector<1x1xf32>
    %cst_98 = arith.constant 4.096000e+03 : f32
    %236 = vector.broadcast %cst_98 : f32 to vector<1x1xf32>
    %237 = arith.divf %235, %236 : vector<1x1xf32>
    %238 = arith.addf %210, %237 : vector<1x1xf32>
    %239 = arith.subf %150, %155 : vector<8x8xf32>
    %240 = arith.mulf %239, %239 : vector<8x8xf32>
    %cst_99 = arith.constant dense<0.000000e+00> : vector<8xf32>
    %241 = vector.multi_reduction <add>, %240, %cst_99 [1] : vector<8x8xf32> to vector<8xf32>
    %242 = vector.shape_cast %241 : vector<8xf32> to vector<8x1xf32>
    %cst_100 = arith.constant dense<0.000000e+00> : vector<1xf32>
    %243 = vector.multi_reduction <add>, %242, %cst_100 [0] : vector<8x1xf32> to vector<1xf32>
    %244 = vector.shape_cast %243 : vector<1xf32> to vector<1x1xf32>
    %cst_101 = arith.constant 6.400000e+01 : f32
    %245 = vector.broadcast %cst_101 : f32 to vector<1x1xf32>
    %246 = arith.divf %244, %245 : vector<1x1xf32>
    %cst_102 = arith.constant 1.500000e+00 : f32
    %247 = vector.broadcast %cst_102 : f32 to vector<8x8xf32>
    %248 = arith.mulf %247, %114 : vector<8x8xf32>
    %249 = arith.subf %132, %248 : vector<8x8xf32>
    %250 = arith.mulf %249, %249 : vector<8x8xf32>
    %cst_103 = arith.constant dense<0.000000e+00> : vector<8xf32>
    %251 = vector.multi_reduction <add>, %250, %cst_103 [1] : vector<8x8xf32> to vector<8xf32>
    %252 = vector.shape_cast %251 : vector<8xf32> to vector<8x1xf32>
    %cst_104 = arith.constant dense<0.000000e+00> : vector<1xf32>
    %253 = vector.multi_reduction <add>, %252, %cst_104 [0] : vector<8x1xf32> to vector<1xf32>
    %254 = vector.shape_cast %253 : vector<1xf32> to vector<1x1xf32>
    %cst_105 = arith.constant 6.400000e+01 : f32
    %255 = vector.broadcast %cst_105 : f32 to vector<1x1xf32>
    %256 = arith.divf %254, %255 : vector<1x1xf32>
    %cst_106 = arith.constant 1.500000e+00 : f32
    %257 = vector.broadcast %cst_106 : f32 to vector<8x8xf32>
    %258 = arith.mulf %257, %123 : vector<8x8xf32>
    %259 = arith.subf %141, %258 : vector<8x8xf32>
    %260 = arith.mulf %259, %259 : vector<8x8xf32>
    %cst_107 = arith.constant dense<0.000000e+00> : vector<8xf32>
    %261 = vector.multi_reduction <add>, %260, %cst_107 [1] : vector<8x8xf32> to vector<8xf32>
    %262 = vector.shape_cast %261 : vector<8xf32> to vector<8x1xf32>
    %cst_108 = arith.constant dense<0.000000e+00> : vector<1xf32>
    %263 = vector.multi_reduction <add>, %262, %cst_108 [0] : vector<8x1xf32> to vector<1xf32>
    %264 = vector.shape_cast %263 : vector<1xf32> to vector<1x1xf32>
    %cst_109 = arith.constant 6.400000e+01 : f32
    %265 = vector.broadcast %cst_109 : f32 to vector<1x1xf32>
    %266 = arith.divf %264, %265 : vector<1x1xf32>
    %267 = arith.subf %132, %141 : vector<8x8xf32>
    %268 = arith.mulf %267, %267 : vector<8x8xf32>
    %cst_110 = arith.constant dense<0.000000e+00> : vector<8xf32>
    %269 = vector.multi_reduction <add>, %268, %cst_110 [1] : vector<8x8xf32> to vector<8xf32>
    %270 = vector.shape_cast %269 : vector<8xf32> to vector<8x1xf32>
    %cst_111 = arith.constant dense<0.000000e+00> : vector<1xf32>
    %271 = vector.multi_reduction <add>, %270, %cst_111 [0] : vector<8x1xf32> to vector<1xf32>
    %272 = vector.shape_cast %271 : vector<1xf32> to vector<1x1xf32>
    %cst_112 = arith.constant 6.400000e+01 : f32
    %273 = vector.broadcast %cst_112 : f32 to vector<1x1xf32>
    %274 = arith.divf %272, %273 : vector<1x1xf32>
    %275 = arith.addf %183, %238 : vector<1x1xf32>
    %276 = arith.addf %275, %246 : vector<1x1xf32>
    %277 = arith.addf %276, %274 : vector<1x1xf32>
    %278 = arith.addf %256, %266 : vector<1x1xf32>
    %cst_113 = arith.constant 1.000000e-01 : f32
    %279 = vector.broadcast %cst_113 : f32 to vector<1x1xf32>
    %280 = arith.mulf %279, %278 : vector<1x1xf32>
    %281 = arith.addf %277, %280 : vector<1x1xf32>
    %282 = tpu.iota {dimensions = array<i32: 1>} : vector<8x128xi32>
    %c2_i32 = arith.constant 2 : i32
    %283 = vector.broadcast %c2_i32 : i32 to vector<8x128xi32>
    %284 = arith.cmpi eq, %282, %283 : vector<8x128xi32>
    %285 = arith.extui %284 : vector<8x128xi1> to vector<8x128xi32>
    %286 = arith.sitofp %285 : vector<8x128xi32> to vector<8x128xf32>
    %287 = vector.broadcast %281 : vector<1x1xf32> to vector<8x128xf32>
    %288 = arith.mulf %287, %286 : vector<8x128xf32>
    %289 = arith.addf %104, %288 : vector<8x128xf32>
    %c0_114 = arith.constant 0 : index
    %c0_115 = arith.constant 0 : index
    %c0_116 = arith.constant 0 : index
    %290 = vector.load %arg15[%c0_114, %c0_115, %c0_116] : memref<1x8x128xf32, #tpu.memory_space<vmem>>, vector<1x8x128xf32>
    %291 = vector.shape_cast %290 : vector<1x8x128xf32> to vector<8x128xf32>
    %292 = vector.shape_cast %289 : vector<8x128xf32> to vector<1x8x128xf32>
    tpu.vector_store %arg15[%c0_114, %c0_115, %c0_116], %292 {strides = array<i32>} : memref<1x8x128xf32, #tpu.memory_space<vmem>>, vector<1x8x128xf32>,
    return
  }
  func.func @transform_0(%arg0: i32) -> (i32, i32, i32) {
    %c0_i32 = arith.constant 0 : i32
    %c0_i32_0 = arith.constant 0 : i32
    %c0_i32_1 = arith.constant 0 : i32
    return %arg0, %c0_i32, %c0_i32_0 : i32, i32, i32
  }
  func.func @transform_1(%arg0: i32) -> (i32, i32, i32) {
    %c0_i32 = arith.constant 0 : i32
    %c0_i32_0 = arith.constant 0 : i32
    %c0_i32_1 = arith.constant 0 : i32
    return %arg0, %c0_i32, %c0_i32_0 : i32, i32, i32
  }
  func.func @transform_2(%arg0: i32) -> (i32, i32, i32) {
    %c0_i32 = arith.constant 0 : i32
    %c0_i32_0 = arith.constant 0 : i32
    %c0_i32_1 = arith.constant 0 : i32
    return %arg0, %c0_i32, %c0_i32_0 : i32, i32, i32
  }
  func.func @transform_3(%arg0: i32) -> (i32, i32) {
    %c0_i32 = arith.constant 0 : i32
    %c0_i32_0 = arith.constant 0 : i32
    %c0_i32_1 = arith.constant 0 : i32
    return %c0_i32, %c0_i32_0 : i32, i32
  }
  func.func @transform_4(%arg0: i32) -> (i32, i32) {
    %c0_i32 = arith.constant 0 : i32
    %c0_i32_0 = arith.constant 0 : i32
    %c0_i32_1 = arith.constant 0 : i32
    return %c0_i32, %c0_i32_0 : i32, i32
  }
  func.func @transform_5(%arg0: i32) -> (i32, i32) {
    %c0_i32 = arith.constant 0 : i32
    %c0_i32_0 = arith.constant 0 : i32
    %c0_i32_1 = arith.constant 0 : i32
    return %c0_i32, %c0_i32_0 : i32, i32
  }
  func.func @transform_6(%arg0: i32) -> (i32, i32) {
    %c0_i32 = arith.constant 0 : i32
    %c0_i32_0 = arith.constant 0 : i32
    %c0_i32_1 = arith.constant 0 : i32
    return %c0_i32, %c0_i32_0 : i32, i32
  }
  func.func @transform_7(%arg0: i32) -> (i32, i32) {
    %c0_i32 = arith.constant 0 : i32
    %c0_i32_0 = arith.constant 0 : i32
    %c0_i32_1 = arith.constant 0 : i32
    return %c0_i32, %c0_i32_0 : i32, i32
  }
  func.func @transform_8(%arg0: i32) -> (i32, i32) {
    %c0_i32 = arith.constant 0 : i32
    %c0_i32_0 = arith.constant 0 : i32
    %c0_i32_1 = arith.constant 0 : i32
    return %c0_i32, %c0_i32_0 : i32, i32
  }
  func.func @transform_9(%arg0: i32) -> (i32, i32) {
    %c0_i32 = arith.constant 0 : i32
    %c0_i32_0 = arith.constant 0 : i32
    %c0_i32_1 = arith.constant 0 : i32
    return %c0_i32, %c0_i32_0 : i32, i32
  }
  func.func @transform_10(%arg0: i32) -> (i32, i32) {
    %c0_i32 = arith.constant 0 : i32
    %c0_i32_0 = arith.constant 0 : i32
    %c0_i32_1 = arith.constant 0 : i32
    return %c0_i32, %c0_i32_0 : i32, i32
  }
  func.func @transform_11(%arg0: i32) -> (i32, i32) {
    %c0_i32 = arith.constant 0 : i32
    %c0_i32_0 = arith.constant 0 : i32
    %c0_i32_1 = arith.constant 0 : i32
    return %c0_i32, %c0_i32_0 : i32, i32
  }
  func.func @transform_12(%arg0: i32) -> (i32, i32) {
    %c0_i32 = arith.constant 0 : i32
    %c0_i32_0 = arith.constant 0 : i32
    %c0_i32_1 = arith.constant 0 : i32
    return %c0_i32, %c0_i32_0 : i32, i32
  }
  func.func @transform_13(%arg0: i32) -> (i32, i32) {
    %c0_i32 = arith.constant 0 : i32
    %c0_i32_0 = arith.constant 0 : i32
    %c0_i32_1 = arith.constant 0 : i32
    return %c0_i32, %c0_i32_0 : i32, i32
  }
  func.func @transform_14(%arg0: i32) -> (i32, i32, i32) {
    %c0_i32 = arith.constant 0 : i32
    %c0_i32_0 = arith.constant 0 : i32
    %c0_i32_1 = arith.constant 0 : i32
    return %arg0, %c0_i32, %c0_i32_0 : i32, i32, i32
  }
}

</mosaic_0001>

<bundles_post_ra>
// kernel: model_forward_batched.1
= control target key start
LH: loop header
LB: loop body
LE: loop exit
PB: predicated region body
PF: predicated region fallthrough
CT: control target
= control target key end

     0   :  { %s7526_s0 = inlined_call_operand.hbm [shape: f32[4,8,512], index: 0, kind: input, shape index: {}]   ;;  %s7527_s1 = inlined_call_operand.hbm [shape: f32[4,8,768], index: 1, kind: input, shape index: {}]   ;;  %s7528_s2 = inlined_call_operand.vmem [shape: s32[4,8,1], index: 2, kind: input, shape index: {}]   ;;  %s7529_s3 = inlined_call_operand.hbm [shape: f32[512,256], index: 3, kind: input, shape index: {}]   ;;  %s7530_s4 = inlined_call_operand.hbm [shape: f32[256,128], index: 4, kind: input, shape index: {}]   ;;  %s7531_s5 = inlined_call_operand.hbm [shape: f32[128,512], index: 5, kind: input, shape index: {}]   ;;  %s7532_s6 = inlined_call_operand.hbm [shape: f32[768,512], index: 6, kind: input, shape index: {}]   ;;  %s7533_s7 = inlined_call_operand.hbm [shape: f32[512,256], index: 7, kind: input, shape index: {}]   ;;  %s7534_s8 = inlined_call_operand.hbm [shape: f32[256,128], index: 8, kind: input, shape index: {}]   ;;  %s7535_s9 = inlined_call_operand.hbm [shape: f32[128,512], index: 9, kind: input, shape index: {}]   ;;  %s7536_s10 = inlined_call_operand.hbm [shape: f32[512,128], index: 10, kind: input, shape index: {}]   ;;  %s7537_s11 = inlined_call_operand.hbm [shape: f32[128,128], index: 11, kind: input, shape index: {}]   ;;  %s7538_s12 = inlined_call_operand.hbm [shape: f32[128,128], index: 12, kind: input, shape index: {}]   ;;  %s7539_s13 = inlined_call_operand.hbm [shape: f32[1,3328], index: 13, kind: input, shape index: {}]   ;;  %s7540_s14 = inlined_call_operand.vmem [shape: f32[4,8,128], index: 14, kind: output, shape index: {}]  }
   0x1   :  { %7556 = sst [smem:[#allocation31_spill]] %s7526_s0 }
   0x2   :  { %7557 = sst [smem:[#allocation32_spill]] %s7527_s1 }
   0x3   :  { %7558 = sst [smem:[#allocation33_spill]] %s7528_s2 }
   0x4   :  { %7559 = sst [smem:[#allocation34_spill]] %s7529_s3 }
   0x5   :  { %7560 = sst [smem:[#allocation35_spill]] %s7530_s4 }
   0x6   :  { %7561 = sst [smem:[#allocation36_spill]] %s7531_s5 }
   0x7   :  { %7562 = sst [smem:[#allocation37_spill]] %s7532_s6 }
   0x8   :  { %7563 = sst [smem:[#allocation38_spill]] %s7540_s14 }
   0x9   :  { %19 = vsyncpa [#allocation3], 0 }
   0xa   :  { %21 = vsyncpa [#allocation3 + $0x1], 0 }
   0xb   :  { %22 = vsyncpa [#allocation5], 0 }
   0xc   :  { %24 = vsyncpa [#allocation5 + $0x1], 0 }
   0xd   :  { %25 = vsyncpa [#allocation8], 0 }
   0xe   :  { %26 = vsyncpa [#allocation11], 0 }
   0xf   :  { %27 = vsyncpa [#allocation14], 0 }
  0x10   :  { %28 = vsyncpa [#allocation17], 0 }
  0x11   :  { %29 = vsyncpa [#allocation20], 0  ;;  %s6624_s29 = smov 0   ;;  %s6626_s30 = smov 0  }
  0x12   :  { %s6628_s15 = smov 0   ;;  %s6630_s16 = smov 0  }
  0x13 LB: > { %s6526_s17 = smov [#allocation6]   ;;  %s6645_s19 = sadd.s32 4294967295, %s6524_s16   ;;  %s6524_s16 = sphi %s6630_s16, %s7603_s16   ;;  %s6520_s15 = sphi %s6628_s15, %s7602_s15   ;;  %s6516_s30 = sphi %s6626_s30, %s7601_s30   ;;  %s6512_s29 = sphi %s6624_s29, %s7600_s29  }
  0x14   : > { %s387_s18 = sshll.u32 %s6526_s17, 4  ;;  %p4560_p0 = scmp.ge.s32.totalorder %s6524_s16, 1  ;;  %s6650_s18 = int_to_ptr.vmem [resolvable:$true] %s387_s18 }
  0x15   : > { %p7546_p1 = scmp.eq.s32.totalorder %s6645_s19, 0  ;;  %p375_p2 = scmp.lt.s32.totalorder %s6524_s16, 5 }
  0x16   : > { %s6527_s21 = smov [#allocation7]   ;;  %s7567_s3 = sld [smem:[#allocation34_spill]] }
  0x17   : > { %p6652_p3 = pnand %p4560_p0, %p375_p2  ;;  %s400_s22 = sshll.u32 %s6527_s21, 4  ;;  %s6664_s22 = int_to_ptr.vmem [resolvable:$true] %s400_s22 }
  0x19   : > { %s7564_s20 = scalar_select %p6652_p3, 1, 0 }
  0x1a   : > { %p5873_p4 = pneg %p6652_p3 }
  0x1b   : > { %7565 = sst [smem:[#allocation30_spill]] %s7564_s20 }
  0x1c   : > { %p6660_p5 = pnand %p5873_p4, %p7546_p1  ;;  %s6094_s26 = scalar_lea.hbm %s7567_s3, 16384 }
  0x1d   : > { %p6095_p6 = scmp.ne.s32.totalorder %s7567_s3, %s6094_s26  ;;  %p6101_p10 = scmp.lt.u32.totalorder %s6094_s26, %s7567_s3 }
  0x1e   : > { %p6674_p7 = pneg %p6660_p5 }
  0x20   : > { %p6097_p8 = pnand %p6674_p7, %p6095_p6 }
  0x22   : > { %p6098_p9 = pneg %p6097_p8 }
  0x24   : > { %p6103_p11 = pnand %p6101_p10, %p6098_p9 }
  0x26   : > { %6106 = shalt.err (!%p6103_p11)
}
  0x27   : > { %s6107_s24 = scalar_lea.vmem %s6650_s18, 16384  ;;  %p6115_p2 = scmp.lt.s32.totalorder %s6650_s18, %s6650_s18 }
  0x28   : > { %p6108_p12 = scmp.ne.s32.totalorder %s6650_s18, %s6107_s24  ;;  %p6116_p4 = scmp.lt.s32.totalorder %s6107_s24, %s6107_s24 }
  0x2a   : > { %p6110_p13 = pnand %p6108_p12, %p6674_p7  ;;  %p6117_p6 = por %p6116_p4, %p6115_p2 }
  0x2c   : > { %p6111_p0 = pneg %p6110_p13 }
  0x2e   : > { %p6118_p8 = pnand %p6117_p6, %p6111_p0 }
  0x30   : > { %6121 = shalt.err (!%p6118_p8)
}
  0x31   : > { %s7544_s25 = smov 256   ;;  %s7545_s14 = smov 16  }
  0x32   : > { %5876 = dma.hbm_to_vmem [thread:$0]  (!%p6660_p5), %s7567_s3, 16384, %s6650_s18, [#allocation5], %s7544_s25, %s7544_s25, %s7545_s14  }
  0x33   : > { %s7569_s4 = sld [smem:[#allocation35_spill]] }
  0x39   : > { %s6122_s24 = scalar_lea.hbm %s7569_s4, 4096 }
  0x3a   : > { %p6123_p9 = scmp.ne.s32.totalorder %s7569_s4, %s6122_s24  ;;  %p6129_p12 = scmp.lt.u32.totalorder %s6122_s24, %s7569_s4 }
  0x3c   : > { %p6125_p10 = pnand %p6123_p9, %p6674_p7 }
  0x3e   : > { %p6126_p11 = pneg %p6125_p10 }
  0x40   : > { %p6131_p13 = pnand %p6129_p12, %p6126_p11 }
  0x42   : > { %6134 = shalt.err (!%p6131_p13)
}
  0x43   : > { %s6135_s18 = scalar_lea.vmem %s6664_s22, 4096  ;;  %p6143_p6 = scmp.lt.s32.totalorder %s6664_s22, %s6664_s22 }
  0x44   : > { %p6136_p0 = scmp.ne.s32.totalorder %s6664_s22, %s6135_s18  ;;  %p6144_p8 = scmp.lt.s32.totalorder %s6135_s18, %s6135_s18 }
  0x46   : > { %p6138_p2 = pnand %p6136_p0, %p6674_p7  ;;  %p6145_p9 = por %p6144_p8, %p6143_p6 }
  0x48   : > { %p6139_p4 = pneg %p6138_p2 }
  0x4a   : > { %p6146_p10 = pnand %p6145_p9, %p6139_p4 }
  0x4c   : > { %6149 = shalt.err (!%p6146_p10)
}
  0x4d   : > { %s7548_s2 = smov 128   ;;  %s7554_s0 = smov 8  }
  0x4e   : > { %5879 = dma.hbm_to_vmem [thread:$0]  (!%p6660_p5), %s7569_s4, 4096, %s6664_s22, [#allocation8], %s7548_s2, %s7548_s2, %s7554_s0  }
  0x4f   : > { %s6532_s26 = smov [#allocation10]   ;;  %s6533_s28 = smov [#allocation13]  }
  0x50   : > { %s426_s27 = sshll.u32 %s6532_s26, 4  ;;  %s452_s21 = sshll.u32 %s6533_s28, 4  ;;  %s427_s27 = int_to_ptr.vmem [resolvable:$true] %s426_s27  ;;  %s6724_s21 = int_to_ptr.vmem [resolvable:$true] %s452_s21 }
  0x51   : > { %s7570_s6 = sld [smem:[#allocation37_spill]] }
  0x57   : > { %s6150_s25 = scalar_lea.hbm %s7570_s6, 49152 }
  0x58   : > { %p6151_p11 = scmp.ne.s32.totalorder %s7570_s6, %s6150_s25  ;;  %p6157_p0 = scmp.lt.u32.totalorder %s6150_s25, %s7570_s6 }
  0x5a   : > { %p6153_p12 = pnand %p6151_p11, %p6674_p7 }
  0x5c   : > { %p6154_p13 = pneg %p6153_p12 }
  0x5e   : > { %p6159_p2 = pnand %p6157_p0, %p6154_p13 }
  0x60   : > { %6162 = shalt.err (!%p6159_p2)
}
  0x61   : > { %s6163_s20 = scalar_lea.vmem %s427_s27, 49152  ;;  %p6171_p9 = scmp.lt.s32.totalorder %s427_s27, %s427_s27 }
  0x62   : > { %p6164_p4 = scmp.ne.s32.totalorder %s427_s27, %s6163_s20  ;;  %p6172_p10 = scmp.lt.s32.totalorder %s6163_s20, %s6163_s20 }
  0x64   : > { %p6166_p6 = pnand %p6164_p4, %p6674_p7  ;;  %p6173_p1 = por %p6172_p10, %p6171_p9 }
  0x66   : > { %p6167_p8 = pneg %p6166_p6 }
  0x68   : > { %p6174_p3 = pnand %p6173_p1, %p6167_p8 }
  0x6a   : > { %6177 = shalt.err (!%p6174_p3)
}
  0x6b   : > { %s7550_s3 = smov 512   ;;  %s7552_s14 = smov 32  }
  0x6c   : > { %5885 = dma.hbm_to_vmem [thread:$0]  (!%p6660_p5), %s7570_s6, 49152, %s427_s27, [#allocation11], %s7550_s3, %s7550_s3, %s7552_s14  }
  0x6d   : > { %s6178_s18 = scalar_lea.hbm %s7534_s8, 4096 }
  0x6e   : > { %p6179_p1 = scmp.ne.s32.totalorder %s7534_s8, %s6178_s18  ;;  %p6185_p12 = scmp.lt.u32.totalorder %s6178_s18, %s7534_s8 }
  0x70   : > { %p6181_p3 = pnand %p6179_p1, %p6674_p7 }
  0x72   : > { %p6182_p11 = pneg %p6181_p3 }
  0x74   : > { %p6187_p13 = pnand %p6185_p12, %p6182_p11 }
  0x76   : > { %6190 = shalt.err (!%p6187_p13)
}
  0x77   : > { %s6191_s27 = scalar_lea.vmem %s6724_s21, 4096  ;;  %p6199_p6 = scmp.lt.s32.totalorder %s6724_s21, %s6724_s21 }
  0x78   : > { %p6192_p0 = scmp.ne.s32.totalorder %s6724_s21, %s6191_s27  ;;  %p6200_p8 = scmp.lt.s32.totalorder %s6191_s27, %s6191_s27 }
  0x7a   : > { %p6194_p2 = pnand %p6192_p0, %p6674_p7  ;;  %p6201_p9 = por %p6200_p8, %p6199_p6 }
  0x7c   : > { %p6195_p4 = pneg %p6194_p2 }
  0x7e   : > { %p6202_p10 = pnand %p6201_p9, %p6195_p4 }
  0x80   : > { %6205 = shalt.err (!%p6202_p10)
}
  0x81   : > { %s7571_s2 = smov 128   ;;  %s6536_s28 = smov [#allocation16]  }
  0x82   : > { %5891 = dma.hbm_to_vmem [thread:$0]  (!%p6660_p5), %s7534_s8, 4096, %s6724_s21, [#allocation14], %s7571_s2, %s7571_s2, %s7554_s0  }
  0x83   : > { %s478_s24 = sshll.u32 %s6536_s28, 4  ;;  %s6537_s18 = smov [#allocation19]   ;;  %s479_s24 = int_to_ptr.vmem [resolvable:$true] %s478_s24 }
  0x84   : > { %s504_s1 = sshll.u32 %s6537_s18, 4  ;;  %s6206_s27 = scalar_lea.hbm %s7536_s10, 8192  ;;  %s6773_s1 = int_to_ptr.vmem [resolvable:$true] %s504_s1 }
  0x85   : > { %p6207_p1 = scmp.ne.s32.totalorder %s7536_s10, %s6206_s27  ;;  %p6213_p12 = scmp.lt.u32.totalorder %s6206_s27, %s7536_s10 }
  0x87   : > { %p6209_p3 = pnand %p6207_p1, %p6674_p7 }
  0x89   : > { %p6210_p11 = pneg %p6209_p3 }
  0x8b   : > { %p6215_p13 = pnand %p6213_p12, %p6210_p11 }
  0x8d   : > { %6218 = shalt.err (!%p6215_p13)
}
  0x8e   : > { %s6219_s26 = scalar_lea.vmem %s479_s24, 8192  ;;  %p6227_p6 = scmp.lt.s32.totalorder %s479_s24, %s479_s24 }
  0x8f   : > { %p6220_p0 = scmp.ne.s32.totalorder %s479_s24, %s6219_s26  ;;  %p6228_p8 = scmp.lt.s32.totalorder %s6219_s26, %s6219_s26 }
  0x91   : > { %p6222_p2 = pnand %p6220_p0, %p6674_p7  ;;  %p6229_p9 = por %p6228_p8, %p6227_p6 }
  0x93   : > { %p6223_p4 = pneg %p6222_p2 }
  0x95   : > { %p6230_p10 = pnand %p6229_p9, %p6223_p4 }
  0x97   : > { %6233 = shalt.err (!%p6230_p10)
}
  0x98   : > { %5897 = dma.hbm_to_vmem [thread:$0]  (!%p6660_p5), %s7536_s10, 8192, %s479_s24, [#allocation17], %s7571_s2, %s7571_s2, %s7554_s0  }
  0x99   : > { %s6234_s22 = scalar_lea.hbm %s7538_s12, 2048 }
  0x9a   : > { %p6235_p1 = scmp.ne.s32.totalorder %s7538_s12, %s6234_s22  ;;  %p6241_p12 = scmp.lt.u32.totalorder %s6234_s22, %s7538_s12 }
  0x9c   : > { %p6237_p3 = pnand %p6235_p1, %p6674_p7 }
  0x9e   : > { %p6238_p11 = pneg %p6237_p3 }
  0xa0   : > { %p6243_p13 = pnand %p6241_p12, %p6238_p11 }
  0xa2   : > { %6246 = shalt.err (!%p6243_p13)
}
  0xa3   : > { %s6247_s24 = scalar_lea.vmem %s6773_s1, 2048  ;;  %p6255_p6 = scmp.lt.s32.totalorder %s6773_s1, %s6773_s1 }
  0xa4   : > { %p6248_p0 = scmp.ne.s32.totalorder %s6773_s1, %s6247_s24  ;;  %p6256_p8 = scmp.lt.s32.totalorder %s6247_s24, %s6247_s24 }
  0xa6   : > { %p6250_p2 = pnand %p6248_p0, %p6674_p7  ;;  %p6257_p9 = por %p6256_p8, %p6255_p6 }
  0xa8   : > { %p6251_p4 = pneg %p6250_p2 }
  0xaa   : > { %p6258_p10 = pnand %p6257_p9, %p6251_p4 }
  0xac   : > { %6261 = shalt.err (!%p6258_p10)
}
  0xad   : > { %5903 = dma.hbm_to_vmem [thread:$0]  (!%p6660_p5), %s7538_s12, 2048, %s6773_s1, [#allocation20], %s7571_s2, %s7571_s2, %s7554_s0  }
  0xae   : > { %s6538_s14 = smov [#allocation9]   ;;  %s6539_s18 = smov [#allocation12]  }
  0xaf   : > { %s413_s28 = sshll.u32 %s6538_s14, 4  ;;  %s439_s22 = sshll.u32 %s6539_s18, 4  ;;  %s414_s28 = int_to_ptr.vmem [resolvable:$true] %s413_s28  ;;  %s6822_s22 = int_to_ptr.vmem [resolvable:$true] %s439_s22 }
  0xb0   : > { %s7572_s5 = sld [smem:[#allocation36_spill]] }
  0xb6   : > { %s6262_s25 = scalar_lea.hbm %s7572_s5, 8192 }
  0xb7   : > { %p6263_p1 = scmp.ne.s32.totalorder %s7572_s5, %s6262_s25  ;;  %p6269_p12 = scmp.lt.u32.totalorder %s6262_s25, %s7572_s5 }
  0xb9   : > { %p6265_p3 = pnand %p6263_p1, %p6674_p7 }
  0xbb   : > { %p6266_p11 = pneg %p6265_p3 }
  0xbd   : > { %p6271_p13 = pnand %p6269_p12, %p6266_p11 }
  0xbf   : > { %6274 = shalt.err (!%p6271_p13)
}
  0xc0   : > { %s6275_s3 = scalar_lea.vmem %s414_s28, 8192  ;;  %p6283_p6 = scmp.lt.s32.totalorder %s414_s28, %s414_s28 }
  0xc1   : > { %p6276_p0 = scmp.ne.s32.totalorder %s414_s28, %s6275_s3  ;;  %p6284_p8 = scmp.lt.s32.totalorder %s6275_s3, %s6275_s3 }
  0xc3   : > { %p6278_p2 = pnand %p6276_p0, %p6674_p7  ;;  %p6285_p9 = por %p6284_p8, %p6283_p6 }
  0xc5   : > { %p6279_p4 = pneg %p6278_p2 }
  0xc7   : > { %p6286_p10 = pnand %p6285_p9, %p6279_p4 }
  0xc9   : > { %6289 = shalt.err (!%p6286_p10)
}
  0xca   : > { %s7573_s14 = smov 32   ;;  %s7574_s18 = smov 512  }
  0xcb   : > { %5882 = dma.hbm_to_vmem [thread:$0]  (!%p6660_p5), %s7572_s5, 8192, %s414_s28, [#allocation8], %s7574_s18, %s7574_s18, %s7573_s14  }
  0xcc   : > { %s6290_s24 = scalar_lea.hbm %s7533_s7, 16384 }
  0xcd   : > { %p6291_p1 = scmp.ne.s32.totalorder %s7533_s7, %s6290_s24  ;;  %p6297_p12 = scmp.lt.u32.totalorder %s6290_s24, %s7533_s7 }
  0xcf   : > { %p6293_p3 = pnand %p6291_p1, %p6674_p7 }
  0xd1   : > { %p6294_p11 = pneg %p6293_p3 }
  0xd3   : > { %p6299_p13 = pnand %p6297_p12, %p6294_p11 }
  0xd5   : > { %6302 = shalt.err (!%p6299_p13)
}
  0xd6   : > { %s6303_s28 = scalar_lea.vmem %s6822_s22, 16384  ;;  %p6311_p6 = scmp.lt.s32.totalorder %s6822_s22, %s6822_s22 }
  0xd7   : > { %p6304_p0 = scmp.ne.s32.totalorder %s6822_s22, %s6303_s28  ;;  %p6312_p8 = scmp.lt.s32.totalorder %s6303_s28, %s6303_s28 }
  0xd9   : > { %p6306_p2 = pnand %p6304_p0, %p6674_p7  ;;  %p6313_p9 = por %p6312_p8, %p6311_p6 }
  0xdb   : > { %p6307_p4 = pneg %p6306_p2 }
  0xdd   : > { %p6314_p10 = pnand %p6313_p9, %p6307_p4 }
  0xdf   : > { %6317 = shalt.err (!%p6314_p10)
}
  0xe0   : > { %s7575_s0 = smov 16   ;;  %s7576_s20 = smov 256  }
  0xe1   : > { %5888 = dma.hbm_to_vmem [thread:$0]  (!%p6660_p5), %s7533_s7, 16384, %s6822_s22, [#allocation11], %s7576_s20, %s7576_s20, %s7575_s0  }
  0xe2   : > { %s6540_s21 = smov [#allocation15]   ;;  %s6541_s26 = smov [#allocation18]  }
  0xe3   : > { %s465_s24 = sshll.u32 %s6540_s21, 4  ;;  %s491_s1 = sshll.u32 %s6541_s26, 4  ;;  %s466_s24 = int_to_ptr.vmem [resolvable:$true] %s465_s24  ;;  %s6871_s1 = int_to_ptr.vmem [resolvable:$true] %s491_s1 }
  0xe4   : > { %s6318_s4 = scalar_lea.hbm %s7535_s9, 8192 }
  0xe5   : > { %p6319_p1 = scmp.ne.s32.totalorder %s7535_s9, %s6318_s4  ;;  %p6325_p12 = scmp.lt.u32.totalorder %s6318_s4, %s7535_s9 }
  0xe7   : > { %p6321_p3 = pnand %p6319_p1, %p6674_p7 }
  0xe9   : > { %p6322_p11 = pneg %p6321_p3 }
  0xeb   : > { %p6327_p13 = pnand %p6325_p12, %p6322_p11 }
  0xed   : > { %6330 = shalt.err (!%p6327_p13)
}
  0xee   : > { %s6331_s0 = scalar_lea.vmem %s466_s24, 8192  ;;  %p6339_p6 = scmp.lt.s32.totalorder %s466_s24, %s466_s24 }
  0xef   : > { %p6332_p0 = scmp.ne.s32.totalorder %s466_s24, %s6331_s0  ;;  %p6340_p8 = scmp.lt.s32.totalorder %s6331_s0, %s6331_s0 }
  0xf1   : > { %p6334_p2 = pnand %p6332_p0, %p6674_p7  ;;  %p6341_p9 = por %p6340_p8, %p6339_p6 }
  0xf3   : > { %p6335_p4 = pneg %p6334_p2 }
  0xf5   : > { %p6342_p10 = pnand %p6341_p9, %p6335_p4 }
  0xf7   : > { %6345 = shalt.err (!%p6342_p10)
}
  0xf8   : > { %5894 = dma.hbm_to_vmem [thread:$0]  (!%p6660_p5), %s7535_s9, 8192, %s466_s24, [#allocation14], %s7574_s18, %s7574_s18, %s7573_s14  }
  0xf9   : > { %s6346_s25 = scalar_lea.hbm %s7537_s11, 2048 }
  0xfa   : > { %p6347_p1 = scmp.ne.s32.totalorder %s7537_s11, %s6346_s25  ;;  %p6353_p12 = scmp.lt.u32.totalorder %s6346_s25, %s7537_s11 }
  0xfc   : > { %p6349_p3 = pnand %p6347_p1, %p6674_p7 }
  0xfe   : > { %p6350_p11 = pneg %p6349_p3 }
 0x100   : > { %p6355_p13 = pnand %p6353_p12, %p6350_p11 }
 0x102   : > { %6358 = shalt.err (!%p6355_p13)
}
 0x103   : > { %s6359_s14 = scalar_lea.vmem %s6871_s1, 2048  ;;  %p6367_p6 = scmp.lt.s32.totalorder %s6871_s1, %s6871_s1 }
 0x104   : > { %p6360_p0 = scmp.ne.s32.totalorder %s6871_s1, %s6359_s14  ;;  %p6368_p8 = scmp.lt.s32.totalorder %s6359_s14, %s6359_s14 }
 0x106   : > { %p6362_p2 = pnand %p6360_p0, %p6674_p7  ;;  %p6369_p9 = por %p6368_p8, %p6367_p6 }
 0x108   : > { %p6363_p4 = pneg %p6362_p2 }
 0x10a   : > { %p6370_p10 = pnand %p6369_p9, %p6363_p4 }
 0x10c   : > { %6373 = shalt.err (!%p6370_p10)
}
 0x10d   : > { %s7577_s18 = smov 8   ;;  %s6542_s22 = smov [#allocation21]  }
 0x10e   : > { %5900 = dma.hbm_to_vmem [thread:$0]  (!%p6660_p5), %s7537_s11, 2048, %s6871_s1, [#allocation17], %s7571_s2, %s7571_s2, %s7577_s18  }
 0x10f   : > { %s518_s0 = sshll.u32 %s6542_s22, 4  ;;  %s6374_s6 = scalar_lea.hbm %s7539_s13, 416  ;;  %s519_s0 = int_to_ptr.vmem [resolvable:$true] %s518_s0 }
 0x110   : > { %p6375_p1 = scmp.ne.s32.totalorder %s7539_s13, %s6374_s6  ;;  %p6381_p12 = scmp.lt.u32.totalorder %s6374_s6, %s7539_s13 }
 0x112   : > { %p6377_p3 = pnand %p6375_p1, %p6674_p7 }
 0x114   : > { %p6378_p11 = pneg %p6377_p3 }
 0x116   : > { %p6383_p13 = pnand %p6381_p12, %p6378_p11 }
 0x118   : > { %6386 = shalt.err (!%p6383_p13)
}
 0x119   : > { %s6387_s2 = scalar_lea.vmem %s519_s0, 416  ;;  %p6395_p6 = scmp.lt.s32.totalorder %s519_s0, %s519_s0 }
 0x11a   : > { %p6388_p0 = scmp.ne.s32.totalorder %s519_s0, %s6387_s2  ;;  %p6396_p8 = scmp.lt.s32.totalorder %s6387_s2, %s6387_s2 }
 0x11c   : > { %p6390_p2 = pnand %p6388_p0, %p6674_p7  ;;  %p6397_p9 = por %p6396_p8, %p6395_p6 }
 0x11e   : > { %p6391_p4 = pneg %p6390_p2 }
 0x120   : > { %p6398_p10 = pnand %p6397_p9, %p6391_p4 }
 0x122   : > { %6401 = shalt.err (!%p6398_p10)
}
 0x123   : > { %5906 = dma.hbm_to_vmem [thread:$0]  (!%p6660_p5), %s7539_s13, 416, %s519_s0, [#allocation20]  }
 0x124   : > { %s6939_s17 = sadd.s32 1, %s6524_s16   ;;  %s42_s28 = sadd.s32 1, %s6520_s15 }
 0x125   : > { %s39_s23 = ssub.s32 %s6524_s16, %s6939_s17  ;;  %p49_p1 = scmp.ne.s32.totalorder %s6520_s15, %s6516_s30 }
 0x126   : > { %p40_p7 = scmp.eq.s32.totalorder %s39_s23, 0  ;;  %p50_p3 = scmp.eq.s32.totalorder %s6524_s16, 0 }
 0x127   : > { %p55_p11 = scmp.ne.s32.totalorder %s6516_s30, %s6512_s29  ;;  %p7578_p13 = scmp.eq.s32.totalorder %s6645_s19, 0 }
 0x128   : > { %s6950_s14 = scalar_select %p40_p7, %s6520_s15, %s42_s28  }
 0x129   : > { %p51_p12 = por %p50_p3, %p49_p1  ;;  %p6954_p0 = por %p7578_p13, %p55_p11 }
 0x12a   : > { %p5925_p2 = scmp.lt.s32.totalorder %s6524_s16, 4  ;;  %s6960_s24 = sand.u32 1, %s6520_s15  }
 0x12b   : > { %s7579_s18 = scalar_select %p6954_p0, 1, 0 }
 0x12c   : > { %s4573_s27 = sshll.u32 %s6960_s24, 5  ;;  %s4604_s22 = sshll.u32 %s6524_s16, 9 }
 0x12d   : > { %s7580_s4 = sld [smem:[#allocation31_spill]]  ;;  %s533_s6 = scalar_lea.vmem [#allocation2], %s4573_s27 }
 0x12e   : > { %s541_s20 = sshll.u32 %s533_s6, 4  ;;  %p6971_p5 = pnand %p5925_p2, %p51_p12  ;;  %s6969_s20 = int_to_ptr.vmem [resolvable:$true] %s541_s20 }
 0x12f   : > { %s548_s21 = sand.u32 1, %s6524_s16   ;;  %s5822_s26 = smul.u32 48, %s6960_s24 }
 0x130   : > { %s530_s2 = scalar_lea.sflag [#allocation3], %s6960_s24  ;;  %p6404_p6 = pneg %p6971_p5 }
 0x133   : > { %s6967_s29 = scalar_lea.hbm %s7580_s4, %s4604_s22  ;;  %s6407_s28 = scalar_lea.hbm %s7580_s4, 2048 }
 0x134   : > { %s6402_s1 = scalar_lea.hbm %s6967_s29, 512  ;;  %p6408_p10 = scmp.lt.u32.totalorder %s6967_s29, %s7580_s4 }
 0x135   : > { %p6403_p4 = scmp.ne.s32.totalorder %s6967_s29, %s6402_s1  ;;  %p6409_p7 = scmp.lt.u32.totalorder %s6407_s28, %s6402_s1 }
 0x136   : > { %p6411_p3 = scmp.lt.u32.totalorder %s6402_s1, %s6967_s29 }
 0x137   : > { %p6405_p8 = pnand %p6404_p6, %p6403_p4  ;;  %p6410_p1 = por %p6409_p7, %p6408_p10 }
 0x139   : > { %p6406_p9 = pneg %p6405_p8  ;;  %p6412_p11 = por %p6411_p3, %p6410_p1 }
 0x13b   : > { %p6413_p12 = pnand %p6412_p11, %p6406_p9 }
 0x13d   : > { %6416 = shalt.err (!%p6413_p12)
}
 0x13e   : > { %s6417_s0 = scalar_lea.vmem %s6969_s20, 512  ;;  %s6543_s5 = smov [#allocation2]  }
 0x13f   : > { %p6418_p13 = scmp.ne.s32.totalorder %s6969_s20, %s6417_s0  ;;  %s6422_s6 = sshll.u32 %s6543_s5, 4  ;;  %s6423_s6 = int_to_ptr.vmem [resolvable:$false] %s6422_s6 }
 0x140   : > { %s6424_s3 = scalar_lea.vmem %s6423_s6, 1024  ;;  %p6425_p8 = scmp.lt.s32.totalorder %s6969_s20, %s6423_s6 }
 0x141   : > { %p6420_p2 = pnand %p6418_p13, %p6404_p6  ;;  %p6426_p10 = scmp.lt.s32.totalorder %s6424_s3, %s6417_s0 }
 0x143   : > { %p6421_p4 = pneg %p6420_p2  ;;  %p6427_p7 = por %p6426_p10, %p6425_p8 }
 0x145   : > { %p6428_p1 = pnand %p6427_p7, %p6421_p4 }
 0x147   : > { %6431 = shalt.err (!%p6428_p1)
}
 0x148   : > { %5910 = dma.hbm_to_vmem [thread:$0]  (!%p6971_p5), %s6967_s29, 512, %s6969_s20, %s530_s2  }
 0x149   : > { %s5823_s1 = smul.u32 768, %s6524_s16  ;;  %s552_s23 = scalar_lea.vmem [#allocation4], %s5822_s26 }
 0x14a   : > { %s560_s28 = sshll.u32 %s552_s23, 4  ;;  %s7582_s5 = sld [smem:[#allocation32_spill]]  ;;  %s561_s28 = int_to_ptr.vmem [resolvable:$true] %s560_s28 }
 0x14b   : > { %s549_s6 = scalar_lea.sflag [#allocation5], %s548_s21 }
 0x150   : > { %s7009_s0 = scalar_lea.hbm %s7582_s5, %s5823_s1  ;;  %s6437_s20 = scalar_lea.hbm %s7582_s5, 3072 }
 0x151   : > { %s6432_s3 = scalar_lea.hbm %s7009_s0, 768  ;;  %p6438_p12 = scmp.lt.u32.totalorder %s7009_s0, %s7582_s5 }
 0x152   : > { %p6433_p9 = scmp.ne.s32.totalorder %s7009_s0, %s6432_s3  ;;  %p6439_p13 = scmp.lt.u32.totalorder %s6437_s20, %s6432_s3 }
 0x153   : > { %p6441_p4 = scmp.lt.u32.totalorder %s6432_s3, %s7009_s0 }
 0x154   : > { %p6435_p3 = pnand %p6433_p9, %p6404_p6  ;;  %p6440_p2 = por %p6439_p13, %p6438_p12 }
 0x156   : > { %p6436_p11 = pneg %p6435_p3  ;;  %p6442_p8 = por %p6441_p4, %p6440_p2 }
 0x158   : > { %p6443_p10 = pnand %p6442_p8, %p6436_p11 }
 0x15a   : > { %6446 = shalt.err (!%p6443_p10)
}
 0x15b   : > { %s6447_s16 = scalar_lea.vmem %s561_s28, 768  ;;  %s6544_s21 = smov [#allocation4]  }
 0x15c   : > { %p6448_p7 = scmp.ne.s32.totalorder %s561_s28, %s6447_s16  ;;  %s6452_s1 = sshll.u32 %s6544_s21, 4  ;;  %s6453_s1 = int_to_ptr.vmem [resolvable:$false] %s6452_s1 }
 0x15d   : > { %s6454_s23 = scalar_lea.vmem %s6453_s1, 1536  ;;  %p6455_p3 = scmp.lt.s32.totalorder %s561_s28, %s6453_s1 }
 0x15e   : > { %p6450_p1 = pnand %p6448_p7, %p6404_p6  ;;  %p6456_p0 = scmp.lt.s32.totalorder %s6454_s23, %s6447_s16 }
 0x160   : > { %p6451_p9 = pneg %p6450_p1  ;;  %p6457_p12 = por %p6456_p0, %p6455_p3 }
 0x162   : > { %p6458_p13 = pnand %p6457_p12, %p6451_p9 }
 0x164   : > { %6461 = shalt.err (!%p6458_p13)
}
 0x165   : > { %5913 = dma.hbm_to_vmem [thread:$0]  (!%p6971_p5), %s7009_s0, 768, %s561_s28, %s549_s6  }
 0x166   : > { %s7583_s27 = sld [smem:[#allocation30_spill]] }
 0x16c   : > { %p7584_p11 = scmp.ne.s32.totalorder %s7583_s27, 0 }
 0x16d   : > { %s578_s22 = sand.u32 (!%p7584_p11), 1, %s6516_s30   ;;  %p7585_p6 = scmp.ne.s32.totalorder (!%p7584_p11), %s7579_s18, 0 }
 0x16e   : > { %576 = sbr.rel (%p7584_p11) target bundleno = 3640 (0xe38), region = 76  ;;  %s4578_s3 = sshll.u32 (!%p7584_p11), %s578_s22, 5 }
 0x16f   : > { %s579_s24 = scalar_lea.sflag (!%p7584_p11), [#allocation3], %s578_s22  ;;  %s7035_s29 = scalar_lea.vmem (!%p7584_p11), [#allocation2], %s4578_s3 }
 0x175   : > { %6479 = dma.done.wait (%p7585_p6), %s579_s24, 512  }
 0x176   : > { %6481 = vsyncadd (%p7585_p6), %s579_s24, 4294966784  ;;  %s587_s25 = sand.u32 1, %s6645_s19   ;;  %s5824_s20 = smul.u32 48, %s578_s22 }
 0x177   : > { %s588_s28 = scalar_lea.sflag [#allocation5], %s587_s25 }
 0x178   : > { %s7042_s0 = scalar_lea.vmem [#allocation4], %s5824_s20 }
 0x179   : > { %6483 = dma.done.wait (%p7585_p6), %s588_s28, 768  }
 0x17a   : > { %6485 = vsyncadd (%p7585_p6), %s588_s28, 4294966528  ;;  %p7586_p0 = scmp.eq.s32.totalorder %s6645_s19, 0 }
 0x17c   : > { %6487 = dma.done.wait (%p7586_p0), [#allocation5], 16384   ;;  %p7587_p5 = pmov %p7586_p0 }
 0x17d   : > { %p7588_p2 = pmov %p7586_p0 }
 0x17e   : > { %6489 = vsyncadd (%p7587_p5), [#allocation5], 4294950912 }
 0x17f   : > { %6491 = dma.done.wait (%p7588_p2), [#allocation8], 12288   ;;  %p7589_p4 = pmov %p7586_p0 }
 0x180   : > { %p7590_p8 = pmov %p7586_p0 }
 0x181   : > { %6493 = vsyncadd (%p7589_p4), [#allocation8], 4294955008 }
 0x182   : > { %6495 = dma.done.wait (%p7590_p8), [#allocation11], 65536   ;;  %p7591_p10 = pmov %p7586_p0 }
 0x183   : > { %p7592_p7 = pmov %p7586_p0 }
 0x184   : > { %6497 = vsyncadd (%p7591_p10), [#allocation11], 4294901760 }
 0x185   : > { %6499 = dma.done.wait (%p7592_p7), [#allocation14], 12288   ;;  %p7593_p1 = pmov %p7586_p0 }
 0x186   : > { %p7594_p9 = pmov %p7586_p0 }
 0x187   : > { %6501 = vsyncadd (%p7593_p1), [#allocation14], 4294955008 }
 0x188   : > { %6503 = dma.done.wait (%p7594_p9), [#allocation17], 10240   ;;  %p7595_p3 = pmov %p7586_p0 }
 0x189   : > { %p7596_p12 = pmov %p7586_p0 }
 0x18a   : > { %6505 = vsyncadd (%p7595_p3), [#allocation17], 4294957056 }
 0x18b   : > { %6507 = dma.done.wait (%p7596_p12), [#allocation20], 2464   ;;  %p7597_p13 = pmov %p7586_p0 }
 0x18c   : > { %v708_v0 = vld [vmem:[#allocation6 + $0x8] sm:$0xff]  ;;  %v710_v1 = vld [vmem:[#allocation6 + $0x18] sm:$0xff]  ;;  %v707_v2 = vld [vmem:[#allocation6] sm:$0xff]  ;;  %vm6548_vm2 = vmmov 0   ;;  %p688_p11 = scmp.lt.s32.totalorder %s6645_s19, 3  ;;  %s7598_s2 = sld [smem:[#allocation33_spill]] }
 0x18d   : > { %6509 = vsyncadd (%p7597_p13), [#allocation20], 4294964832  ;;  %v4849_v3 = vpack.c.bf16 %v710_v1, %v708_v0  ;;  %v709_v4 = vld [vmem:[#allocation6 + $0x10] sm:$0xff]  ;;  %v712_v5 = vld [vmem:[#allocation6 + $0x28] sm:$0xff]  ;;  %vm4098_vm11 = vcmask 15360   ;;  %vm4293_vm12 = vcmask 64512  }
 0x18e   : > { %v714_v6 = vld [vmem:[#allocation6 + $0x38] sm:$0xff]  ;;  %v4851_v7 = vpack.c.bf16 %v709_v4, %v707_v2  ;;  %v711_v9 = vld [vmem:[#allocation6 + $0x20] sm:$0xff]  ;;  %v713_v10 = vld [vmem:[#allocation6 + $0x30] sm:$0xff]  ;;  %s7605_s19 = smov (!%p688_p11, %s6645_s19), 3  ;;  %s7599_s23 = sld [smem:[#allocation38_spill]] }
 0x18f   : > { %v4853_v8 = vpack.c.bf16 %v714_v6, %v712_v5  ;;  %v716_v11 = vld [vmem:[#allocation6 + $0x48] sm:$0xff]  ;;  %4850 = vmatprep.subr.bf16.mxu0 %v4849_v3  ;;  %v718_v12 = vld [vmem:[#allocation6 + $0x58] sm:$0xff]  ;;  %v4855_v13 = vpack.c.bf16 %v713_v10, %v711_v9  ;;  %v715_v15 = vld [vmem:[#allocation6 + $0x40] sm:$0xff]  ;;  %s4590_s18 = sshll.u32 %s7605_s19, 3 }
 0x190   : > { %4852 = vmatpush1.bf16.msra.mxu0 %v4851_v7  ;;  %v4857_v14 = vpack.c.bf16 %v718_v12, %v716_v11  ;;  %v717_v16 = vld [vmem:[#allocation6 + $0x50] sm:$0xff]  ;;  %v720_v17 = vld [vmem:[#allocation6 + $0x68] sm:$0xff]  ;;  %v722_v18 = vld [vmem:[#allocation6 + $0x78] sm:$0xff] }
 0x191   : > { %4854 = vmatprep.subr.bf16.mxu0 %v4853_v8  ;;  %v4859_v19 = vpack.c.bf16 %v717_v16, %v715_v15  ;;  %v4861_v20 = vpack.c.bf16 %v722_v18, %v720_v17  ;;  %v719_v21 = vld [vmem:[#allocation6 + $0x60] sm:$0xff]  ;;  %v721_v22 = vld [vmem:[#allocation6 + $0x70] sm:$0xff]  ;;  %v724_v23 = vld [vmem:[#allocation6 + $0x88] sm:$0xff] }
 0x192   : > { %v726_v24 = vld [vmem:[#allocation6 + $0x98] sm:$0xff]  ;;  %v4863_v25 = vpack.c.bf16 %v721_v22, %v719_v21  ;;  %v723_v27 = vld [vmem:[#allocation6 + $0x80] sm:$0xff]  ;;  %v725_v28 = vld [vmem:[#allocation6 + $0x90] sm:$0xff]  ;;  %s691_s16 = scalar_lea.vmem %s7598_s2, %s4590_s18 }
 0x193   : > { %v4865_v26 = vpack.c.bf16 %v726_v24, %v724_v23  ;;  %v728_v29 = vld [vmem:[#allocation6 + $0xa8] sm:$0xff]  ;;  %v730_v30 = vld [vmem:[#allocation6 + $0xb8] sm:$0xff]  ;;  %v4867_v31 = vpack.c.bf16 %v725_v28, %v723_v27  ;;  %v727_v33 = vld [vmem:[#allocation6 + $0xa0] sm:$0xff] }
 0x194   : > { %4856 = vmatpush1.bf16.msra.mxu0 %v4855_v13  ;;  %v4869_v32 = vpack.c.bf16 %v730_v30, %v728_v29  ;;  %v729_v34 = vld [vmem:[#allocation6 + $0xb0] sm:$0xff]  ;;  %v732_v35 = vld [vmem:[#allocation6 + $0xc8] sm:$0xff]  ;;  %v734_v36 = vld [vmem:[#allocation6 + $0xd8] sm:$0xff]  ;;  %s695_s27 = scalar_lea.vmem %s7599_s23, %s4590_s18 }
 0x195   : > { %4858 = vmatprep.subr.bf16.mxu0 %v4857_v14  ;;  %v4871_v37 = vpack.c.bf16 %v729_v34, %v727_v33  ;;  %v4873_v38 = vpack.c.bf16 %v734_v36, %v732_v35  ;;  %v731_v39 = vld [vmem:[#allocation6 + $0xc0] sm:$0xff]  ;;  %v733_v40 = vld [vmem:[#allocation6 + $0xd0] sm:$0xff]  ;;  %v697_v41 = vld [vmem:[%s7035_s29 + $0x8] sm:$0xff] }
 0x196   : > { %v736_v42 = vld [vmem:[#allocation6 + $0xe8] sm:$0xff]  ;;  %v738_v43 = vld [vmem:[#allocation6 + $0xf8] sm:$0xff]  ;;  %910 = vmatprep.mubr.f32.mxu0 %v697_v41  ;;  %v4875_v44 = vpack.c.bf16 %v733_v40, %v731_v39  ;;  %v735_v46 = vld [vmem:[#allocation6 + $0xe0] sm:$0xff] }
 0x197   : > { %v4877_v45 = vpack.c.bf16 %v738_v43, %v736_v42  ;;  %v737_v47 = vld [vmem:[#allocation6 + $0xf0] sm:$0xff]  ;;  %v740_v48 = vld [vmem:[#allocation6 + $0x108] sm:$0xff]  ;;  %v742_v49 = vld [vmem:[#allocation6 + $0x118] sm:$0xff] }
 0x198   : > { %4860 = vmatpush1.bf16.msra.mxu0 %v4859_v19  ;;  %v4879_v50 = vpack.c.bf16 %v737_v47, %v735_v46  ;;  %v4881_v51 = vpack.c.bf16 %v742_v49, %v740_v48  ;;  %v739_v52 = vld [vmem:[#allocation6 + $0x100] sm:$0xff]  ;;  %v741_v53 = vld [vmem:[#allocation6 + $0x110] sm:$0xff]  ;;  %v744_v54 = vld [vmem:[#allocation6 + $0x128] sm:$0xff] }
 0x199   : > { %4862 = vmatprep.subr.bf16.mxu0 %v4861_v20  ;;  %v746_v55 = vld [vmem:[#allocation6 + $0x138] sm:$0xff]  ;;  %v4883_v56 = vpack.c.bf16 %v741_v53, %v739_v52  ;;  %v743_v58 = vld [vmem:[#allocation6 + $0x120] sm:$0xff]  ;;  %v745_v59 = vld [vmem:[#allocation6 + $0x130] sm:$0xff] }
 0x19a   : > { %v4885_v57 = vpack.c.bf16 %v746_v55, %v744_v54  ;;  %v748_v60 = vld [vmem:[#allocation6 + $0x148] sm:$0xff]  ;;  %v750_v61 = vld [vmem:[#allocation6 + $0x158] sm:$0xff]  ;;  %v4887_v62 = vpack.c.bf16 %v745_v59, %v743_v58  ;;  %v747_v0 = vld [vmem:[#allocation6 + $0x140] sm:$0xff] }
 0x19b   : > { %v4889_v63 = vpack.c.bf16 %v750_v61, %v748_v60  ;;  %v749_v1 = vld [vmem:[#allocation6 + $0x150] sm:$0xff]  ;;  %v752_v2 = vld [vmem:[#allocation6 + $0x168] sm:$0xff]  ;;  %v754_v3 = vld [vmem:[#allocation6 + $0x178] sm:$0xff] }
 0x19c   : > { %4864 = vmatpush1.bf16.msra.mxu0 %v4863_v25  ;;  %v4891_v4 = vpack.c.bf16 %v749_v1, %v747_v0  ;;  %v4893_v5 = vpack.c.bf16 %v754_v3, %v752_v2  ;;  %v751_v6 = vld [vmem:[#allocation6 + $0x160] sm:$0xff]  ;;  %v753_v7 = vld [vmem:[#allocation6 + $0x170] sm:$0xff]  ;;  %v756_v8 = vld [vmem:[#allocation6 + $0x188] sm:$0xff] }
 0x19d   : > { %4866 = vmatprep.subr.bf16.mxu0 %v4865_v26  ;;  %v758_v9 = vld [vmem:[#allocation6 + $0x198] sm:$0xff]  ;;  %v755_v10 = vld [vmem:[#allocation6 + $0x180] sm:$0xff]  ;;  %v757_v11 = vld [vmem:[#allocation6 + $0x190] sm:$0xff]  ;;  %v4895_v12 = vpack.c.bf16 %v753_v7, %v751_v6 }
 0x19e   : > { %v760_v13 = vld [vmem:[#allocation6 + $0x1a8] sm:$0xff]  ;;  %v762_v14 = vld [vmem:[#allocation6 + $0x1b8] sm:$0xff]  ;;  %v1007_v15 = vld [vmem:[#allocation7 + $0x80] sm:$0xff]  ;;  %v4897_v18 = vpack.c.bf16 %v758_v9, %v756_v8  ;;  %v4899_v29 = vpack.c.bf16 %v757_v11, %v755_v10 }
 0x19f   : > { %v1008_v16 = vld [vmem:[#allocation7 + $0x88] sm:$0xff]  ;;  %v991_v17 = vld [vmem:[#allocation7] sm:$0xff]  ;;  %v1009_v21 = vld [vmem:[#allocation7 + $0x90] sm:$0xff]  ;;  %v4901_v33 = vpack.c.bf16 %v762_v14, %v760_v13 }
 0x1a0   : > { %4868 = vmatpush1.bf16.msra.mxu0 %v4867_v31  ;;  %v4977_v19 = vpack.c.bf16 %v1008_v16, %v1007_v15  ;;  %v992_v20 = vld [vmem:[#allocation7 + $0x8] sm:$0xff]  ;;  %v1010_v22 = vld [vmem:[#allocation7 + $0x98] sm:$0xff]  ;;  %v993_v25 = vld [vmem:[#allocation7 + $0x10] sm:$0xff] }
 0x1a1   : > { %4870 = vmatprep.subr.bf16.mxu0 %v4869_v32  ;;  %v4979_v23 = vpack.c.bf16 %v992_v20, %v991_v17  ;;  %v4981_v24 = vpack.c.bf16 %v1010_v22, %v1009_v21  ;;  %v994_v26 = vld [vmem:[#allocation7 + $0x18] sm:$0xff]  ;;  %v1011_v27 = vld [vmem:[#allocation7 + $0xa0] sm:$0xff]  ;;  %v1012_v28 = vld [vmem:[#allocation7 + $0xa8] sm:$0xff] }
 0x1a2   : > { %4978 = vmatprep.subr.bf16.mxu1 %v4977_v19  ;;  %v759_v30 = vld [vmem:[#allocation6 + $0x1a0] sm:$0xff]  ;;  %v761_v31 = vld [vmem:[#allocation6 + $0x1b0] sm:$0xff]  ;;  %v4983_v32 = vpack.c.bf16 %v994_v26, %v993_v25  ;;  %v764_v34 = vld [vmem:[#allocation6 + $0x1c8] sm:$0xff]  ;;  %v4985_v35 = vpack.c.bf16 %v1012_v28, %v1011_v27 }
 0x1a3   : > { %4980 = vmatpush3.bf16.msra.mxu1 %v4979_v23  ;;  %v995_v36 = vld [vmem:[#allocation7 + $0x20] sm:$0xff]  ;;  %v1013_v39 = vld [vmem:[#allocation7 + $0xb0] sm:$0xff]  ;;  %v1014_v40 = vld [vmem:[#allocation7 + $0xb8] sm:$0xff]  ;;  %v4903_v41 = vpack.c.bf16 %v761_v31, %v759_v30 }
 0x1a4   : > { %4872 = vmatpush1.bf16.msra.mxu0 %v4871_v37  ;;  %4982 = vmatprep.subr.bf16.mxu1 %v4981_v24  ;;  %v996_v37 = vld [vmem:[#allocation7 + $0x28] sm:$0xff]  ;;  %v763_v42 = vld [vmem:[#allocation6 + $0x1c0] sm:$0xff]  ;;  %v765_v43 = vld [vmem:[#allocation6 + $0x1d0] sm:$0xff]  ;;  %v4989_v47 = vpack.c.bf16 %v1014_v40, %v1013_v39 }
 0x1a5   : > { %4874 = vmatprep.subr.bf16.mxu0 %v4873_v38  ;;  %v766_v38 = vld [vmem:[#allocation6 + $0x1d8] sm:$0xff]  ;;  %v768_v46 = vld [vmem:[#allocation6 + $0x1e8] sm:$0xff]  ;;  %v997_v48 = vld [vmem:[#allocation7 + $0x30] sm:$0xff]  ;;  %v4907_v53 = vpack.c.bf16 %v765_v43, %v763_v42 }
 0x1a6   : > { %v998_v49 = vld [vmem:[#allocation7 + $0x38] sm:$0xff]  ;;  %v1016_v52 = vld [vmem:[#allocation7 + $0xc8] sm:$0xff]  ;;  %v767_v54 = vld [vmem:[#allocation6 + $0x1e0] sm:$0xff] }
 0x1a7   : > { %4984 = vmatpush3.bf16.msra.mxu1 %v4983_v32  ;;  %v769_v55 = vld [vmem:[#allocation6 + $0x1f0] sm:$0xff]  ;;  %v772_v58 = vld [vmem:[#allocation6 + $0x208] sm:$0xff]  ;;  %v999_v60 = vld [vmem:[#allocation7 + $0x40] sm:$0xff] }
 0x1a8   : > { %4876 = vmatpush1.bf16.msra.mxu0 %v4875_v44  ;;  %v4987_v44 = vpack.c.bf16 %v996_v37, %v995_v36  ;;  %4986 = vmatprep.subr.bf16.mxu1 %v4985_v35  ;;  %v1000_v61 = vld [vmem:[#allocation7 + $0x48] sm:$0xff]  ;;  %v1018_v0 = vld [vmem:[#allocation7 + $0xd8] sm:$0xff]  ;;  %v4911_v1 = vpack.c.bf16 %v769_v55, %v767_v54  ;;  %v1001_v9 = vld [vmem:[#allocation7 + $0x50] sm:$0xff] }
 0x1a9   : > { %4878 = vmatprep.subr.bf16.mxu0 %v4877_v45  ;;  %v4905_v45 = vpack.c.bf16 %v766_v38, %v764_v34  ;;  %v4995_v2 = vpack.c.bf16 %v1000_v61, %v999_v60  ;;  %v776_v6 = vld [vmem:[#allocation6 + $0x228] sm:$0xff]  ;;  %v778_v8 = vld [vmem:[#allocation6 + $0x238] sm:$0xff]  ;;  %v1019_v11 = vld [vmem:[#allocation7 + $0xe0] sm:$0xff] }
 0x1aa   : > { %v1002_v10 = vld [vmem:[#allocation7 + $0x58] sm:$0xff]  ;;  %v696_v13 = vld [vmem:[%s7035_s29] sm:$0xff]  ;;  %v4917_v15 = vpack.c.bf16 %v778_v8, %v776_v6  ;;  %v777_v17 = vld [vmem:[#allocation6 + $0x230] sm:$0xff] }
 0x1ab   : > { %4988 = vmatpush3.bf16.msra.mxu1 %v4987_v44  ;;  %v775_v16 = vld [vmem:[#allocation6 + $0x220] sm:$0xff]  ;;  %v4999_v19 = vpack.c.bf16 %v1002_v10, %v1001_v9  ;;  %v780_v20 = vld [vmem:[#allocation6 + $0x248] sm:$0xff]  ;;  %v782_v21 = vld [vmem:[#allocation6 + $0x258] sm:$0xff] }
 0x1ac   : > { %4880 = vmatpush1.bf16.msra.mxu0 %v4879_v50  ;;  %v770_v50 = vld [vmem:[#allocation6 + $0x1f8] sm:$0xff]  ;;  %4990 = vmatprep.subr.bf16.mxu1 %v4989_v47  ;;  %v4919_v23 = vpack.c.bf16 %v777_v17, %v775_v16  ;;  %v4921_v24 = vpack.c.bf16 %v782_v21, %v780_v20  ;;  %v779_v25 = vld [vmem:[#allocation6 + $0x240] sm:$0xff]  ;;  %v781_v26 = vld [vmem:[#allocation6 + $0x250] sm:$0xff] }
 0x1ad   : > { %4882 = vmatprep.subr.bf16.mxu0 %v4881_v51  ;;  %v1015_v51 = vld [vmem:[#allocation7 + $0xc0] sm:$0xff]  ;;  %v784_v27 = vld [vmem:[#allocation6 + $0x268] sm:$0xff]  ;;  %v786_v28 = vld [vmem:[#allocation6 + $0x278] sm:$0xff] }
 0x1ae   : > { %v4993_v59 = vpack.c.bf16 %v1016_v52, %v1015_v51  ;;  %v4925_v30 = vpack.c.bf16 %v786_v28, %v784_v27  ;;  %v783_v31 = vld [vmem:[#allocation6 + $0x260] sm:$0xff]  ;;  %v785_v32 = vld [vmem:[#allocation6 + $0x270] sm:$0xff]  ;;  %v790_v34 = vld [vmem:[#allocation6 + $0x298] sm:$0xff] }
 0x1af   : > { %v4927_v35 = vpack.c.bf16 %v785_v32, %v783_v31  ;;  %v787_v37 = vld [vmem:[#allocation6 + $0x280] sm:$0xff]  ;;  %v789_v38 = vld [vmem:[#allocation6 + $0x290] sm:$0xff]  ;;  %v792_v39 = vld [vmem:[#allocation6 + $0x2a8] sm:$0xff] }
 0x1b0   : > { %4884 = vmatpush1.bf16.msra.mxu0 %v4883_v56  ;;  %v4991_v56 = vpack.c.bf16 %v998_v49, %v997_v48  ;;  %v794_v40 = vld [vmem:[#allocation6 + $0x2b8] sm:$0xff]  ;;  %v791_v43 = vld [vmem:[#allocation6 + $0x2a0] sm:$0xff]  ;;  %v793_v44 = vld [vmem:[#allocation6 + $0x2b0] sm:$0xff] }
 0x1b1   : > { %4886 = vmatprep.subr.bf16.mxu0 %v4885_v57  ;;  %v4909_v57 = vpack.c.bf16 %v770_v50, %v768_v46  ;;  %v4933_v42 = vpack.c.bf16 %v794_v40, %v792_v39  ;;  %v798_v46 = vld [vmem:[#allocation6 + $0x2d8] sm:$0xff]  ;;  %v4935_v47 = vpack.c.bf16 %v793_v44, %v791_v43  ;;  %v795_v49 = vld [vmem:[#allocation6 + $0x2c0] sm:$0xff]  ;;  %v797_v50 = vld [vmem:[#allocation6 + $0x2d0] sm:$0xff] }
 0x1b2   : > { %4992 = vmatpush3.bf16.msra.mxu1 %v4991_v56  ;;  %v800_v51 = vld [vmem:[#allocation6 + $0x2e8] sm:$0xff]  ;;  %v802_v52 = vld [vmem:[#allocation6 + $0x2f8] sm:$0xff]  ;;  %v799_v55 = vld [vmem:[#allocation6 + $0x2e0] sm:$0xff] }
 0x1b3   : > { %4994 = vmatprep.subr.bf16.mxu1 %v4993_v59  ;;  %v4941_v54 = vpack.c.bf16 %v802_v52, %v800_v51  ;;  %v801_v56 = vld [vmem:[#allocation6 + $0x2f0] sm:$0xff]  ;;  %v803_v61 = vld [vmem:[#allocation6 + $0x300] sm:$0xff]  ;;  %v814_v6 = vld [vmem:[#allocation6 + $0x358] sm:$0xff] }
 0x1b4   : > { %4888 = vmatpush1.bf16.msra.mxu0 %v4887_v62  ;;  %v774_v62 = vld [vmem:[#allocation6 + $0x218] sm:$0xff]  ;;  %v4943_v59 = vpack.c.bf16 %v801_v56, %v799_v55  ;;  %v811_v9 = vld [vmem:[#allocation6 + $0x340] sm:$0xff]  ;;  %v813_v10 = vld [vmem:[#allocation6 + $0x350] sm:$0xff] }
 0x1b5   : > { %4890 = vmatprep.subr.bf16.mxu0 %v4889_v63  ;;  %v1017_v63 = vld [vmem:[#allocation7 + $0xd0] sm:$0xff]  ;;  %v4913_v3 = vpack.c.bf16 %v774_v62, %v772_v58  ;;  %v806_v58 = vld [vmem:[#allocation6 + $0x318] sm:$0xff]  ;;  %v820_v17 = vld [vmem:[#allocation6 + $0x388] sm:$0xff] }
 0x1b6   : > { %v4997_v7 = vpack.c.bf16 %v1018_v0, %v1017_v63  ;;  %4996 = vmatpush3.bf16.msra.mxu1 %v4995_v2  ;;  %v805_v62 = vld [vmem:[#allocation6 + $0x310] sm:$0xff]  ;;  %v808_v63 = vld [vmem:[#allocation6 + $0x328] sm:$0xff]  ;;  %v810_v0 = vld [vmem:[#allocation6 + $0x338] sm:$0xff] }
 0x1b7   : > { %v4949_v2 = vpack.c.bf16 %v810_v0, %v808_v63  ;;  %v817_v16 = vld [vmem:[#allocation6 + $0x370] sm:$0xff]  ;;  %v819_v21 = vld [vmem:[#allocation6 + $0x380] sm:$0xff]  ;;  %v1004_v44 = vld [vmem:[#allocation7 + $0x68] sm:$0xff] }
 0x1b8   : > { %4892 = vmatpush1.bf16.msra.mxu0 %v4891_v4  ;;  %v771_v4 = vld [vmem:[#allocation6 + $0x200] sm:$0xff]  ;;  %4998 = vmatprep.subr.bf16.mxu1 %v4997_v7  ;;  %v825_v28 = vld [vmem:[#allocation6 + $0x3b0] sm:$0xff]  ;;  %v1332_v52 = vld [vmem:[#allocation10 + $0x18] sm:$0xff] }
 0x1b9   : > { %4894 = vmatprep.subr.bf16.mxu0 %v4893_v5  ;;  %v773_v5 = vld [vmem:[#allocation6 + $0x210] sm:$0xff]  ;;  %v823_v27 = vld [vmem:[#allocation6 + $0x3a0] sm:$0xff]  ;;  %v1106_v56 = vld [vmem:[#allocation9 + $0x28] sm:$0xff] }
 0x1ba   : > { %v4915_v14 = vpack.c.bf16 %v773_v5, %v771_v4  ;;  %5000 = vmatpush3.bf16.msra.mxu1 %v4999_v19  ;;  %v809_v4 = vld [vmem:[#allocation6 + $0x330] sm:$0xff]  ;;  %v812_v5 = vld [vmem:[#allocation6 + $0x348] sm:$0xff]  ;;  %v4967_v31 = vpack.c.bf16 %v825_v28, %v823_v27  ;;  %v831_v39 = vld [vmem:[#allocation6 + $0x3e0] sm:$0xff] }
 0x1bb   : > { %v4953_v8 = vpack.c.bf16 %v814_v6, %v812_v5  ;;  %v833_v40 = vld [vmem:[#allocation6 + $0x3f0] sm:$0xff]  ;;  %v1003_v43 = vld [vmem:[#allocation7 + $0x60] sm:$0xff]  ;;  %v1380_v27 = vld [vmem:[#allocation10 + $0x198] sm:$0xff] }
 0x1bc   : > { %4896 = vmatpush1.bf16.msra.mxu0 %v4895_v12  ;;  %v1020_v12 = vld [vmem:[#allocation7 + $0xe8] sm:$0xff]  ;;  %v1339_v0 = vld [vmem:[#allocation10 + $0x50] sm:$0xff]  ;;  %v1384_v28 = vld [vmem:[#allocation10 + $0x1b8] sm:$0xff] }
 0x1bd   : > { %4898 = vmatprep.subr.bf16.mxu0 %v4897_v18  ;;  %v699_v18 = vld [vmem:[%s7035_s29 + $0x18] sm:$0xff]  ;;  %v5001_v22 = vpack.c.bf16 %v1020_v12, %v1019_v11  ;;  %v816_v11 = vld [vmem:[#allocation6 + $0x368] sm:$0xff]  ;;  %v1347_v6 = vld [vmem:[#allocation10 + $0x90] sm:$0xff] }
 0x1be   : > { %v818_v12 = vld [vmem:[#allocation6 + $0x378] sm:$0xff] }
 0x1bf   : > { %5002 = vmatprep.subr.bf16.mxu1 %v5001_v22  ;;  %v821_v22 = vld [vmem:[#allocation6 + $0x390] sm:$0xff] }
 0x1c0   : > { %4900 = vmatpush1.bf16.msra.mxu0 %v4899_v29  ;;  %v4923_v29 = vpack.c.bf16 %v781_v26, %v779_v25  ;;  %v4963_v25 = vpack.c.bf16 %v821_v22, %v819_v21  ;;  %v1372_v21 = vld [vmem:[#allocation10 + $0x158] sm:$0xff] }
 0x1c1   : > { %4902 = vmatprep.subr.bf16.mxu0 %v4901_v33  ;;  %v788_v33 = vld [vmem:[#allocation6 + $0x288] sm:$0xff]  ;;  %v1376_v22 = vld [vmem:[#allocation10 + $0x178] sm:$0xff] }
 0x1c2   : > { %v4929_v36 = vpack.c.bf16 %v790_v34, %v788_v33  ;;  %v827_v33 = vld [vmem:[#allocation6 + $0x3c0] sm:$0xff]  ;;  %v829_v34 = vld [vmem:[#allocation6 + $0x3d0] sm:$0xff] }
 0x1c4   : > { %4904 = vmatpush1.bf16.msra.mxu0 %v4903_v41  ;;  %v4931_v41 = vpack.c.bf16 %v789_v38, %v787_v37  ;;  %v4971_v37 = vpack.c.bf16 %v829_v34, %v827_v33  ;;  %v836_v33 = vlaneseq }
 0x1c5   : > { %4906 = vmatprep.subr.bf16.mxu0 %v4905_v45  ;;  %v796_v45 = vld [vmem:[#allocation6 + $0x2c8] sm:$0xff] }
 0x1c6   : > { %v4937_v48 = vpack.c.bf16 %v798_v46, %v796_v45  ;;  %v5003_v45 = vpack.c.bf16 %v1004_v44, %v1003_v43  ;;  %v1021_v46 = vld [vmem:[#allocation7 + $0xf0] sm:$0xff]  ;;  %v7077_v34 = vshrl.u32 %v836_v33, 7  ;;  %v1101_v43 = vld [vmem:[#allocation9] sm:$0xff] }
 0x1c7   : > { %v1105_v44 = vld [vmem:[#allocation9 + $0x20] sm:$0xff] }
 0x1c8   : > { %4908 = vmatpush1.bf16.msra.mxu0 %v4907_v53  ;;  %v4939_v53 = vpack.c.bf16 %v797_v50, %v795_v49  ;;  %5004 = vmatpush3.bf16.msra.mxu1 %v5003_v45  ;;  %v1005_v49 = vld [vmem:[#allocation7 + $0x70] sm:$0xff]  ;;  %v1006_v50 = vld [vmem:[#allocation7 + $0x78] sm:$0xff] }
 0x1c9   : > { %4910 = vmatprep.subr.bf16.mxu0 %v4909_v57  ;;  %v804_v57 = vld [vmem:[#allocation6 + $0x308] sm:$0xff]  ;;  %v5007_v51 = vpack.c.bf16 %v1006_v50, %v1005_v49  ;;  %v5011_v49 = vpack.c.bf16 %v1105_v44, %v1101_v43  ;;  %v1399_v44 = vld [vmem:[#allocation10 + $0x230] sm:$0xff] }
 0x1ca   : > { %v4945_v60 = vpack.c.bf16 %v806_v58, %v804_v57  ;;  %v1331_v57 = vld [vmem:[#allocation10 + $0x10] sm:$0xff] }
 0x1cb   : > { %v1335_v58 = vld [vmem:[#allocation10 + $0x30] sm:$0xff] }
 0x1cc   : > { %4912 = vmatpush1.bf16.msra.mxu0 %v4911_v1  ;;  %v4947_v1 = vpack.c.bf16 %v805_v62, %v803_v61  ;;  %v1340_v61 = vld [vmem:[#allocation10 + $0x58] sm:$0xff] }
 0x1cd   : > { %4914 = vmatprep.subr.bf16.mxu0 %v4913_v3  ;;  %v807_v3 = vld [vmem:[#allocation6 + $0x320] sm:$0xff]  ;;  %v1344_v62 = vld [vmem:[#allocation10 + $0x78] sm:$0xff] }
 0x1ce   : > { %v4951_v7 = vpack.c.bf16 %v809_v4, %v807_v3  ;;  %v5269_v63 = vpack.c.bf16 %v1344_v62, %v1340_v61  ;;  %v1348_v3 = vld [vmem:[#allocation10 + $0x98] sm:$0xff]  ;;  %v1130_v61 = vld [vmem:[#allocation9 + $0xe8] sm:$0xff] }
 0x1cf   : > { %911 = vmatmul.mubr.f32.vlgmr.msra.gmra.mrb[0].mxu0 %v696_v13  ;;  %v4955_v13 = vpack.c.bf16 %v813_v10, %v811_v9  ;;  %v1352_v4 = vld [vmem:[#allocation10 + $0xb8] sm:$0xff] }
 0x1d0   : > { %4916 = vmatpush1.bf16.msra.mxu0 %v4915_v14  ;;  %981 = vmatprep.mubr.f32.mxu0 %v699_v18  ;;  %v4957_v14 = vpack.c.bf16 %v818_v12, %v816_v11  ;;  %v822_v18 = vld [vmem:[#allocation6 + $0x398] sm:$0xff]  ;;  %v5273_v5 = vpack.c.bf16 %v1352_v4, %v1348_v3  ;;  %v1355_v12 = vld [vmem:[#allocation10 + $0xd0] sm:$0xff]  ;;  %v1138_v3 = vld [vmem:[#allocation9 + $0x128] sm:$0xff] }
 0x1d1   : > { %4918 = vmatprep.subr.bf16.mxu0 %v4917_v15  ;;  %v815_v15 = vld [vmem:[#allocation6 + $0x360] sm:$0xff]  ;;  %v4961_v20 = vpack.c.bf16 %v822_v18, %v820_v17  ;;  %v1356_v9 = vld [vmem:[#allocation10 + $0xd8] sm:$0xff]  ;;  %v1363_v18 = vld [vmem:[#allocation10 + $0x110] sm:$0xff] }
 0x1d2   : > { %v4959_v19 = vpack.c.bf16 %v817_v16, %v815_v15  ;;  %v1360_v10 = vld [vmem:[#allocation10 + $0xf8] sm:$0xff] }
 0x1d3   : > { %v5277_v11 = vpack.c.bf16 %v1360_v10, %v1356_v9  ;;  %v1364_v15 = vld [vmem:[#allocation10 + $0x118] sm:$0xff]  ;;  %v1146_v9 = vld [vmem:[#allocation9 + $0x168] sm:$0xff] }
 0x1d4   : > { %4920 = vmatpush1.bf16.msra.mxu0 %v4919_v23  ;;  %v824_v23 = vld [vmem:[#allocation6 + $0x3a8] sm:$0xff]  ;;  %v1368_v16 = vld [vmem:[#allocation10 + $0x138] sm:$0xff] }
 0x1d5   : > { %4922 = vmatprep.subr.bf16.mxu0 %v4921_v24  ;;  %v826_v24 = vld [vmem:[#allocation6 + $0x3b8] sm:$0xff]  ;;  %v5281_v17 = vpack.c.bf16 %v1368_v16, %v1364_v15  ;;  %v1154_v15 = vld [vmem:[#allocation9 + $0x1a8] sm:$0xff] }
 0x1d6   : > { %v4965_v26 = vpack.c.bf16 %v826_v24, %v824_v23  ;;  %v5285_v23 = vpack.c.bf16 %v1376_v22, %v1372_v21  ;;  %v1371_v24 = vld [vmem:[#allocation10 + $0x150] sm:$0xff]  ;;  %v1388_v21 = vld [vmem:[#allocation10 + $0x1d8] sm:$0xff] }
 0x1d7   : > { %v1392_v22 = vld [vmem:[#allocation10 + $0x1f8] sm:$0xff] }
 0x1d8   : > { %4924 = vmatpush1.bf16.msra.mxu0 %v4923_v29  ;;  %v828_v29 = vld [vmem:[#allocation6 + $0x3c8] sm:$0xff] }
 0x1d9   : > { %4926 = vmatprep.subr.bf16.mxu0 %v4925_v30  ;;  %v830_v30 = vld [vmem:[#allocation6 + $0x3d8] sm:$0xff] }
 0x1da   : > { %v4969_v32 = vpack.c.bf16 %v830_v30, %v828_v29  ;;  %v5289_v29 = vpack.c.bf16 %v1384_v28, %v1380_v27  ;;  %v1379_v30 = vld [vmem:[#allocation10 + $0x190] sm:$0xff] }
 0x1db   : > { %v1387_v27 = vld [vmem:[#allocation10 + $0x1d0] sm:$0xff] }
 0x1dc   : > { %4928 = vmatpush1.bf16.msra.mxu0 %v4927_v35  ;;  %v832_v35 = vld [vmem:[#allocation6 + $0x3e8] sm:$0xff]  ;;  %v1391_v28 = vld [vmem:[#allocation10 + $0x1f0] sm:$0xff] }
 0x1dd   : > { %4930 = vmatprep.subr.bf16.mxu0 %v4929_v36  ;;  %v834_v36 = vld [vmem:[#allocation6 + $0x3f8] sm:$0xff] }
 0x1de   : > { %v4973_v38 = vpack.c.bf16 %v834_v36, %v832_v35  ;;  %v7080_v35 = vsub.s32 0, %v7077_v34  ;;  %v706_v36 = vld [vmem:[#allocation21] sm:$0x3] }
 0x1e0   : > { %4932 = vmatpush1.bf16.msra.mxu0 %v4931_v41  ;;  %v4975_v41 = vpack.c.bf16 %v833_v40, %v831_v39 }
 0x1e1   : > { %4934 = vmatprep.subr.bf16.mxu0 %v4933_v42  ;;  %v698_v42 = vld [vmem:[%s7035_s29 + $0x10] sm:$0xff] }
 0x1e4   : > { %4936 = vmatpush1.bf16.msra.mxu0 %v4935_v47  ;;  %v1022_v47 = vld [vmem:[#allocation7 + $0xf8] sm:$0xff] }
 0x1e5   : > { %4938 = vmatprep.subr.bf16.mxu0 %v4937_v48  ;;  %v5005_v48 = vpack.c.bf16 %v1022_v47, %v1021_v46  ;;  %v1110_v46 = vld [vmem:[#allocation9 + $0x48] sm:$0xff] }
 0x1e6   : > { %v1114_v47 = vld [vmem:[#allocation9 + $0x68] sm:$0xff] }
 0x1e7   : > { %5006 = vmatprep.subr.bf16.mxu1 %v5005_v48 }
 0x1e8   : > { %4940 = vmatpush1.bf16.msra.mxu0 %v4939_v53  ;;  %5008 = vmatpush3.bf16.msra.mxu1 %v5007_v51  ;;  %v1336_v53 = vld [vmem:[#allocation10 + $0x38] sm:$0xff]  ;;  %v5013_v51 = vpack.c.bf16 %v1114_v47, %v1110_v46  ;;  %v6545_v46 = vmov 0.0  }
 0x1e9   : > { %4942 = vmatprep.subr.bf16.mxu0 %v4941_v54  ;;  %v1102_v54 = vld [vmem:[#allocation9 + $0x8] sm:$0xff]  ;;  %v5265_v55 = vpack.c.bf16 %v1336_v53, %v1332_v52  ;;  %v1109_v52 = vld [vmem:[#allocation9 + $0x40] sm:$0xff]  ;;  %v1404_v47 = vld [vmem:[#allocation10 + $0x258] sm:$0xff] }
 0x1ea   : > { %v1113_v53 = vld [vmem:[#allocation9 + $0x60] sm:$0xff] }
 0x1ec   : > { %4944 = vmatpush1.bf16.msra.mxu0 %v4943_v59  ;;  %v5009_v59 = vpack.c.bf16 %v1106_v56, %v1102_v54  ;;  %v1118_v54 = vld [vmem:[#allocation9 + $0x88] sm:$0xff]  ;;  %v5015_v56 = vpack.c.bf16 %v1113_v53, %v1109_v52  ;;  %v1412_v53 = vld [vmem:[#allocation10 + $0x298] sm:$0xff] }
 0x1ed   : > { %4946 = vmatprep.subr.bf16.mxu0 %v4945_v60  ;;  %v5267_v60 = vpack.c.bf16 %v1335_v58, %v1331_v57  ;;  %v1117_v58 = vld [vmem:[#allocation9 + $0x80] sm:$0xff] }
 0x1ee   : > { %5010 = vmatprep.subr.bf16.mxu1 %v5009_v59  ;;  %v1121_v59 = vld [vmem:[#allocation9 + $0xa0] sm:$0xff] }
 0x1ef   : > { %v5019_v62 = vpack.c.bf16 %v1121_v59, %v1117_v58  ;;  %v1420_v59 = vld [vmem:[#allocation10 + $0x2d8] sm:$0xff] }
 0x1f0   : > { %4948 = vmatpush1.bf16.msra.mxu0 %v4947_v1  ;;  %v1343_v1 = vld [vmem:[#allocation10 + $0x70] sm:$0xff] }
 0x1f1   : > { %4950 = vmatprep.subr.bf16.mxu0 %v4949_v2  ;;  %v5271_v2 = vpack.c.bf16 %v1343_v1, %v1339_v0  ;;  %v1125_v0 = vld [vmem:[#allocation9 + $0xc0] sm:$0xff] }
 0x1f2   : > { %v1129_v1 = vld [vmem:[#allocation9 + $0xe0] sm:$0xff] }
 0x1f3   : > { %v5023_v4 = vpack.c.bf16 %v1129_v1, %v1125_v0  ;;  %v1428_v1 = vld [vmem:[#allocation10 + $0x318] sm:$0xff] }
 0x1f4   : > { %4952 = vmatpush1.bf16.msra.mxu0 %v4951_v7  ;;  %v1351_v7 = vld [vmem:[#allocation10 + $0xb0] sm:$0xff] }
 0x1f5   : > { %4954 = vmatprep.subr.bf16.mxu0 %v4953_v8  ;;  %v5275_v8 = vpack.c.bf16 %v1351_v7, %v1347_v6  ;;  %v1133_v6 = vld [vmem:[#allocation9 + $0x100] sm:$0xff] }
 0x1f6   : > { %v1137_v7 = vld [vmem:[#allocation9 + $0x120] sm:$0xff] }
 0x1f7   : > { %v5027_v10 = vpack.c.bf16 %v1137_v7, %v1133_v6  ;;  %v1436_v7 = vld [vmem:[#allocation10 + $0x358] sm:$0xff] }
 0x1f8   : > { %4956 = vmatpush1.bf16.msra.mxu0 %v4955_v13  ;;  %v1359_v13 = vld [vmem:[#allocation10 + $0xf0] sm:$0xff] }
 0x1f9   : > { %4958 = vmatprep.subr.bf16.mxu0 %v4957_v14  ;;  %v5279_v14 = vpack.c.bf16 %v1359_v13, %v1355_v12  ;;  %v1141_v12 = vld [vmem:[#allocation9 + $0x140] sm:$0xff] }
 0x1fa   : > { %v1145_v13 = vld [vmem:[#allocation9 + $0x160] sm:$0xff] }
 0x1fb   : > { %v5031_v16 = vpack.c.bf16 %v1145_v13, %v1141_v12  ;;  %v1444_v13 = vld [vmem:[#allocation10 + $0x398] sm:$0xff] }
 0x1fc   : > { %4960 = vmatpush1.bf16.msra.mxu0 %v4959_v19  ;;  %v1367_v19 = vld [vmem:[#allocation10 + $0x130] sm:$0xff] }
 0x1fd   : > { %4962 = vmatprep.subr.bf16.mxu0 %v4961_v20  ;;  %v5283_v20 = vpack.c.bf16 %v1367_v19, %v1363_v18  ;;  %v1149_v18 = vld [vmem:[#allocation9 + $0x180] sm:$0xff] }
 0x1fe   : > { %v1153_v19 = vld [vmem:[#allocation9 + $0x1a0] sm:$0xff] }
 0x200   : > { %4964 = vmatpush1.bf16.msra.mxu0 %v4963_v25  ;;  %v1375_v25 = vld [vmem:[#allocation10 + $0x170] sm:$0xff] }
 0x201   : > { %4966 = vmatprep.subr.bf16.mxu0 %v4965_v26  ;;  %v5287_v26 = vpack.c.bf16 %v1375_v25, %v1371_v24  ;;  %v1158_v24 = vld [vmem:[#allocation9 + $0x1c8] sm:$0xff] }
 0x202   : > { %v1162_v25 = vld [vmem:[#allocation9 + $0x1e8] sm:$0xff] }
 0x204   : > { %4968 = vmatpush1.bf16.msra.mxu0 %v4967_v31  ;;  %v1383_v31 = vld [vmem:[#allocation10 + $0x1b0] sm:$0xff] }
 0x205   : > { %4970 = vmatprep.subr.bf16.mxu0 %v4969_v32  ;;  %v5291_v32 = vpack.c.bf16 %v1383_v31, %v1379_v30  ;;  %v5295_v30 = vpack.c.bf16 %v1391_v28, %v1387_v27  ;;  %v1161_v31 = vld [vmem:[#allocation9 + $0x1e0] sm:$0xff]  ;;  %v7089_v27 = vld [vmem:[%s7042_s0 + $0x8] sm:$0xff] }
 0x208   : > { %4972 = vmatpush1.bf16.msra.mxu0 %v4971_v37  ;;  %v7083_v37 = vsub.s32 1, %v7077_v34 }
 0x209   : > { %4974 = vmatprep.subr.bf16.mxu0 %v4973_v38  ;;  %v839_v38 = vrot.slane %v706_v36, %v7080_v35 }
 0x20a   : > { %v843_v39 = vrot.slane %v706_v36, %v7083_v37  ;;  %v1396_v36 = vld [vmem:[#allocation10 + $0x218] sm:$0xff] }
 0x20c   : > { %4976 = vmatpush1.bf16.msra.mxu0 %v4975_v41 }
 0x20d   : > { %5266 = vmatprep.subr.bf16.mxu0 %v5265_v55  ;;  %v1122_v55 = vld [vmem:[#allocation9 + $0xa8] sm:$0xff] }
 0x20e   : > { %v5017_v57 = vpack.c.bf16 %v1122_v55, %v1118_v54  ;;  %v1416_v54 = vld [vmem:[#allocation10 + $0x2b8] sm:$0xff] }
 0x20f   : > { %982 = vmatmul.mubr.f32.vlgmr.msra.gmra.mrb[0].mxu0 %v698_v42  ;;  %v5305_v55 = vpack.c.bf16 %v1416_v54, %v1412_v53  ;;  %v1483_v53 = vld [vmem:[#allocation10 + $0x4d0] sm:$0xff] }
 0x210   : > { %5268 = vmatpush1.bf16.msra.mxu0 %v5267_v60  ;;  %v1126_v60 = vld [vmem:[#allocation9 + $0xc8] sm:$0xff]  ;;  %2011 = vmatprep.mubr.f32.mxu0 %v7089_v27  ;;  %v1487_v54 = vld [vmem:[#allocation10 + $0x4f0] sm:$0xff] }
 0x211   : > { %5270 = vmatprep.subr.bf16.mxu0 %v5269_v63  ;;  %v5021_v63 = vpack.c.bf16 %v1130_v61, %v1126_v60  ;;  %v1424_v60 = vld [vmem:[#allocation10 + $0x2f8] sm:$0xff] }
 0x212   : > { %v5309_v61 = vpack.c.bf16 %v1424_v60, %v1420_v59  ;;  %v1491_v59 = vld [vmem:[#allocation10 + $0x510] sm:$0xff] }
 0x213   : > { %v1495_v60 = vld [vmem:[#allocation10 + $0x530] sm:$0xff] }
 0x214   : > { %5272 = vmatpush1.bf16.msra.mxu0 %v5271_v2  ;;  %v1134_v2 = vld [vmem:[#allocation9 + $0x108] sm:$0xff] }
 0x215   : > { %5274 = vmatprep.subr.bf16.mxu0 %v5273_v5  ;;  %v5025_v5 = vpack.c.bf16 %v1138_v3, %v1134_v2  ;;  %v1432_v2 = vld [vmem:[#allocation10 + $0x338] sm:$0xff] }
 0x216   : > { %v5313_v3 = vpack.c.bf16 %v1432_v2, %v1428_v1  ;;  %v1499_v1 = vld [vmem:[#allocation10 + $0x550] sm:$0xff] }
 0x217   : > { %v1503_v2 = vld [vmem:[#allocation10 + $0x570] sm:$0xff] }
 0x218   : > { %5276 = vmatpush1.bf16.msra.mxu0 %v5275_v8  ;;  %v1142_v8 = vld [vmem:[#allocation9 + $0x148] sm:$0xff] }
 0x219   : > { %5278 = vmatprep.subr.bf16.mxu0 %v5277_v11  ;;  %v5029_v11 = vpack.c.bf16 %v1146_v9, %v1142_v8  ;;  %v1440_v8 = vld [vmem:[#allocation10 + $0x378] sm:$0xff] }
 0x21a   : > { %v5317_v9 = vpack.c.bf16 %v1440_v8, %v1436_v7  ;;  %v1507_v7 = vld [vmem:[#allocation10 + $0x590] sm:$0xff] }
 0x21b   : > { %v1511_v8 = vld [vmem:[#allocation10 + $0x5b0] sm:$0xff] }
 0x21c   : > { %5280 = vmatpush1.bf16.msra.mxu0 %v5279_v14  ;;  %v1150_v14 = vld [vmem:[#allocation9 + $0x188] sm:$0xff] }
 0x21d   : > { %5282 = vmatprep.subr.bf16.mxu0 %v5281_v17  ;;  %v5033_v17 = vpack.c.bf16 %v1154_v15, %v1150_v14  ;;  %v1448_v14 = vld [vmem:[#allocation10 + $0x3b8] sm:$0xff] }
 0x21e   : > { %v5321_v15 = vpack.c.bf16 %v1448_v14, %v1444_v13  ;;  %v1515_v13 = vld [vmem:[#allocation10 + $0x5d0] sm:$0xff] }
 0x21f   : > { %v1519_v14 = vld [vmem:[#allocation10 + $0x5f0] sm:$0xff] }
 0x220   : > { %5284 = vmatpush1.bf16.msra.mxu0 %v5283_v20  ;;  %v5035_v20 = vpack.c.bf16 %v1153_v19, %v1149_v18  ;;  %v1452_v19 = vld [vmem:[#allocation10 + $0x3d8] sm:$0xff] }
 0x221   : > { %5286 = vmatprep.subr.bf16.mxu0 %v5285_v23  ;;  %v5293_v23 = vpack.c.bf16 %v1392_v22, %v1388_v21  ;;  %v1451_v22 = vld [vmem:[#allocation10 + $0x3d0] sm:$0xff] }
 0x224   : > { %5288 = vmatpush1.bf16.msra.mxu0 %v5287_v26  ;;  %v5037_v26 = vpack.c.bf16 %v1162_v25, %v1158_v24  ;;  %v1460_v25 = vld [vmem:[#allocation10 + $0x418] sm:$0xff] }
 0x225   : > { %5290 = vmatprep.subr.bf16.mxu0 %v5289_v29  ;;  %v1157_v29 = vld [vmem:[#allocation9 + $0x1c0] sm:$0xff] }
 0x228   : > { %5292 = vmatpush1.bf16.msra.mxu0 %v5291_v32  ;;  %v5039_v32 = vpack.c.bf16 %v1161_v31, %v1157_v29  ;;  %v1459_v29 = vld [vmem:[#allocation10 + $0x410] sm:$0xff] }
 0x229   : > { %5294 = vmatprep.subr.bf16.mxu0 %v5293_v23  ;;  %v1455_v23 = vld [vmem:[#allocation10 + $0x3f0] sm:$0xff] }
 0x22a   : > { %v5327_v24 = vpack.c.bf16 %v1455_v23, %v1451_v22  ;;  %v7093_v31 = vld [vmem:[%s7042_s0] sm:$0xff]  ;;  %v1532_v22 = vld [vmem:[#allocation10 + $0x658] sm:$0xff] }
 0x22b   : > { %v1536_v23 = vld [vmem:[#allocation10 + $0x678] sm:$0xff] }
 0x22c   : > { %5296 = vmatpush1.bf16.msra.mxu0 %v5295_v30  ;;  %v1463_v30 = vld [vmem:[#allocation10 + $0x430] sm:$0xff] }
 0x2e2   : > { %v983_v40 = vpop.f32.mrb[0].mxu0 }
 0x2e3   : > { %v5793_v41 = vadd.f32 %v983_v40, %v839_v38  ;;  %v985_v42 = vpop.f32.mrb[1].mxu0  ;;  %v1400_v38 = vld [vmem:[#allocation10 + $0x238] sm:$0xff] }
 0x2e4   : > { %v5794_v45 = vadd.f32 %v985_v42, %v843_v39  ;;  %v5297_v39 = vpack.c.bf16 %v1400_v38, %v1396_v36  ;;  %v1104_v40 = vld [vmem:[#allocation9 + $0x18] sm:$0xff]  ;;  %v1395_v42 = vld [vmem:[#allocation10 + $0x210] sm:$0xff] }
 0x2e5   : > { %v988_v50 = vmax.f32 %v5793_v41, 0.0  ;;  %v1108_v41 = vld [vmem:[#allocation9 + $0x38] sm:$0xff] }
 0x2e6   : > { %v989_v48 = vmax.f32 %v5794_v45, 0.0  ;;  %v5041_v43 = vpack.c.bf16 %v1108_v41, %v1104_v40  ;;  %5298 = vmatprep.subr.bf16.mxu0 %v5297_v39  ;;  %v5299_v45 = vpack.c.bf16 %v1399_v44, %v1395_v42  ;;  %v1468_v36 = vld [vmem:[#allocation10 + $0x458] sm:$0xff]  ;;  %v1467_v40 = vld [vmem:[#allocation10 + $0x450] sm:$0xff] }
 0x2e7   : > { %v1472_v38 = vld [vmem:[#allocation10 + $0x478] sm:$0xff]  ;;  %v1471_v41 = vld [vmem:[#allocation10 + $0x470] sm:$0xff] }
 0x2e8   : > { %1093 = vmatprep.mubr.f32.mxu1 %v989_v48  ;;  %5300 = vmatpush1.bf16.msra.mxu0 %v5299_v45  ;;  %v1408_v48 = vld [vmem:[#allocation10 + $0x278] sm:$0xff]  ;;  %v5333_v39 = vpack.c.bf16 %v1472_v38, %v1468_v36  ;;  %v5335_v42 = vpack.c.bf16 %v1471_v41, %v1467_v40  ;;  %v1539_v36 = vld [vmem:[#allocation10 + $0x690] sm:$0xff] }
 0x2e9   : > { %1094 = vmatmul.mubr.f32.vlgmr.msra.gmra.mrb[0].mxu1 %v988_v50  ;;  %v1403_v50 = vld [vmem:[#allocation10 + $0x250] sm:$0xff]  ;;  %v1480_v44 = vld [vmem:[#allocation10 + $0x4b8] sm:$0xff] }
 0x2ea   : > { %5012 = vmatpush1.bf16.msra.mxu1 %v5011_v49  ;;  %1250 = vmatprep.mubr.f32.mxu1 %v6545_v46  ;;  %v5301_v49 = vpack.c.bf16 %v1408_v48, %v1404_v47  ;;  %v1475_v47 = vld [vmem:[#allocation10 + $0x490] sm:$0xff]  ;;  %v1548_v40 = vld [vmem:[#allocation10 + $0x6d8] sm:$0xff] }
 0x2eb   : > { %5014 = vmatprep.subr.bf16.mxu1 %v5013_v51  ;;  %v1407_v51 = vld [vmem:[#allocation10 + $0x270] sm:$0xff]  ;;  %v1552_v41 = vld [vmem:[#allocation10 + $0x6f8] sm:$0xff] }
 0x2ec   : > { %5302 = vmatprep.subr.bf16.mxu0 %v5301_v49  ;;  %v5303_v52 = vpack.c.bf16 %v1407_v51, %v1403_v50  ;;  %v1479_v48 = vld [vmem:[#allocation10 + $0x4b0] sm:$0xff]  ;;  %v1484_v50 = vld [vmem:[#allocation10 + $0x4d8] sm:$0xff] }
 0x2ed   : > { %v5339_v49 = vpack.c.bf16 %v1479_v48, %v1475_v47  ;;  %v1488_v51 = vld [vmem:[#allocation10 + $0x4f8] sm:$0xff]  ;;  %v1543_v38 = vld [vmem:[#allocation10 + $0x6b0] sm:$0xff] }
 0x2ee   : > { %5016 = vmatpush1.bf16.msra.mxu1 %v5015_v56  ;;  %5304 = vmatpush1.bf16.msra.mxu0 %v5303_v52  ;;  %v1411_v56 = vld [vmem:[#allocation10 + $0x290] sm:$0xff]  ;;  %v5341_v52 = vpack.c.bf16 %v1488_v51, %v1484_v50  ;;  %v1556_v47 = vld [vmem:[#allocation10 + $0x718] sm:$0xff] }
 0x2ef   : > { %5018 = vmatprep.subr.bf16.mxu1 %v5017_v57  ;;  %v1415_v57 = vld [vmem:[#allocation10 + $0x2b0] sm:$0xff]  ;;  %5306 = vmatprep.subr.bf16.mxu0 %v5305_v55  ;;  %v5343_v55 = vpack.c.bf16 %v1487_v54, %v1483_v53  ;;  %v1560_v48 = vld [vmem:[#allocation10 + $0x738] sm:$0xff] }
 0x2f0   : > { %v5307_v58 = vpack.c.bf16 %v1415_v57, %v1411_v56  ;;  %v1492_v56 = vld [vmem:[#allocation10 + $0x518] sm:$0xff]  ;;  %v1555_v50 = vld [vmem:[#allocation10 + $0x710] sm:$0xff] }
 0x2f1   : > { %v1496_v57 = vld [vmem:[#allocation10 + $0x538] sm:$0xff]  ;;  %v1559_v51 = vld [vmem:[#allocation10 + $0x730] sm:$0xff] }
 0x2f2   : > { %5020 = vmatpush1.bf16.msra.mxu1 %v5019_v62  ;;  %5308 = vmatpush1.bf16.msra.mxu0 %v5307_v58  ;;  %v1419_v62 = vld [vmem:[#allocation10 + $0x2d0] sm:$0xff]  ;;  %v5345_v58 = vpack.c.bf16 %v1496_v57, %v1492_v56  ;;  %v1564_v53 = vld [vmem:[#allocation10 + $0x758] sm:$0xff] }
 0x2f3   : > { %5022 = vmatprep.subr.bf16.mxu1 %v5021_v63  ;;  %v1423_v63 = vld [vmem:[#allocation10 + $0x2f0] sm:$0xff]  ;;  %5310 = vmatprep.subr.bf16.mxu0 %v5309_v61  ;;  %v5347_v61 = vpack.c.bf16 %v1495_v60, %v1491_v59  ;;  %v1568_v54 = vld [vmem:[#allocation10 + $0x778] sm:$0xff] }
 0x2f4   : > { %v5311_v0 = vpack.c.bf16 %v1423_v63, %v1419_v62  ;;  %v1500_v62 = vld [vmem:[#allocation10 + $0x558] sm:$0xff]  ;;  %v1563_v56 = vld [vmem:[#allocation10 + $0x750] sm:$0xff] }
 0x2f5   : > { %v1504_v63 = vld [vmem:[#allocation10 + $0x578] sm:$0xff]  ;;  %v1567_v57 = vld [vmem:[#allocation10 + $0x770] sm:$0xff] }
 0x2f6   : > { %5024 = vmatpush1.bf16.msra.mxu1 %v5023_v4  ;;  %5312 = vmatpush1.bf16.msra.mxu0 %v5311_v0  ;;  %v1427_v4 = vld [vmem:[#allocation10 + $0x310] sm:$0xff]  ;;  %v5349_v0 = vpack.c.bf16 %v1504_v63, %v1500_v62  ;;  %v1572_v59 = vld [vmem:[#allocation10 + $0x798] sm:$0xff] }
 0x2f7   : > { %5026 = vmatprep.subr.bf16.mxu1 %v5025_v5  ;;  %v1431_v5 = vld [vmem:[#allocation10 + $0x330] sm:$0xff]  ;;  %5314 = vmatprep.subr.bf16.mxu0 %v5313_v3  ;;  %v5351_v3 = vpack.c.bf16 %v1503_v2, %v1499_v1  ;;  %v1576_v60 = vld [vmem:[#allocation10 + $0x7b8] sm:$0xff] }
 0x2f8   : > { %v5315_v6 = vpack.c.bf16 %v1431_v5, %v1427_v4  ;;  %v1508_v4 = vld [vmem:[#allocation10 + $0x598] sm:$0xff]  ;;  %v1571_v62 = vld [vmem:[#allocation10 + $0x790] sm:$0xff] }
 0x2f9   : > { %v1512_v5 = vld [vmem:[#allocation10 + $0x5b8] sm:$0xff]  ;;  %v1575_v63 = vld [vmem:[#allocation10 + $0x7b0] sm:$0xff] }
 0x2fa   : > { %5028 = vmatpush1.bf16.msra.mxu1 %v5027_v10  ;;  %5316 = vmatpush1.bf16.msra.mxu0 %v5315_v6  ;;  %v1435_v10 = vld [vmem:[#allocation10 + $0x350] sm:$0xff]  ;;  %v5353_v6 = vpack.c.bf16 %v1512_v5, %v1508_v4  ;;  %v1580_v1 = vld [vmem:[#allocation10 + $0x7d8] sm:$0xff] }
 0x2fb   : > { %5030 = vmatprep.subr.bf16.mxu1 %v5029_v11  ;;  %v1439_v11 = vld [vmem:[#allocation10 + $0x370] sm:$0xff]  ;;  %5318 = vmatprep.subr.bf16.mxu0 %v5317_v9  ;;  %v5355_v9 = vpack.c.bf16 %v1511_v8, %v1507_v7  ;;  %v1584_v2 = vld [vmem:[#allocation10 + $0x7f8] sm:$0xff] }
 0x2fc   : > { %v5319_v12 = vpack.c.bf16 %v1439_v11, %v1435_v10  ;;  %v1516_v10 = vld [vmem:[#allocation10 + $0x5d8] sm:$0xff]  ;;  %v1579_v4 = vld [vmem:[#allocation10 + $0x7d0] sm:$0xff] }
 0x2fd   : > { %v1520_v11 = vld [vmem:[#allocation10 + $0x5f8] sm:$0xff]  ;;  %v1583_v5 = vld [vmem:[#allocation10 + $0x7f0] sm:$0xff] }
 0x2fe   : > { %5032 = vmatpush1.bf16.msra.mxu1 %v5031_v16  ;;  %5320 = vmatpush1.bf16.msra.mxu0 %v5319_v12  ;;  %v1443_v16 = vld [vmem:[#allocation10 + $0x390] sm:$0xff]  ;;  %v5357_v12 = vpack.c.bf16 %v1520_v11, %v1516_v10  ;;  %v1588_v7 = vld [vmem:[#allocation10 + $0x818] sm:$0xff] }
 0x2ff   : > { %5034 = vmatprep.subr.bf16.mxu1 %v5033_v17  ;;  %v1447_v17 = vld [vmem:[#allocation10 + $0x3b0] sm:$0xff]  ;;  %5322 = vmatprep.subr.bf16.mxu0 %v5321_v15  ;;  %v5359_v15 = vpack.c.bf16 %v1519_v14, %v1515_v13  ;;  %v1592_v8 = vld [vmem:[#allocation10 + $0x838] sm:$0xff] }
 0x300   : > { %v5323_v18 = vpack.c.bf16 %v1447_v17, %v1443_v16  ;;  %v1524_v16 = vld [vmem:[#allocation10 + $0x618] sm:$0xff]  ;;  %v5393_v10 = vpack.c.bf16 %v1592_v8, %v1588_v7  ;;  %v7101_v11 = vld [vmem:[%s7042_s0 + $0x10] sm:$0xff] }
 0x301   : > { %v1528_v17 = vld [vmem:[#allocation10 + $0x638] sm:$0xff]  ;;  %v1591_v13 = vld [vmem:[#allocation10 + $0x830] sm:$0xff] }
 0x302   : > { %5036 = vmatpush1.bf16.msra.mxu1 %v5035_v20  ;;  %v1456_v20 = vld [vmem:[#allocation10 + $0x3f8] sm:$0xff]  ;;  %5324 = vmatpush1.bf16.msra.mxu0 %v5323_v18  ;;  %v5361_v18 = vpack.c.bf16 %v1528_v17, %v1524_v16 }
 0x303   : > { %5038 = vmatprep.subr.bf16.mxu1 %v5037_v26  ;;  %v5325_v21 = vpack.c.bf16 %v1456_v20, %v1452_v19  ;;  %v1464_v26 = vld [vmem:[#allocation10 + $0x438] sm:$0xff]  ;;  %v1523_v19 = vld [vmem:[#allocation10 + $0x610] sm:$0xff] }
 0x304   : > { %v5329_v28 = vpack.c.bf16 %v1464_v26, %v1460_v25  ;;  %v1527_v20 = vld [vmem:[#allocation10 + $0x630] sm:$0xff]  ;;  %v1600_v16 = vld [vmem:[#allocation10 + $0x878] sm:$0xff] }
 0x305   : > { %5326 = vmatprep.subr.bf16.mxu0 %v5325_v21  ;;  %v5363_v21 = vpack.c.bf16 %v1527_v20, %v1523_v19  ;;  %v1531_v25 = vld [vmem:[#allocation10 + $0x650] sm:$0xff] }
 0x306   : > { %5040 = vmatpush1.bf16.msra.mxu1 %v5039_v32  ;;  %5328 = vmatpush1.bf16.msra.mxu0 %v5327_v24  ;;  %v5331_v32 = vpack.c.bf16 %v1463_v30, %v1459_v29  ;;  %v5365_v24 = vpack.c.bf16 %v1536_v23, %v1532_v22  ;;  %v1535_v26 = vld [vmem:[#allocation10 + $0x670] sm:$0xff]  ;;  %v1540_v29 = vld [vmem:[#allocation10 + $0x698] sm:$0xff] }
 0x307   : > { %5042 = vmatprep.subr.bf16.mxu1 %v5041_v43  ;;  %5330 = vmatprep.subr.bf16.mxu0 %v5329_v28  ;;  %v1476_v43 = vld [vmem:[#allocation10 + $0x498] sm:$0xff]  ;;  %v5367_v28 = vpack.c.bf16 %v1535_v26, %v1531_v25  ;;  %v1599_v19 = vld [vmem:[#allocation10 + $0x870] sm:$0xff] }
 0x308   : > { %v5337_v45 = vpack.c.bf16 %v1480_v44, %v1476_v43  ;;  %v1544_v30 = vld [vmem:[#allocation10 + $0x6b8] sm:$0xff]  ;;  %v1547_v43 = vld [vmem:[#allocation10 + $0x6d0] sm:$0xff] }
 0x309   : > { %2012 = vmatmul.mubr.f32.vlgmr.msra.gmra.mrb[2].mxu0 %v7093_v31  ;;  %v1551_v44 = vld [vmem:[#allocation10 + $0x6f0] sm:$0xff]  ;;  %v1608_v22 = vld [vmem:[#allocation10 + $0x8b8] sm:$0xff] }
 0x30a   : > { %5332 = vmatpush1.bf16.msra.mxu0 %v5331_v32  ;;  %v5369_v32 = vpack.c.bf16 %v1544_v30, %v1540_v29  ;;  %v1607_v25 = vld [vmem:[#allocation10 + $0x8b0] sm:$0xff]  ;;  %v1616_v29 = vld [vmem:[#allocation10 + $0x8f8] sm:$0xff] }
 0x30b   : > { %5334 = vmatprep.subr.bf16.mxu0 %v5333_v39  ;;  %v5371_v39 = vpack.c.bf16 %v1543_v38, %v1539_v36  ;;  %v1615_v36 = vld [vmem:[#allocation10 + $0x8f0] sm:$0xff] }
 0x30e   : > { %5336 = vmatpush1.bf16.msra.mxu0 %v5335_v42  ;;  %v5373_v42 = vpack.c.bf16 %v1552_v41, %v1548_v40  ;;  %v1624_v40 = vld [vmem:[#allocation10 + $0x938] sm:$0xff] }
 0x30f   : > { %5338 = vmatprep.subr.bf16.mxu0 %v5337_v45  ;;  %v5375_v45 = vpack.c.bf16 %v1551_v44, %v1547_v43  ;;  %v1623_v43 = vld [vmem:[#allocation10 + $0x930] sm:$0xff] }
 0x312   : > { %5340 = vmatpush1.bf16.msra.mxu0 %v5339_v49  ;;  %v5377_v49 = vpack.c.bf16 %v1560_v48, %v1556_v47  ;;  %v1632_v47 = vld [vmem:[#allocation10 + $0x978] sm:$0xff] }
 0x313   : > { %5342 = vmatprep.subr.bf16.mxu0 %v5341_v52  ;;  %v5379_v52 = vpack.c.bf16 %v1559_v51, %v1555_v50  ;;  %v1631_v50 = vld [vmem:[#allocation10 + $0x970] sm:$0xff] }
 0x316   : > { %5344 = vmatpush1.bf16.msra.mxu0 %v5343_v55  ;;  %v5381_v55 = vpack.c.bf16 %v1568_v54, %v1564_v53  ;;  %v1640_v53 = vld [vmem:[#allocation10 + $0x9b8] sm:$0xff] }
 0x317   : > { %5346 = vmatprep.subr.bf16.mxu0 %v5345_v58  ;;  %v5383_v58 = vpack.c.bf16 %v1567_v57, %v1563_v56  ;;  %v1639_v56 = vld [vmem:[#allocation10 + $0x9b0] sm:$0xff] }
 0x31a   : > { %5348 = vmatpush1.bf16.msra.mxu0 %v5347_v61  ;;  %v5385_v61 = vpack.c.bf16 %v1576_v60, %v1572_v59  ;;  %v1644_v59 = vld [vmem:[#allocation10 + $0x9d8] sm:$0xff] }
 0x31b   : > { %5350 = vmatprep.subr.bf16.mxu0 %v5349_v0  ;;  %v5387_v0 = vpack.c.bf16 %v1575_v63, %v1571_v62  ;;  %v1648_v60 = vld [vmem:[#allocation10 + $0x9f8] sm:$0xff] }
 0x31c   : > { %v5421_v63 = vpack.c.bf16 %v1648_v60, %v1644_v59  ;;  %v1675_v59 = vld [vmem:[#allocation10 + $0xad0] sm:$0xff] }
 0x31e   : > { %5352 = vmatpush1.bf16.msra.mxu0 %v5351_v3  ;;  %v5389_v3 = vpack.c.bf16 %v1584_v2, %v1580_v1  ;;  %v1103_v2 = vld [vmem:[#allocation9 + $0x10] sm:$0xff] }
 0x31f   : > { %5354 = vmatprep.subr.bf16.mxu0 %v5353_v6  ;;  %v5391_v6 = vpack.c.bf16 %v1583_v5, %v1579_v4  ;;  %v1647_v4 = vld [vmem:[#allocation10 + $0x9f0] sm:$0xff]  ;;  %v1112_v5 = vld [vmem:[#allocation9 + $0x58] sm:$0xff] }
 0x322   : > { %5356 = vmatpush1.bf16.msra.mxu0 %v5355_v9  ;;  %v7097_v9 = vld [vmem:[%s7042_s0 + $0x18] sm:$0xff] }
 0x323   : > { %5358 = vmatprep.subr.bf16.mxu0 %v5357_v12  ;;  %2082 = vmatprep.mubr.f32.mxu0 %v7097_v9  ;;  %v1587_v12 = vld [vmem:[#allocation10 + $0x810] sm:$0xff] }
 0x324   : > { %v5395_v14 = vpack.c.bf16 %v1591_v13, %v1587_v12  ;;  %v1656_v12 = vld [vmem:[#allocation10 + $0xa38] sm:$0xff] }
 0x326   : > { %5360 = vmatpush1.bf16.msra.mxu0 %v5359_v15  ;;  %v1596_v15 = vld [vmem:[#allocation10 + $0x858] sm:$0xff] }
 0x327   : > { %5362 = vmatprep.subr.bf16.mxu0 %v5361_v18  ;;  %v5397_v17 = vpack.c.bf16 %v1600_v16, %v1596_v15  ;;  %v1595_v18 = vld [vmem:[#allocation10 + $0x850] sm:$0xff] }
 0x328   : > { %v5399_v20 = vpack.c.bf16 %v1599_v19, %v1595_v18  ;;  %v1651_v15 = vld [vmem:[#allocation10 + $0xa10] sm:$0xff] }
 0x329   : > { %v1111_v18 = vld [vmem:[#allocation9 + $0x50] sm:$0xff] }
 0x32a   : > { %5364 = vmatpush1.bf16.msra.mxu0 %v5363_v21  ;;  %v1604_v21 = vld [vmem:[#allocation10 + $0x898] sm:$0xff]  ;;  %v1115_v19 = vld [vmem:[#allocation9 + $0x70] sm:$0xff] }
 0x32b   : > { %5366 = vmatprep.subr.bf16.mxu0 %v5365_v24  ;;  %v5401_v23 = vpack.c.bf16 %v1608_v22, %v1604_v21  ;;  %v1603_v24 = vld [vmem:[#allocation10 + $0x890] sm:$0xff]  ;;  %v1120_v21 = vld [vmem:[#allocation9 + $0x98] sm:$0xff] }
 0x32c   : > { %v5403_v26 = vpack.c.bf16 %v1607_v25, %v1603_v24  ;;  %v1124_v22 = vld [vmem:[#allocation9 + $0xb8] sm:$0xff] }
 0x32d   : > { %v1660_v24 = vld [vmem:[#allocation10 + $0xa58] sm:$0xff] }
 0x32e   : > { %5368 = vmatpush1.bf16.msra.mxu0 %v5367_v28  ;;  %v1612_v28 = vld [vmem:[#allocation10 + $0x8d8] sm:$0xff] }
 0x32f   : > { %5370 = vmatprep.subr.bf16.mxu0 %v5369_v32  ;;  %v5405_v30 = vpack.c.bf16 %v1616_v29, %v1612_v28  ;;  %v1611_v32 = vld [vmem:[#allocation10 + $0x8d0] sm:$0xff]  ;;  %v1664_v25 = vld [vmem:[#allocation10 + $0xa78] sm:$0xff] }
 0x330   : > { %v5407_v38 = vpack.c.bf16 %v1615_v36, %v1611_v32  ;;  %v5429_v28 = vpack.c.bf16 %v1664_v25, %v1660_v24  ;;  %v1659_v29 = vld [vmem:[#allocation10 + $0xa50] sm:$0xff] }
 0x331   : > { %v1119_v32 = vld [vmem:[#allocation9 + $0x90] sm:$0xff] }
 0x332   : > { %5372 = vmatpush1.bf16.msra.mxu0 %v5371_v39  ;;  %v1620_v39 = vld [vmem:[#allocation10 + $0x918] sm:$0xff]  ;;  %v1123_v36 = vld [vmem:[#allocation9 + $0xb0] sm:$0xff] }
 0x333   : > { %5374 = vmatprep.subr.bf16.mxu0 %v5373_v42  ;;  %v5409_v41 = vpack.c.bf16 %v1624_v40, %v1620_v39  ;;  %v1619_v42 = vld [vmem:[#allocation10 + $0x910] sm:$0xff]  ;;  %v1128_v39 = vld [vmem:[#allocation9 + $0xd8] sm:$0xff] }
 0x334   : > { %v5411_v44 = vpack.c.bf16 %v1623_v43, %v1619_v42  ;;  %v1132_v40 = vld [vmem:[#allocation9 + $0xf8] sm:$0xff]  ;;  %v1151_v25 = vld [vmem:[#allocation9 + $0x190] sm:$0xff] }
 0x335   : > { %v1668_v42 = vld [vmem:[#allocation10 + $0xa98] sm:$0xff] }
 0x336   : > { %5376 = vmatpush1.bf16.msra.mxu0 %v5375_v45  ;;  %v1628_v45 = vld [vmem:[#allocation10 + $0x958] sm:$0xff] }
 0x337   : > { %5378 = vmatprep.subr.bf16.mxu0 %v5377_v49  ;;  %v5413_v48 = vpack.c.bf16 %v1632_v47, %v1628_v45  ;;  %v1627_v49 = vld [vmem:[#allocation10 + $0x950] sm:$0xff]  ;;  %v1672_v43 = vld [vmem:[#allocation10 + $0xab8] sm:$0xff] }
 0x338   : > { %v5415_v51 = vpack.c.bf16 %v1631_v50, %v1627_v49  ;;  %v5433_v45 = vpack.c.bf16 %v1672_v43, %v1668_v42  ;;  %v1667_v47 = vld [vmem:[#allocation10 + $0xa90] sm:$0xff] }
 0x339   : > { %v1127_v49 = vld [vmem:[#allocation9 + $0xd0] sm:$0xff] }
 0x33a   : > { %5380 = vmatpush1.bf16.msra.mxu0 %v5379_v52  ;;  %v1636_v52 = vld [vmem:[#allocation10 + $0x998] sm:$0xff]  ;;  %v1131_v50 = vld [vmem:[#allocation9 + $0xf0] sm:$0xff] }
 0x33b   : > { %5382 = vmatprep.subr.bf16.mxu0 %v5381_v55  ;;  %v5417_v54 = vpack.c.bf16 %v1640_v53, %v1636_v52  ;;  %v1635_v55 = vld [vmem:[#allocation10 + $0x990] sm:$0xff]  ;;  %v1136_v52 = vld [vmem:[#allocation9 + $0x118] sm:$0xff] }
 0x33c   : > { %v5419_v57 = vpack.c.bf16 %v1639_v56, %v1635_v55  ;;  %v1140_v53 = vld [vmem:[#allocation9 + $0x138] sm:$0xff]  ;;  %v1159_v43 = vld [vmem:[#allocation9 + $0x1d0] sm:$0xff] }
 0x33d   : > { %v1676_v55 = vld [vmem:[#allocation10 + $0xad8] sm:$0xff]  ;;  %v5057_v60 = vpack.c.bf16 %v1140_v53, %v1136_v52 }
 0x33e   : > { %5384 = vmatpush1.bf16.msra.mxu0 %v5383_v58  ;;  %v1680_v56 = vld [vmem:[#allocation10 + $0xaf8] sm:$0xff] }
 0x33f   : > { %5386 = vmatprep.subr.bf16.mxu0 %v5385_v61  ;;  %v4592_v61 = vld [vmem:[#allocation21 + $0x2] ss:$0 sm:$0xff] }
 0x342   : > { %5388 = vmatpush1.bf16.msra.mxu0 %v5387_v0  ;;  %v1643_v0 = vld [vmem:[#allocation10 + $0x9d0] sm:$0xff] }
 0x343   : > { %5390 = vmatprep.subr.bf16.mxu0 %v5389_v3  ;;  %v1107_v3 = vld [vmem:[#allocation9 + $0x30] sm:$0xff]  ;;  %v5423_v7 = vpack.c.bf16 %v1647_v4, %v1643_v0  ;;  %v1144_v0 = vld [vmem:[#allocation9 + $0x158] sm:$0xff] }
 0x344   : > { %v5043_v13 = vpack.c.bf16 %v1107_v3, %v1103_v2  ;;  %v1684_v3 = vld [vmem:[#allocation10 + $0xb18] sm:$0xff] }
 0x345   : > { %v1688_v4 = vld [vmem:[#allocation10 + $0xb38] sm:$0xff] }
 0x346   : > { %5392 = vmatpush1.bf16.msra.mxu0 %v5391_v6  ;;  %v1116_v6 = vld [vmem:[#allocation9 + $0x78] sm:$0xff] }
 0x347   : > { %5394 = vmatprep.subr.bf16.mxu0 %v5393_v10  ;;  %v1652_v10 = vld [vmem:[#allocation10 + $0xa18] sm:$0xff] }
 0x349   : > { %2083 = vmatmul.mubr.f32.vlgmr.msra.gmra.mrb[2].mxu0 %v7101_v11 }
 0x34a   : > { %5396 = vmatpush1.bf16.msra.mxu0 %v5395_v14  ;;  %v5425_v14 = vpack.c.bf16 %v1656_v12, %v1652_v10  ;;  %v1143_v12 = vld [vmem:[#allocation9 + $0x150] sm:$0xff] }
 0x34b   : > { %5398 = vmatprep.subr.bf16.mxu0 %v5397_v17  ;;  %v5045_v17 = vpack.c.bf16 %v1116_v6, %v1112_v5  ;;  %v5441_v6 = vpack.c.bf16 %v1688_v4, %v1684_v3  ;;  %v1346_v3 = vld [vmem:[#allocation10 + $0x88] sm:$0xff] }
 0x34c   : > { %v1350_v4 = vld [vmem:[#allocation10 + $0xa8] sm:$0xff] }
 0x34e   : > { %5400 = vmatpush1.bf16.msra.mxu0 %v5399_v20  ;;  %v1655_v20 = vld [vmem:[#allocation10 + $0xa30] sm:$0xff] }
 0x34f   : > { %5402 = vmatprep.subr.bf16.mxu0 %v5401_v23  ;;  %v5427_v23 = vpack.c.bf16 %v1655_v20, %v1651_v15  ;;  %v1152_v15 = vld [vmem:[#allocation9 + $0x198] sm:$0xff] }
 0x350   : > { %v1696_v20 = vld [vmem:[#allocation10 + $0xb78] sm:$0xff] }
 0x352   : > { %5404 = vmatpush1.bf16.msra.mxu0 %v5403_v26  ;;  %v5047_v26 = vpack.c.bf16 %v1115_v19, %v1111_v18  ;;  %v1692_v19 = vld [vmem:[#allocation10 + $0xb58] sm:$0xff] }
 0x353   : > { %5406 = vmatprep.subr.bf16.mxu0 %v5405_v30  ;;  %v5049_v30 = vpack.c.bf16 %v1124_v22, %v1120_v21  ;;  %v5445_v22 = vpack.c.bf16 %v1696_v20, %v1692_v19  ;;  %v1357_v19 = vld [vmem:[#allocation10 + $0xe0] sm:$0xff] }
 0x356   : > { %5408 = vmatpush1.bf16.msra.mxu0 %v5407_v38  ;;  %v1663_v38 = vld [vmem:[#allocation10 + $0xa70] sm:$0xff] }
 0x357   : > { %5410 = vmatprep.subr.bf16.mxu0 %v5409_v41  ;;  %v5431_v41 = vpack.c.bf16 %v1663_v38, %v1659_v29  ;;  %v1160_v29 = vld [vmem:[#allocation9 + $0x1d8] sm:$0xff] }
 0x358   : > { %v1704_v38 = vld [vmem:[#allocation10 + $0xbb8] sm:$0xff] }
 0x35a   : > { %5412 = vmatpush1.bf16.msra.mxu0 %v5411_v44  ;;  %v5051_v44 = vpack.c.bf16 %v1123_v36, %v1119_v32  ;;  %v1700_v36 = vld [vmem:[#allocation10 + $0xb98] sm:$0xff] }
 0x35b   : > { %5414 = vmatprep.subr.bf16.mxu0 %v5413_v48  ;;  %v5053_v48 = vpack.c.bf16 %v1132_v40, %v1128_v39  ;;  %v5449_v40 = vpack.c.bf16 %v1704_v38, %v1700_v36 }
 0x35e   : > { %5416 = vmatpush1.bf16.msra.mxu0 %v5415_v51  ;;  %v1671_v51 = vld [vmem:[#allocation10 + $0xab0] sm:$0xff] }
 0x35f   : > { %5418 = vmatprep.subr.bf16.mxu0 %v5417_v54  ;;  %v5435_v54 = vpack.c.bf16 %v1671_v51, %v1667_v47  ;;  %v1330_v47 = vld [vmem:[#allocation10 + $0x8] sm:$0xff]  ;;  %v1712_v51 = vld [vmem:[#allocation10 + $0xbf8] sm:$0xff] }
 0x362   : > { %5420 = vmatpush1.bf16.msra.mxu0 %v5419_v57  ;;  %v5055_v57 = vpack.c.bf16 %v1131_v50, %v1127_v49  ;;  %v1708_v50 = vld [vmem:[#allocation10 + $0xbd8] sm:$0xff] }
 0x363   : > { %5422 = vmatprep.subr.bf16.mxu0 %v5421_v63  ;;  %v1679_v63 = vld [vmem:[#allocation10 + $0xaf0] sm:$0xff]  ;;  %v5453_v53 = vpack.c.bf16 %v1712_v51, %v1708_v50 }
 0x364   : > { %v5439_v2 = vpack.c.bf16 %v1679_v63, %v1675_v59  ;;  %v1338_v59 = vld [vmem:[#allocation10 + $0x48] sm:$0xff] }
 0x365   : > { %v7111_v63 = vld [vmem:[%s7042_s0 + $0x28] sm:$0xff] }
 0x366   : > { %5424 = vmatpush1.bf16.msra.mxu0 %v5423_v7  ;;  %v1683_v7 = vld [vmem:[#allocation10 + $0xb10] sm:$0xff]  ;;  %2153 = vmatprep.mubr.f32.mxu0 %v7111_v63 }
 0x367   : > { %5426 = vmatprep.subr.bf16.mxu0 %v5425_v14  ;;  %v1687_v14 = vld [vmem:[#allocation10 + $0xb30] sm:$0xff] }
 0x368   : > { %v5443_v18 = vpack.c.bf16 %v1687_v14, %v1683_v7  ;;  %v5081_v7 = vpack.c.bf16 %v1350_v4, %v1346_v3  ;;  %v1358_v14 = vld [vmem:[#allocation10 + $0xe8] sm:$0xff] }
 0x369   : > { %v1418_v3 = vld [vmem:[#allocation10 + $0x2c8] sm:$0xff] }
 0x36a   : > { %5428 = vmatpush1.bf16.msra.mxu0 %v5427_v23  ;;  %v1691_v23 = vld [vmem:[#allocation10 + $0xb50] sm:$0xff]  ;;  %v1422_v4 = vld [vmem:[#allocation10 + $0x2e8] sm:$0xff] }
 0x36b   : > { %5430 = vmatprep.subr.bf16.mxu0 %v5429_v28  ;;  %v1695_v28 = vld [vmem:[#allocation10 + $0xb70] sm:$0xff] }
 0x36c   : > { %v5447_v32 = vpack.c.bf16 %v1695_v28, %v1691_v23  ;;  %v1370_v23 = vld [vmem:[#allocation10 + $0x148] sm:$0xff]  ;;  %v1369_v28 = vld [vmem:[#allocation10 + $0x140] sm:$0xff] }
 0x36e   : > { %5432 = vmatpush1.bf16.msra.mxu0 %v5431_v41  ;;  %v1699_v41 = vld [vmem:[#allocation10 + $0xb90] sm:$0xff] }
 0x36f   : > { %5434 = vmatprep.subr.bf16.mxu0 %v5433_v45  ;;  %v1703_v45 = vld [vmem:[#allocation10 + $0xbb0] sm:$0xff] }
 0x370   : > { %v5451_v49 = vpack.c.bf16 %v1703_v45, %v1699_v41  ;;  %v1386_v41 = vld [vmem:[#allocation10 + $0x1c8] sm:$0xff]  ;;  %v1385_v45 = vld [vmem:[#allocation10 + $0x1c0] sm:$0xff] }
 0x372   : > { %5436 = vmatpush1.bf16.msra.mxu0 %v5435_v54  ;;  %v1707_v54 = vld [vmem:[#allocation10 + $0xbd0] sm:$0xff] }
 0x3bc   : > { %v4637_v58 = vpop.f32.mrb[0].mxu1 }
 0x3bd   : > { %v4638_v62 = vpop.f32.mrb[1].mxu1 }
 0x3be   : > { %v4639_v1 = vadd.f32 %v4638_v62, %v4637_v58  ;;  %v5437_v58 = vpack.c.bf16 %v1680_v56, %v1676_v55  ;;  %v1139_v62 = vld [vmem:[#allocation9 + $0x130] sm:$0xff]  ;;  %v1329_v56 = vld [vmem:[#allocation10] sm:$0xff] }
 0x3c0   : > { %v7104_v8 = vadd.f32 %v4639_v1, %v4592_v61  ;;  %v1135_v61 = vld [vmem:[#allocation9 + $0x110] sm:$0xff]  ;;  %v1148_v1 = vld [vmem:[#allocation9 + $0x178] sm:$0xff]  ;;  %5438 = vmatprep.subr.bf16.mxu0 %v5437_v58 }
 0x3c1   : > { %v5059_v5 = vpack.c.bf16 %v1139_v62, %v1135_v61  ;;  %v5061_v10 = vpack.c.bf16 %v1148_v1, %v1144_v0  ;;  %5440 = vmatpush1.bf16.msra.mxu0 %v5439_v2  ;;  %v1711_v58 = vld [vmem:[#allocation10 + $0xbf0] sm:$0xff]  ;;  %v1337_v1 = vld [vmem:[#allocation10 + $0x40] sm:$0xff] }
 0x3c2   : > { %v1099_v16 = vmax.f32 %v7104_v8, 0.0  ;;  %5442 = vmatprep.subr.bf16.mxu0 %v5441_v6  ;;  %v5455_v61 = vpack.c.bf16 %v1711_v58, %v1707_v54  ;;  %v1341_v2 = vld [vmem:[#allocation10 + $0x60] sm:$0xff]  ;;  %v1362_v8 = vld [vmem:[#allocation10 + $0x108] sm:$0xff] }
 0x3c3   : > { %v5079_v6 = vpack.c.bf16 %v1341_v2, %v1337_v1  ;;  %v1402_v54 = vld [vmem:[#allocation10 + $0x248] sm:$0xff]  ;;  %v1401_v58 = vld [vmem:[#allocation10 + $0x240] sm:$0xff] }
 0x3c4   : > { %1251 = vmatmul.mubr.f32.vlgmr.msra.gmra.mrb[2].mxu1 %v1099_v16  ;;  %v1409_v1 = vld [vmem:[#allocation10 + $0x280] sm:$0xff] }
 0x3c5   : > { %5044 = vmatpush1.bf16.msra.mxu1 %v5043_v13  ;;  %1321 = vmatprep.mubr.f32.mxu1 %v6545_v46  ;;  %v1147_v13 = vld [vmem:[#allocation9 + $0x170] sm:$0xff]  ;;  %v1413_v2 = vld [vmem:[#allocation10 + $0x2a0] sm:$0xff] }
 0x3c6   : > { %5046 = vmatprep.subr.bf16.mxu1 %v5045_v17  ;;  %v1156_v17 = vld [vmem:[#allocation9 + $0x1b8] sm:$0xff]  ;;  %v5063_v21 = vpack.c.bf16 %v1147_v13, %v1143_v12  ;;  %5444 = vmatpush1.bf16.msra.mxu0 %v5443_v18  ;;  %v1349_v12 = vld [vmem:[#allocation10 + $0xa0] sm:$0xff]  ;;  %v1354_v13 = vld [vmem:[#allocation10 + $0xc8] sm:$0xff] }
 0x3c7   : > { %v5065_v24 = vpack.c.bf16 %v1156_v17, %v1152_v15  ;;  %5446 = vmatprep.subr.bf16.mxu0 %v5445_v22  ;;  %v5085_v17 = vpack.c.bf16 %v1358_v14, %v1354_v13  ;;  %v1353_v18 = vld [vmem:[#allocation10 + $0xc0] sm:$0xff]  ;;  %v1426_v13 = vld [vmem:[#allocation10 + $0x308] sm:$0xff] }
 0x3c8   : > { %v5087_v20 = vpack.c.bf16 %v1357_v19, %v1353_v18  ;;  %v1365_v22 = vld [vmem:[#allocation10 + $0x120] sm:$0xff]  ;;  %v1430_v14 = vld [vmem:[#allocation10 + $0x328] sm:$0xff] }
 0x3c9   : > { %5048 = vmatpush1.bf16.msra.mxu1 %v5047_v26  ;;  %v1155_v26 = vld [vmem:[#allocation9 + $0x1b0] sm:$0xff]  ;;  %v1425_v18 = vld [vmem:[#allocation10 + $0x300] sm:$0xff] }
 0x3ca   : > { %5050 = vmatprep.subr.bf16.mxu1 %v5049_v30  ;;  %v1164_v30 = vld [vmem:[#allocation9 + $0x1f8] sm:$0xff]  ;;  %v5067_v39 = vpack.c.bf16 %v1155_v26, %v1151_v25  ;;  %5448 = vmatpush1.bf16.msra.mxu0 %v5447_v32  ;;  %v1382_v32 = vld [vmem:[#allocation10 + $0x1a8] sm:$0xff]  ;;  %v1429_v19 = vld [vmem:[#allocation10 + $0x320] sm:$0xff] }
 0x3cb   : > { %v5069_v42 = vpack.c.bf16 %v1164_v30, %v1160_v29  ;;  %5450 = vmatprep.subr.bf16.mxu0 %v5449_v40  ;;  %v1373_v29 = vld [vmem:[#allocation10 + $0x160] sm:$0xff]  ;;  %v1378_v30 = vld [vmem:[#allocation10 + $0x188] sm:$0xff] }
 0x3cc   : > { %v5095_v36 = vpack.c.bf16 %v1373_v29, %v1369_v28  ;;  %v5097_v38 = vpack.c.bf16 %v1382_v32, %v1378_v30  ;;  %v1381_v40 = vld [vmem:[#allocation10 + $0x1a0] sm:$0xff]  ;;  %v1450_v30 = vld [vmem:[#allocation10 + $0x3c8] sm:$0xff] }
 0x3cd   : > { %5052 = vmatpush1.bf16.msra.mxu1 %v5051_v44  ;;  %v1163_v44 = vld [vmem:[#allocation9 + $0x1f0] sm:$0xff]  ;;  %v1441_v28 = vld [vmem:[#allocation10 + $0x380] sm:$0xff]  ;;  %v1454_v32 = vld [vmem:[#allocation10 + $0x3e8] sm:$0xff] }
 0x3ce   : > { %5054 = vmatprep.subr.bf16.mxu1 %v5053_v48  ;;  %v1334_v48 = vld [vmem:[#allocation10 + $0x28] sm:$0xff]  ;;  %v5071_v52 = vpack.c.bf16 %v1163_v44, %v1159_v43  ;;  %5452 = vmatpush1.bf16.msra.mxu0 %v5451_v49  ;;  %v1445_v29 = vld [vmem:[#allocation10 + $0x3a0] sm:$0xff] }
 0x3cf   : > { %v5073_v55 = vpack.c.bf16 %v1334_v48, %v1330_v47  ;;  %5454 = vmatprep.subr.bf16.mxu0 %v5453_v53  ;;  %v1389_v47 = vld [vmem:[#allocation10 + $0x1e0] sm:$0xff]  ;;  %v1394_v48 = vld [vmem:[#allocation10 + $0x208] sm:$0xff] }
 0x3d0   : > { %v1398_v49 = vld [vmem:[#allocation10 + $0x228] sm:$0xff]  ;;  %v5103_v50 = vpack.c.bf16 %v1389_v47, %v1385_v45  ;;  %v1397_v53 = vld [vmem:[#allocation10 + $0x220] sm:$0xff] }
 0x3d1   : > { %5056 = vmatpush1.bf16.msra.mxu1 %v5055_v57  ;;  %v1333_v57 = vld [vmem:[#allocation10 + $0x20] sm:$0xff]  ;;  %v5105_v51 = vpack.c.bf16 %v1398_v49, %v1394_v48  ;;  %v1466_v48 = vld [vmem:[#allocation10 + $0x448] sm:$0xff] }
 0x3d2   : > { %5058 = vmatprep.subr.bf16.mxu1 %v5057_v60  ;;  %v1342_v60 = vld [vmem:[#allocation10 + $0x68] sm:$0xff]  ;;  %v5075_v62 = vpack.c.bf16 %v1333_v57, %v1329_v56  ;;  %5456 = vmatpush1.bf16.msra.mxu0 %v5455_v61  ;;  %v1457_v45 = vld [vmem:[#allocation10 + $0x400] sm:$0xff] }
 0x3d3   : > { %v5077_v0 = vpack.c.bf16 %v1342_v60, %v1338_v59  ;;  %v1405_v59 = vld [vmem:[#allocation10 + $0x260] sm:$0xff]  ;;  %v1410_v60 = vld [vmem:[#allocation10 + $0x288] sm:$0xff] }
 0x3d4   : > { %v1414_v61 = vld [vmem:[#allocation10 + $0x2a8] sm:$0xff]  ;;  %v1461_v47 = vld [vmem:[#allocation10 + $0x420] sm:$0xff] }
 0x3d5   : > { %5060 = vmatpush1.bf16.msra.mxu1 %v5059_v5  ;;  %v7115_v5 = vld [vmem:[%s7042_s0 + $0x20] sm:$0xff]  ;;  %v1470_v49 = vld [vmem:[#allocation10 + $0x468] sm:$0xff] }
 0x3d6   : > { %5062 = vmatprep.subr.bf16.mxu1 %v5061_v10  ;;  %v1345_v10 = vld [vmem:[#allocation10 + $0x80] sm:$0xff]  ;;  %2154 = vmatmul.mubr.f32.vlgmr.msra.gmra.mrb[2].mxu0 %v7115_v5 }
 0x3d7   : > { %v5083_v15 = vpack.c.bf16 %v1349_v12, %v1345_v10  ;;  %v1417_v10 = vld [vmem:[#allocation10 + $0x2c0] sm:$0xff] }
 0x3d8   : > { %v1421_v12 = vld [vmem:[#allocation10 + $0x2e0] sm:$0xff] }
 0x3d9   : > { %5064 = vmatpush1.bf16.msra.mxu1 %v5063_v21  ;;  %v1361_v21 = vld [vmem:[#allocation10 + $0x100] sm:$0xff] }
 0x3da   : > { %5066 = vmatprep.subr.bf16.mxu1 %v5065_v24  ;;  %v1374_v24 = vld [vmem:[#allocation10 + $0x168] sm:$0xff]  ;;  %v5091_v25 = vpack.c.bf16 %v1365_v22, %v1361_v21  ;;  %v1433_v21 = vld [vmem:[#allocation10 + $0x340] sm:$0xff] }
 0x3db   : > { %v5093_v26 = vpack.c.bf16 %v1374_v24, %v1370_v23  ;;  %v1437_v22 = vld [vmem:[#allocation10 + $0x360] sm:$0xff]  ;;  %v1442_v23 = vld [vmem:[#allocation10 + $0x388] sm:$0xff] }
 0x3dc   : > { %v1446_v24 = vld [vmem:[#allocation10 + $0x3a8] sm:$0xff] }
 0x3dd   : > { %5068 = vmatpush1.bf16.msra.mxu1 %v5067_v39  ;;  %v1377_v39 = vld [vmem:[#allocation10 + $0x180] sm:$0xff] }
 0x3de   : > { %5070 = vmatprep.subr.bf16.mxu1 %v5069_v42  ;;  %v1390_v42 = vld [vmem:[#allocation10 + $0x1e8] sm:$0xff]  ;;  %v5099_v43 = vpack.c.bf16 %v1381_v40, %v1377_v39  ;;  %v1449_v39 = vld [vmem:[#allocation10 + $0x3c0] sm:$0xff] }
 0x3df   : > { %v5101_v44 = vpack.c.bf16 %v1390_v42, %v1386_v41  ;;  %v1453_v40 = vld [vmem:[#allocation10 + $0x3e0] sm:$0xff]  ;;  %v1458_v41 = vld [vmem:[#allocation10 + $0x408] sm:$0xff] }
 0x3e0   : > { %v1462_v42 = vld [vmem:[#allocation10 + $0x428] sm:$0xff] }
 0x3e1   : > { %5072 = vmatpush1.bf16.msra.mxu1 %v5071_v52  ;;  %v1393_v52 = vld [vmem:[#allocation10 + $0x200] sm:$0xff] }
 0x3e2   : > { %5074 = vmatprep.subr.bf16.mxu1 %v5073_v55  ;;  %v1406_v55 = vld [vmem:[#allocation10 + $0x268] sm:$0xff]  ;;  %v5107_v56 = vpack.c.bf16 %v1397_v53, %v1393_v52  ;;  %v1465_v52 = vld [vmem:[#allocation10 + $0x440] sm:$0xff] }
 0x3e3   : > { %v5109_v57 = vpack.c.bf16 %v1406_v55, %v1402_v54  ;;  %v1469_v53 = vld [vmem:[#allocation10 + $0x460] sm:$0xff]  ;;  %v1474_v54 = vld [vmem:[#allocation10 + $0x488] sm:$0xff] }
 0x3e4   : > { %1322 = vmatmul.mubr.f32.vlgmr.msra.gmra.mrb[4].mxu1 %v1099_v16  ;;  %v1366_v16 = vld [vmem:[#allocation10 + $0x128] sm:$0xff] }
 0x3e5   : > { %5076 = vmatpush1.bf16.msra.mxu1 %v5075_v62  ;;  %1798 = vmatprep.mubr.f32.mxu1 %v7089_v27  ;;  %v5089_v27 = vpack.c.bf16 %v1366_v16, %v1362_v8  ;;  %v5111_v62 = vpack.c.bf16 %v1405_v59, %v1401_v58  ;;  %v1434_v8 = vld [vmem:[#allocation10 + $0x348] sm:$0xff]  ;;  %v1473_v58 = vld [vmem:[#allocation10 + $0x480] sm:$0xff] }
 0x3e6   : > { %5078 = vmatprep.subr.bf16.mxu1 %v5077_v0  ;;  %v5113_v0 = vpack.c.bf16 %v1414_v61, %v1410_v60  ;;  %v1438_v16 = vld [vmem:[#allocation10 + $0x368] sm:$0xff]  ;;  %v1477_v59 = vld [vmem:[#allocation10 + $0x4a0] sm:$0xff] }
 0x3e7   : > { %v1478_v55 = vld [vmem:[#allocation10 + $0x4a8] sm:$0xff] }
 0x3e8   : > { %v1482_v60 = vld [vmem:[#allocation10 + $0x4c8] sm:$0xff] }
 0x3e9   : > { %5080 = vmatpush1.bf16.msra.mxu1 %v5079_v6  ;;  %v5115_v6 = vpack.c.bf16 %v1413_v2, %v1409_v1  ;;  %v1486_v61 = vld [vmem:[#allocation10 + $0x4e8] sm:$0xff]  ;;  %v1481_v1 = vld [vmem:[#allocation10 + $0x4c0] sm:$0xff] }
 0x3ea   : > { %5082 = vmatprep.subr.bf16.mxu1 %v5081_v7  ;;  %v5117_v7 = vpack.c.bf16 %v1422_v4, %v1418_v3  ;;  %v1485_v2 = vld [vmem:[#allocation10 + $0x4e0] sm:$0xff]  ;;  %v1490_v3 = vld [vmem:[#allocation10 + $0x508] sm:$0xff] }
 0x3eb   : > { %v1494_v4 = vld [vmem:[#allocation10 + $0x528] sm:$0xff] }
 0x3ed   : > { %5084 = vmatpush1.bf16.msra.mxu1 %v5083_v15  ;;  %v5119_v15 = vpack.c.bf16 %v1421_v12, %v1417_v10  ;;  %v1498_v10 = vld [vmem:[#allocation10 + $0x548] sm:$0xff] }
 0x3ee   : > { %5086 = vmatprep.subr.bf16.mxu1 %v5085_v17  ;;  %v5121_v17 = vpack.c.bf16 %v1430_v14, %v1426_v13  ;;  %v1502_v12 = vld [vmem:[#allocation10 + $0x568] sm:$0xff] }
 0x3ef   : > { %v5157_v14 = vpack.c.bf16 %v1502_v12, %v1498_v10 }
 0x3f1   : > { %5088 = vmatpush1.bf16.msra.mxu1 %v5087_v20  ;;  %v5123_v20 = vpack.c.bf16 %v1429_v19, %v1425_v18  ;;  %v1506_v18 = vld [vmem:[#allocation10 + $0x588] sm:$0xff] }
 0x3f2   : > { %5090 = vmatprep.subr.bf16.mxu1 %v5089_v27  ;;  %v5125_v27 = vpack.c.bf16 %v1438_v16, %v1434_v8  ;;  %v1510_v19 = vld [vmem:[#allocation10 + $0x5a8] sm:$0xff] }
 0x3f3   : > { %v5161_v16 = vpack.c.bf16 %v1510_v19, %v1506_v18 }
 0x3f5   : > { %5092 = vmatpush1.bf16.msra.mxu1 %v5091_v25  ;;  %v5127_v25 = vpack.c.bf16 %v1437_v22, %v1433_v21  ;;  %v1514_v21 = vld [vmem:[#allocation10 + $0x5c8] sm:$0xff] }
 0x3f6   : > { %5094 = vmatprep.subr.bf16.mxu1 %v5093_v26  ;;  %v5129_v26 = vpack.c.bf16 %v1446_v24, %v1442_v23  ;;  %v1518_v22 = vld [vmem:[#allocation10 + $0x5e8] sm:$0xff] }
 0x3f7   : > { %v5165_v24 = vpack.c.bf16 %v1518_v22, %v1514_v21 }
 0x3f9   : > { %5096 = vmatpush1.bf16.msra.mxu1 %v5095_v36  ;;  %v5131_v36 = vpack.c.bf16 %v1445_v29, %v1441_v28  ;;  %v1522_v28 = vld [vmem:[#allocation10 + $0x608] sm:$0xff] }
 0x3fa   : > { %5098 = vmatprep.subr.bf16.mxu1 %v5097_v38  ;;  %v5133_v38 = vpack.c.bf16 %v1454_v32, %v1450_v30  ;;  %v1526_v29 = vld [vmem:[#allocation10 + $0x628] sm:$0xff] }
 0x3fb   : > { %v5169_v32 = vpack.c.bf16 %v1526_v29, %v1522_v28 }
 0x3fd   : > { %5100 = vmatpush1.bf16.msra.mxu1 %v5099_v43  ;;  %v5135_v43 = vpack.c.bf16 %v1453_v40, %v1449_v39  ;;  %v1530_v39 = vld [vmem:[#allocation10 + $0x648] sm:$0xff] }
 0x3fe   : > { %5102 = vmatprep.subr.bf16.mxu1 %v5101_v44  ;;  %v5137_v44 = vpack.c.bf16 %v1462_v42, %v1458_v41  ;;  %v1534_v40 = vld [vmem:[#allocation10 + $0x668] sm:$0xff] }
 0x3ff   : > { %v5173_v42 = vpack.c.bf16 %v1534_v40, %v1530_v39 }
 0x401   : > { %5104 = vmatpush1.bf16.msra.mxu1 %v5103_v50  ;;  %v5139_v50 = vpack.c.bf16 %v1461_v47, %v1457_v45  ;;  %v1538_v45 = vld [vmem:[#allocation10 + $0x688] sm:$0xff] }
 0x402   : > { %5106 = vmatprep.subr.bf16.mxu1 %v5105_v51  ;;  %v5141_v51 = vpack.c.bf16 %v1470_v49, %v1466_v48  ;;  %v1542_v47 = vld [vmem:[#allocation10 + $0x6a8] sm:$0xff] }
 0x403   : > { %v5177_v49 = vpack.c.bf16 %v1542_v47, %v1538_v45 }
 0x405   : > { %5108 = vmatpush1.bf16.msra.mxu1 %v5107_v56  ;;  %v5143_v56 = vpack.c.bf16 %v1469_v53, %v1465_v52  ;;  %v1546_v52 = vld [vmem:[#allocation10 + $0x6c8] sm:$0xff] }
 0x406   : > { %5110 = vmatprep.subr.bf16.mxu1 %v5109_v57  ;;  %v5145_v57 = vpack.c.bf16 %v1478_v55, %v1474_v54  ;;  %v1550_v53 = vld [vmem:[#allocation10 + $0x6e8] sm:$0xff] }
 0x407   : > { %v5181_v55 = vpack.c.bf16 %v1550_v53, %v1546_v52  ;;  %v1617_v53 = vld [vmem:[#allocation10 + $0x900] sm:$0xff] }
 0x409   : > { %5112 = vmatpush1.bf16.msra.mxu1 %v5111_v62  ;;  %v5147_v62 = vpack.c.bf16 %v1477_v59, %v1473_v58  ;;  %v1554_v58 = vld [vmem:[#allocation10 + $0x708] sm:$0xff] }
 0x40a   : > { %5114 = vmatprep.subr.bf16.mxu1 %v5113_v0  ;;  %v5149_v0 = vpack.c.bf16 %v1486_v61, %v1482_v60  ;;  %v1558_v59 = vld [vmem:[#allocation10 + $0x728] sm:$0xff] }
 0x40b   : > { %v5185_v61 = vpack.c.bf16 %v1558_v59, %v1554_v58  ;;  %v1625_v58 = vld [vmem:[#allocation10 + $0x940] sm:$0xff] }
 0x40c   : > { %v1629_v59 = vld [vmem:[#allocation10 + $0x960] sm:$0xff] }
 0x40d   : > { %5116 = vmatpush1.bf16.msra.mxu1 %v5115_v6  ;;  %v5153_v6 = vpack.c.bf16 %v1494_v4, %v1490_v3 }
 0x40e   : > { %5118 = vmatprep.subr.bf16.mxu1 %v5117_v7  ;;  %v1489_v7 = vld [vmem:[#allocation10 + $0x500] sm:$0xff] }
 0x411   : > { %5120 = vmatpush1.bf16.msra.mxu1 %v5119_v15  ;;  %v1497_v15 = vld [vmem:[#allocation10 + $0x540] sm:$0xff] }
 0x412   : > { %5122 = vmatprep.subr.bf16.mxu1 %v5121_v17  ;;  %v1501_v17 = vld [vmem:[#allocation10 + $0x560] sm:$0xff] }
 0x413   : > { %v5159_v8 = vpack.c.bf16 %v1501_v17, %v1497_v15  ;;  %v1578_v15 = vld [vmem:[#allocation10 + $0x7c8] sm:$0xff] }
 0x414   : > { %v1582_v17 = vld [vmem:[#allocation10 + $0x7e8] sm:$0xff] }
 0x415   : > { %5124 = vmatpush1.bf16.msra.mxu1 %v5123_v20  ;;  %v1505_v20 = vld [vmem:[#allocation10 + $0x580] sm:$0xff]  ;;  %v5197_v19 = vpack.c.bf16 %v1582_v17, %v1578_v15 }
 0x416   : > { %5126 = vmatprep.subr.bf16.mxu1 %v5125_v27  ;;  %v1509_v27 = vld [vmem:[#allocation10 + $0x5a0] sm:$0xff] }
 0x417   : > { %v5163_v23 = vpack.c.bf16 %v1509_v27, %v1505_v20  ;;  %v1586_v20 = vld [vmem:[#allocation10 + $0x808] sm:$0xff]  ;;  %v1649_v15 = vld [vmem:[#allocation10 + $0xa00] sm:$0xff] }
 0x418   : > { %v1590_v27 = vld [vmem:[#allocation10 + $0x828] sm:$0xff]  ;;  %v1653_v17 = vld [vmem:[#allocation10 + $0xa20] sm:$0xff] }
 0x419   : > { %5128 = vmatpush1.bf16.msra.mxu1 %v5127_v25  ;;  %v1513_v25 = vld [vmem:[#allocation10 + $0x5c0] sm:$0xff]  ;;  %v5201_v22 = vpack.c.bf16 %v1590_v27, %v1586_v20 }
 0x41a   : > { %5130 = vmatprep.subr.bf16.mxu1 %v5129_v26  ;;  %v1517_v26 = vld [vmem:[#allocation10 + $0x5e0] sm:$0xff] }
 0x41b   : > { %v5167_v30 = vpack.c.bf16 %v1517_v26, %v1513_v25  ;;  %v1594_v25 = vld [vmem:[#allocation10 + $0x848] sm:$0xff]  ;;  %v1657_v20 = vld [vmem:[#allocation10 + $0xa40] sm:$0xff] }
 0x41c   : > { %v1598_v26 = vld [vmem:[#allocation10 + $0x868] sm:$0xff]  ;;  %v1661_v27 = vld [vmem:[#allocation10 + $0xa60] sm:$0xff] }
 0x41d   : > { %5132 = vmatpush1.bf16.msra.mxu1 %v5131_v36  ;;  %v1521_v36 = vld [vmem:[#allocation10 + $0x600] sm:$0xff]  ;;  %v5205_v29 = vpack.c.bf16 %v1598_v26, %v1594_v25 }
 0x41e   : > { %5134 = vmatprep.subr.bf16.mxu1 %v5133_v38  ;;  %v1525_v38 = vld [vmem:[#allocation10 + $0x620] sm:$0xff] }
 0x41f   : > { %v5171_v41 = vpack.c.bf16 %v1525_v38, %v1521_v36  ;;  %v1602_v36 = vld [vmem:[#allocation10 + $0x888] sm:$0xff]  ;;  %v1665_v25 = vld [vmem:[#allocation10 + $0xa80] sm:$0xff] }
 0x420   : > { %v1606_v38 = vld [vmem:[#allocation10 + $0x8a8] sm:$0xff]  ;;  %v1669_v26 = vld [vmem:[#allocation10 + $0xaa0] sm:$0xff] }
 0x421   : > { %5136 = vmatpush1.bf16.msra.mxu1 %v5135_v43  ;;  %v1529_v43 = vld [vmem:[#allocation10 + $0x640] sm:$0xff]  ;;  %v5209_v40 = vpack.c.bf16 %v1606_v38, %v1602_v36 }
 0x422   : > { %5138 = vmatprep.subr.bf16.mxu1 %v5137_v44  ;;  %v1533_v44 = vld [vmem:[#allocation10 + $0x660] sm:$0xff] }
 0x423   : > { %v5175_v48 = vpack.c.bf16 %v1533_v44, %v1529_v43  ;;  %v1610_v43 = vld [vmem:[#allocation10 + $0x8c8] sm:$0xff]  ;;  %v1673_v36 = vld [vmem:[#allocation10 + $0xac0] sm:$0xff] }
 0x424   : > { %1799 = vmatmul.mubr.f32.vlgmr.msra.gmra.mrb[6].mxu1 %v7093_v31  ;;  %v5151_v31 = vpack.c.bf16 %v1485_v2, %v1481_v1  ;;  %v1562_v1 = vld [vmem:[#allocation10 + $0x748] sm:$0xff]  ;;  %v1677_v38 = vld [vmem:[#allocation10 + $0xae0] sm:$0xff] }
 0x425   : > { %5140 = vmatpush1.bf16.msra.mxu1 %v5139_v50  ;;  %1869 = vmatprep.mubr.f32.mxu1 %v7097_v9  ;;  %v1493_v9 = vld [vmem:[#allocation10 + $0x520] sm:$0xff]  ;;  %v1566_v2 = vld [vmem:[#allocation10 + $0x768] sm:$0xff] }
 0x426   : > { %5142 = vmatprep.subr.bf16.mxu1 %v5141_v51  ;;  %v5155_v13 = vpack.c.bf16 %v1493_v9, %v1489_v7  ;;  %v1537_v50 = vld [vmem:[#allocation10 + $0x680] sm:$0xff]  ;;  %v5189_v4 = vpack.c.bf16 %v1566_v2, %v1562_v1  ;;  %v1570_v7 = vld [vmem:[#allocation10 + $0x788] sm:$0xff] }
 0x427   : > { %v1541_v51 = vld [vmem:[#allocation10 + $0x6a0] sm:$0xff]  ;;  %v1574_v9 = vld [vmem:[#allocation10 + $0x7a8] sm:$0xff] }
 0x428   : > { %v5179_v54 = vpack.c.bf16 %v1541_v51, %v1537_v50  ;;  %v5193_v12 = vpack.c.bf16 %v1574_v9, %v1570_v7  ;;  %v1614_v44 = vld [vmem:[#allocation10 + $0x8e8] sm:$0xff]  ;;  %v1633_v1 = vld [vmem:[#allocation10 + $0x980] sm:$0xff] }
 0x429   : > { %5144 = vmatpush1.bf16.msra.mxu1 %v5143_v56  ;;  %v1545_v56 = vld [vmem:[#allocation10 + $0x6c0] sm:$0xff]  ;;  %v5213_v47 = vpack.c.bf16 %v1614_v44, %v1610_v43  ;;  %v1618_v50 = vld [vmem:[#allocation10 + $0x908] sm:$0xff] }
 0x42a   : > { %5146 = vmatprep.subr.bf16.mxu1 %v5145_v57  ;;  %v1549_v57 = vld [vmem:[#allocation10 + $0x6e0] sm:$0xff]  ;;  %v1622_v51 = vld [vmem:[#allocation10 + $0x928] sm:$0xff] }
 0x42b   : > { %v5183_v60 = vpack.c.bf16 %v1549_v57, %v1545_v56  ;;  %v5217_v52 = vpack.c.bf16 %v1622_v51, %v1618_v50  ;;  %v1637_v2 = vld [vmem:[#allocation10 + $0x9a0] sm:$0xff] }
 0x42c   : > { %v1641_v7 = vld [vmem:[#allocation10 + $0x9c0] sm:$0xff] }
 0x42d   : > { %5148 = vmatpush1.bf16.msra.mxu1 %v5147_v62  ;;  %v1553_v62 = vld [vmem:[#allocation10 + $0x700] sm:$0xff] }
 0x42e   : > { %5150 = vmatprep.subr.bf16.mxu1 %v5149_v0  ;;  %v1557_v0 = vld [vmem:[#allocation10 + $0x720] sm:$0xff] }
 0x42f   : > { %v5187_v3 = vpack.c.bf16 %v1557_v0, %v1553_v62  ;;  %v5223_v62 = vpack.c.bf16 %v1629_v59, %v1625_v58  ;;  %v1645_v9 = vld [vmem:[#allocation10 + $0x9e0] sm:$0xff]  ;;  %v1710_v58 = vld [vmem:[#allocation10 + $0xbe8] sm:$0xff] }
 0x430   : > { %v1681_v43 = vld [vmem:[#allocation10 + $0xb00] sm:$0xff] }
 0x431   : > { %5152 = vmatpush1.bf16.msra.mxu1 %v5151_v31  ;;  %v1561_v31 = vld [vmem:[#allocation10 + $0x740] sm:$0xff] }
 0x432   : > { %5154 = vmatprep.subr.bf16.mxu1 %v5153_v6  ;;  %v1565_v6 = vld [vmem:[#allocation10 + $0x760] sm:$0xff] }
 0x433   : > { %v5191_v10 = vpack.c.bf16 %v1565_v6, %v1561_v31  ;;  %v5227_v31 = vpack.c.bf16 %v1637_v2, %v1633_v1  ;;  %v1685_v44 = vld [vmem:[#allocation10 + $0xb20] sm:$0xff]  ;;  %v2162_v1 = vld [vmem:[#allocation12 + $0x8] sm:$0xff]  ;;  %v2164_v2 = vld [vmem:[#allocation12 + $0x18] sm:$0xff] }
 0x434   : > { %v1689_v50 = vld [vmem:[#allocation10 + $0xb40] sm:$0xff] }
 0x435   : > { %5156 = vmatpush1.bf16.msra.mxu1 %v5155_v13  ;;  %v1569_v13 = vld [vmem:[#allocation10 + $0x780] sm:$0xff] }
 0x436   : > { %5158 = vmatprep.subr.bf16.mxu1 %v5157_v14  ;;  %v1573_v14 = vld [vmem:[#allocation10 + $0x7a0] sm:$0xff] }
 0x437   : > { %v5195_v18 = vpack.c.bf16 %v1573_v14, %v1569_v13  ;;  %v5231_v13 = vpack.c.bf16 %v1645_v9, %v1641_v7  ;;  %v1693_v51 = vld [vmem:[#allocation10 + $0xb60] sm:$0xff]  ;;  %v2166_v7 = vld [vmem:[#allocation12 + $0x28] sm:$0xff]  ;;  %v2168_v9 = vld [vmem:[#allocation12 + $0x38] sm:$0xff] }
 0x439   : > { %5160 = vmatpush1.bf16.msra.mxu1 %v5159_v8  ;;  %v1577_v8 = vld [vmem:[#allocation10 + $0x7c0] sm:$0xff] }
 0x43a   : > { %5162 = vmatprep.subr.bf16.mxu1 %v5161_v16  ;;  %v1581_v16 = vld [vmem:[#allocation10 + $0x7e0] sm:$0xff] }
 0x43b   : > { %v5199_v21 = vpack.c.bf16 %v1581_v16, %v1577_v8  ;;  %v5235_v8 = vpack.c.bf16 %v1653_v17, %v1649_v15  ;;  %v2170_v15 = vld [vmem:[#allocation12 + $0x48] sm:$0xff]  ;;  %v2172_v17 = vld [vmem:[#allocation12 + $0x58] sm:$0xff] }
 0x43d   : > { %5164 = vmatpush1.bf16.msra.mxu1 %v5163_v23  ;;  %v1585_v23 = vld [vmem:[#allocation10 + $0x800] sm:$0xff] }
 0x43e   : > { %5166 = vmatprep.subr.bf16.mxu1 %v5165_v24  ;;  %v1589_v24 = vld [vmem:[#allocation10 + $0x820] sm:$0xff] }
 0x43f   : > { %v5203_v28 = vpack.c.bf16 %v1589_v24, %v1585_v23  ;;  %v5239_v23 = vpack.c.bf16 %v1661_v27, %v1657_v20  ;;  %v2174_v20 = vld [vmem:[#allocation12 + $0x68] sm:$0xff]  ;;  %v2176_v27 = vld [vmem:[#allocation12 + $0x78] sm:$0xff] }
 0x441   : > { %5168 = vmatpush1.bf16.msra.mxu1 %v5167_v30  ;;  %v1593_v30 = vld [vmem:[#allocation10 + $0x840] sm:$0xff] }
 0x442   : > { %5170 = vmatprep.subr.bf16.mxu1 %v5169_v32  ;;  %v1597_v32 = vld [vmem:[#allocation10 + $0x860] sm:$0xff] }
 0x443   : > { %v5207_v39 = vpack.c.bf16 %v1597_v32, %v1593_v30  ;;  %v5243_v30 = vpack.c.bf16 %v1669_v26, %v1665_v25  ;;  %v1100_v25 = vld [vmem:[#allocation21 + $0x3] sm:$0xf]  ;;  %v2178_v26 = vld [vmem:[#allocation12 + $0x88] sm:$0xff] }
 0x445   : > { %5172 = vmatpush1.bf16.msra.mxu1 %v5171_v41  ;;  %v1601_v41 = vld [vmem:[#allocation10 + $0x880] sm:$0xff] }
 0x446   : > { %5174 = vmatprep.subr.bf16.mxu1 %v5173_v42  ;;  %v1605_v42 = vld [vmem:[#allocation10 + $0x8a0] sm:$0xff] }
 0x447   : > { %v5211_v45 = vpack.c.bf16 %v1605_v42, %v1601_v41  ;;  %v5247_v41 = vpack.c.bf16 %v1677_v38, %v1673_v36  ;;  %v2177_v36 = vld [vmem:[#allocation12 + $0x80] sm:$0xff]  ;;  %v2179_v38 = vld [vmem:[#allocation12 + $0x90] sm:$0xff] }
 0x449   : > { %5176 = vmatpush1.bf16.msra.mxu1 %v5175_v48  ;;  %v1609_v48 = vld [vmem:[#allocation10 + $0x8c0] sm:$0xff] }
 0x44a   : > { %5178 = vmatprep.subr.bf16.mxu1 %v5177_v49  ;;  %v1613_v49 = vld [vmem:[#allocation10 + $0x8e0] sm:$0xff] }
 0x44d   : > { %5180 = vmatpush1.bf16.msra.mxu1 %v5179_v54  ;;  %v1626_v54 = vld [vmem:[#allocation10 + $0x948] sm:$0xff] }
 0x44e   : > { %5182 = vmatprep.subr.bf16.mxu1 %v5181_v55  ;;  %v1630_v55 = vld [vmem:[#allocation10 + $0x968] sm:$0xff] }
 0x44f   : > { %v5221_v57 = vpack.c.bf16 %v1630_v55, %v1626_v54  ;;  %v1697_v54 = vld [vmem:[#allocation10 + $0xb80] sm:$0xff] }
 0x450   : > { %v1701_v55 = vld [vmem:[#allocation10 + $0xba0] sm:$0xff] }
 0x451   : > { %5184 = vmatpush1.bf16.msra.mxu1 %v5183_v60  ;;  %v1634_v60 = vld [vmem:[#allocation10 + $0x988] sm:$0xff] }
 0x452   : > { %5186 = vmatprep.subr.bf16.mxu1 %v5185_v61  ;;  %v1638_v61 = vld [vmem:[#allocation10 + $0x9a8] sm:$0xff] }
 0x453   : > { %v5225_v0 = vpack.c.bf16 %v1638_v61, %v1634_v60  ;;  %v5259_v60 = vpack.c.bf16 %v1701_v55, %v1697_v54 }
 0x455   : > { %5188 = vmatpush1.bf16.msra.mxu1 %v5187_v3  ;;  %v1642_v3 = vld [vmem:[#allocation10 + $0x9c8] sm:$0xff] }
 0x456   : > { %5190 = vmatprep.subr.bf16.mxu1 %v5189_v4  ;;  %v1646_v4 = vld [vmem:[#allocation10 + $0x9e8] sm:$0xff] }
 0x457   : > { %v5229_v6 = vpack.c.bf16 %v1646_v4, %v1642_v3  ;;  %v5457_v4 = vpack.c.bf16 %v2164_v2, %v2162_v1  ;;  %v2181_v2 = vld [vmem:[#allocation12 + $0xa0] sm:$0xff] }
 0x459   : > { %5192 = vmatpush1.bf16.msra.mxu1 %v5191_v10  ;;  %v1650_v10 = vld [vmem:[#allocation10 + $0xa08] sm:$0xff] }
 0x45a   : > { %5194 = vmatprep.subr.bf16.mxu1 %v5193_v12  ;;  %v1654_v12 = vld [vmem:[#allocation10 + $0xa28] sm:$0xff] }
 0x45b   : > { %v5233_v14 = vpack.c.bf16 %v1654_v12, %v1650_v10  ;;  %v5461_v12 = vpack.c.bf16 %v2168_v9, %v2166_v7  ;;  %v2185_v9 = vld [vmem:[#allocation12 + $0xc0] sm:$0xff] }
 0x45d   : > { %5196 = vmatpush1.bf16.msra.mxu1 %v5195_v18  ;;  %v1658_v18 = vld [vmem:[#allocation10 + $0xa48] sm:$0xff] }
 0x45e   : > { %5198 = vmatprep.subr.bf16.mxu1 %v5197_v19  ;;  %v1662_v19 = vld [vmem:[#allocation10 + $0xa68] sm:$0xff] }
 0x45f   : > { %v5237_v16 = vpack.c.bf16 %v1662_v19, %v1658_v18  ;;  %v5465_v19 = vpack.c.bf16 %v2172_v17, %v2170_v15  ;;  %v2189_v17 = vld [vmem:[#allocation12 + $0xe0] sm:$0xff] }
 0x461   : > { %5200 = vmatpush1.bf16.msra.mxu1 %v5199_v21  ;;  %v1666_v21 = vld [vmem:[#allocation10 + $0xa88] sm:$0xff] }
 0x462   : > { %5202 = vmatprep.subr.bf16.mxu1 %v5201_v22  ;;  %v1670_v22 = vld [vmem:[#allocation10 + $0xaa8] sm:$0xff] }
 0x463   : > { %v5241_v24 = vpack.c.bf16 %v1670_v22, %v1666_v21  ;;  %v5469_v22 = vpack.c.bf16 %v2176_v27, %v2174_v20  ;;  %v2193_v27 = vld [vmem:[#allocation12 + $0x100] sm:$0xff] }
 0x464   : > { %1870 = vmatmul.mubr.f32.vlgmr.msra.gmra.mrb[6].mxu1 %v7101_v11  ;;  %v5215_v11 = vpack.c.bf16 %v1613_v49, %v1609_v48  ;;  %v5251_v48 = vpack.c.bf16 %v1685_v44, %v1681_v43 }
 0x465   : > { %5204 = vmatpush1.bf16.msra.mxu1 %v5203_v28  ;;  %1940 = vmatprep.mubr.f32.mxu1 %v7111_v63  ;;  %v1621_v63 = vld [vmem:[#allocation10 + $0x920] sm:$0xff]  ;;  %v1674_v28 = vld [vmem:[#allocation10 + $0xac8] sm:$0xff] }
 0x466   : > { %5206 = vmatprep.subr.bf16.mxu1 %v5205_v29  ;;  %v5219_v56 = vpack.c.bf16 %v1621_v63, %v1617_v53  ;;  %v1678_v29 = vld [vmem:[#allocation10 + $0xae8] sm:$0xff]  ;;  %v5255_v53 = vpack.c.bf16 %v1693_v51, %v1689_v50 }
 0x467   : > { %v5245_v32 = vpack.c.bf16 %v1678_v29, %v1674_v28  ;;  %v2180_v28 = vld [vmem:[#allocation12 + $0x98] sm:$0xff] }
 0x469   : > { %5208 = vmatpush1.bf16.msra.mxu1 %v5207_v39  ;;  %v1682_v39 = vld [vmem:[#allocation10 + $0xb08] sm:$0xff] }
 0x46a   : > { %5210 = vmatprep.subr.bf16.mxu1 %v5209_v40  ;;  %v1686_v40 = vld [vmem:[#allocation10 + $0xb28] sm:$0xff] }
 0x46b   : > { %v5249_v42 = vpack.c.bf16 %v1686_v40, %v1682_v39  ;;  %v2782_v39 = vld [vmem:[#allocation21 + $0x12] sm:$0xf]  ;;  %v7129_v40 = vsub.s32 2, %v7077_v34 }
 0x46d   : > { %5212 = vmatpush1.bf16.msra.mxu1 %v5211_v45  ;;  %v1690_v45 = vld [vmem:[#allocation10 + $0xb48] sm:$0xff] }
 0x46e   : > { %5214 = vmatprep.subr.bf16.mxu1 %v5213_v47  ;;  %v1694_v47 = vld [vmem:[#allocation10 + $0xb68] sm:$0xff] }
 0x46f   : > { %v5253_v49 = vpack.c.bf16 %v1694_v47, %v1690_v45  ;;  %v7139_v45 = vrot.slane %v2782_v39, %v7080_v35  ;;  %v7142_v47 = vrot.slane %v2782_v39, %v7083_v37 }
 0x471   : > { %5216 = vmatpush1.bf16.msra.mxu1 %v5215_v11  ;;  %v1698_v11 = vld [vmem:[#allocation10 + $0xb88] sm:$0xff] }
 0x472   : > { %5218 = vmatprep.subr.bf16.mxu1 %v5217_v52  ;;  %v1702_v52 = vld [vmem:[#allocation10 + $0xba8] sm:$0xff] }
 0x473   : > { %v5257_v63 = vpack.c.bf16 %v1702_v52, %v1698_v11 }
 0x475   : > { %5220 = vmatpush1.bf16.msra.mxu1 %v5219_v56 }
 0x476   : > { %5222 = vmatprep.subr.bf16.mxu1 %v5221_v57  ;;  %v1706_v57 = vld [vmem:[#allocation10 + $0xbc8] sm:$0xff] }
 0x477   : > { %v5261_v61 = vpack.c.bf16 %v1710_v58, %v1706_v57 }
 0x479   : > { %5224 = vmatpush1.bf16.msra.mxu1 %v5223_v62  ;;  %v1705_v62 = vld [vmem:[#allocation10 + $0xbc0] sm:$0xff] }
 0x47a   : > { %5226 = vmatprep.subr.bf16.mxu1 %v5225_v0  ;;  %v1709_v0 = vld [vmem:[#allocation10 + $0xbe0] sm:$0xff] }
 0x47b   : > { %v5263_v3 = vpack.c.bf16 %v1709_v0, %v1705_v62  ;;  %v2182_v62 = vld [vmem:[#allocation12 + $0xa8] sm:$0xff]  ;;  %v2184_v0 = vld [vmem:[#allocation12 + $0xb8] sm:$0xff] }
 0x47c   : > { %v5477_v1 = vpack.c.bf16 %v2184_v0, %v2182_v62  ;;  %v2216_v62 = vld [vmem:[#allocation12 + $0x1b8] sm:$0xff] }
 0x47d   : > { %5228 = vmatpush1.bf16.msra.mxu1 %v5227_v31  ;;  %v2161_v31 = vld [vmem:[#allocation12] sm:$0xff] }
 0x47e   : > { %5230 = vmatprep.subr.bf16.mxu1 %v5229_v6  ;;  %v2163_v6 = vld [vmem:[#allocation12 + $0x10] sm:$0xff] }
 0x47f   : > { %v5459_v10 = vpack.c.bf16 %v2163_v6, %v2161_v31  ;;  %v2186_v31 = vld [vmem:[#allocation12 + $0xc8] sm:$0xff]  ;;  %v2188_v6 = vld [vmem:[#allocation12 + $0xd8] sm:$0xff] }
 0x480   : > { %v5481_v7 = vpack.c.bf16 %v2188_v6, %v2186_v31  ;;  %v2220_v31 = vld [vmem:[#allocation12 + $0x1d8] sm:$0xff] }
 0x481   : > { %5232 = vmatpush1.bf16.msra.mxu1 %v5231_v13  ;;  %v2165_v13 = vld [vmem:[#allocation12 + $0x20] sm:$0xff] }
 0x482   : > { %5234 = vmatprep.subr.bf16.mxu1 %v5233_v14  ;;  %v2167_v14 = vld [vmem:[#allocation12 + $0x30] sm:$0xff] }
 0x483   : > { %v5463_v18 = vpack.c.bf16 %v2167_v14, %v2165_v13  ;;  %v2190_v13 = vld [vmem:[#allocation12 + $0xe8] sm:$0xff]  ;;  %v2192_v14 = vld [vmem:[#allocation12 + $0xf8] sm:$0xff] }
 0x484   : > { %v5485_v15 = vpack.c.bf16 %v2192_v14, %v2190_v13  ;;  %v2222_v13 = vld [vmem:[#allocation12 + $0x1e8] sm:$0xff]  ;;  %v2224_v14 = vld [vmem:[#allocation12 + $0x1f8] sm:$0xff] }
 0x485   : > { %5236 = vmatpush1.bf16.msra.mxu1 %v5235_v8  ;;  %v2169_v8 = vld [vmem:[#allocation12 + $0x40] sm:$0xff] }
 0x486   : > { %5238 = vmatprep.subr.bf16.mxu1 %v5237_v16  ;;  %v2171_v16 = vld [vmem:[#allocation12 + $0x50] sm:$0xff] }
 0x487   : > { %v5467_v21 = vpack.c.bf16 %v2171_v16, %v2169_v8  ;;  %v2194_v8 = vld [vmem:[#allocation12 + $0x108] sm:$0xff]  ;;  %v2196_v16 = vld [vmem:[#allocation12 + $0x118] sm:$0xff] }
 0x488   : > { %v5489_v20 = vpack.c.bf16 %v2196_v16, %v2194_v8  ;;  %v2226_v8 = vld [vmem:[#allocation12 + $0x208] sm:$0xff]  ;;  %v2228_v16 = vld [vmem:[#allocation12 + $0x218] sm:$0xff] }
 0x489   : > { %5240 = vmatpush1.bf16.msra.mxu1 %v5239_v23  ;;  %v2173_v23 = vld [vmem:[#allocation12 + $0x60] sm:$0xff] }
 0x48a   : > { %5242 = vmatprep.subr.bf16.mxu1 %v5241_v24  ;;  %v2175_v24 = vld [vmem:[#allocation12 + $0x70] sm:$0xff] }
 0x48b   : > { %v5471_v29 = vpack.c.bf16 %v2175_v24, %v2173_v23  ;;  %v2198_v23 = vld [vmem:[#allocation12 + $0x128] sm:$0xff]  ;;  %v2200_v24 = vld [vmem:[#allocation12 + $0x138] sm:$0xff] }
 0x48d   : > { %5244 = vmatpush1.bf16.msra.mxu1 %v5243_v30  ;;  %v1173_v30 = vrot.slane %v1100_v25, %v7083_v37 }
 0x48e   : > { %5246 = vmatprep.subr.bf16.mxu1 %v5245_v32  ;;  %v5473_v32 = vpack.c.bf16 %v2180_v28, %v2178_v26  ;;  %v2197_v26 = vld [vmem:[#allocation12 + $0x120] sm:$0xff]  ;;  %v2199_v28 = vld [vmem:[#allocation12 + $0x130] sm:$0xff] }
 0x491   : > { %5248 = vmatpush1.bf16.msra.mxu1 %v5247_v41  ;;  %v7132_v41 = vsub.s32 3, %v7077_v34  ;;  %v7147_v34 = vrot.slane %v2782_v39, %v7129_v40 }
 0x492   : > { %5250 = vmatprep.subr.bf16.mxu1 %v5249_v42  ;;  %v5475_v42 = vpack.c.bf16 %v2179_v38, %v2177_v36  ;;  %v2203_v38 = vld [vmem:[#allocation12 + $0x150] sm:$0xff] }
 0x493   : > { %v7154_v52 = vrot.slane %v2782_v39, %v7132_v41  ;;  %v2206_v39 = vld [vmem:[#allocation12 + $0x168] sm:$0xff] }
 0x495   : > { %5252 = vmatpush1.bf16.msra.mxu1 %v5251_v48  ;;  %v1177_v48 = vrot.slane %v1100_v25, %v7129_v40 }
 0x496   : > { %5254 = vmatprep.subr.bf16.mxu1 %v5253_v49  ;;  %v1181_v49 = vrot.slane %v1100_v25, %v7132_v41 }
 0x497   : > { %v1252_v56 = vpop.f32.mrb[2].mxu1 }
 0x498   : > { %v1254_v59 = vpop.f32.mrb[3].mxu1 }
 0x499   : > { %5256 = vmatpush1.bf16.msra.mxu1 %v5255_v53  ;;  %v7136_v44 = vadd.f32 %v1254_v59, %v1173_v30  ;;  %v2204_v30 = vld [vmem:[#allocation12 + $0x158] sm:$0xff] }
 0x49a   : > { %5258 = vmatprep.subr.bf16.mxu1 %v5257_v63 }
 0x49b   : > { %v2806_v51 = vmul.f32 %v7142_v47, %v7136_v44 }
 0x49d   : > { %5260 = vmatpush1.bf16.msra.mxu1 %v5259_v60 }
 0x49e   : > { %5262 = vmatprep.subr.bf16.mxu1 %v5261_v61 }
 0x4a1   : > { %5264 = vmatpush1.bf16.msra.mxu1 %v5263_v3  ;;  %v2183_v3 = vld [vmem:[#allocation12 + $0xb0] sm:$0xff] }
 0x4a2   : > { %5458 = vmatprep.subr.bf16.mxu1 %v5457_v4  ;;  %v5479_v4 = vpack.c.bf16 %v2183_v3, %v2181_v2  ;;  %v2213_v2 = vld [vmem:[#allocation12 + $0x1a0] sm:$0xff]  ;;  %v2215_v3 = vld [vmem:[#allocation12 + $0x1b0] sm:$0xff] }
 0x4a3   : > { %v5511_v6 = vpack.c.bf16 %v2215_v3, %v2213_v2  ;;  %v2472_v2 = vld [vmem:[#allocation13 + $0xd8] sm:$0xff] }
 0x4a4   : > { %1941 = vmatmul.mubr.f32.vlgmr.msra.gmra.mrb[6].mxu1 %v7115_v5  ;;  %v1169_v5 = vrot.slane %v1100_v25, %v7080_v35  ;;  %v5493_v25 = vpack.c.bf16 %v2200_v24, %v2198_v23  ;;  %v2446_v24 = vld [vmem:[#allocation13 + $0x8] sm:$0xff] }
 0x4a5   : > { %5460 = vmatpush1.bf16.msra.mxu1 %v5459_v10  ;;  %v2187_v10 = vld [vmem:[#allocation12 + $0xd0] sm:$0xff] }
 0x4a6   : > { %5462 = vmatprep.subr.bf16.mxu1 %v5461_v12  ;;  %v7134_v43 = vadd.f32 %v1252_v56, %v1169_v5  ;;  %v5483_v12 = vpack.c.bf16 %v2187_v10, %v2185_v9  ;;  %v2202_v5 = vld [vmem:[#allocation12 + $0x148] sm:$0xff]  ;;  %v2217_v9 = vld [vmem:[#allocation12 + $0x1c0] sm:$0xff]  ;;  %v2219_v10 = vld [vmem:[#allocation12 + $0x1d0] sm:$0xff] }
 0x4a7   : > { %v5497_v36 = vpack.c.bf16 %v2204_v30, %v2202_v5  ;;  %v2447_v5 = vld [vmem:[#allocation13 + $0x10] sm:$0xff]  ;;  %v2448_v30 = vld [vmem:[#allocation13 + $0x18] sm:$0xff] }
 0x4a8   : > { %v2805_v50 = vmul.f32 %v7139_v45, %v7134_v43 }
 0x4a9   : > { %5464 = vmatpush1.bf16.msra.mxu1 %v5463_v18  ;;  %v7160_v55 = vpop.f32.mrb[2].mxu0  ;;  %v2191_v18 = vld [vmem:[#allocation12 + $0xf0] sm:$0xff] }
 0x4aa   : > { %5466 = vmatprep.subr.bf16.mxu1 %v5465_v19  ;;  %v2809_v57 = vadd.f32 %v2806_v51, %v2805_v50  ;;  %v7164_v58 = vpop.f32.mrb[3].mxu0  ;;  %v5487_v19 = vpack.c.bf16 %v2191_v18, %v2189_v17  ;;  %v2205_v50 = vld [vmem:[#allocation12 + $0x160] sm:$0xff]  ;;  %v2207_v51 = vld [vmem:[#allocation12 + $0x170] sm:$0xff] }
 0x4ab   : > { %v2221_v17 = vld [vmem:[#allocation12 + $0x1e0] sm:$0xff]  ;;  %v2223_v18 = vld [vmem:[#allocation12 + $0x1f0] sm:$0xff] }
 0x4ad   : > { %5468 = vmatpush1.bf16.msra.mxu1 %v5467_v21  ;;  %v2195_v21 = vld [vmem:[#allocation12 + $0x110] sm:$0xff] }
 0x4ae   : > { %5470 = vmatprep.subr.bf16.mxu1 %v5469_v22  ;;  %v5491_v22 = vpack.c.bf16 %v2195_v21, %v2193_v27  ;;  %v2461_v27 = vld [vmem:[#allocation13 + $0x80] sm:$0xff]  ;;  %v2462_v21 = vld [vmem:[#allocation13 + $0x88] sm:$0xff] }
 0x4af   : > { %v5585_v23 = vpack.c.bf16 %v2462_v21, %v2461_v27 }
 0x4b1   : > { %5472 = vmatpush1.bf16.msra.mxu1 %v5471_v29  ;;  %v5495_v29 = vpack.c.bf16 %v2199_v28, %v2197_v26  ;;  %v2464_v26 = vld [vmem:[#allocation13 + $0x98] sm:$0xff]  ;;  %5586 = vmatprep.subr.bf16.mxu0 %v5585_v23 }
 0x4b2   : > { %5474 = vmatprep.subr.bf16.mxu1 %v5473_v32  ;;  %v2201_v32 = vld [vmem:[#allocation12 + $0x140] sm:$0xff] }
 0x4b5   : > { %5476 = vmatpush1.bf16.msra.mxu1 %v5475_v42  ;;  %v2208_v42 = vld [vmem:[#allocation12 + $0x178] sm:$0xff] }
 0x4b6   : > { %5478 = vmatprep.subr.bf16.mxu1 %v5477_v1 }
 0x4b7   : > { %v1323_v11 = vpop.f32.mrb[4].mxu1 }
 0x4b8   : > { %v7156_v53 = vadd.f32 %v1323_v11, %v1177_v48  ;;  %v1325_v63 = vpop.f32.mrb[5].mxu1  ;;  %v5499_v48 = vpack.c.bf16 %v2203_v38, %v2201_v32  ;;  %v2210_v11 = vld [vmem:[#allocation12 + $0x188] sm:$0xff]  ;;  %v2465_v32 = vld [vmem:[#allocation13 + $0xa0] sm:$0xff]  ;;  %v5591_v38 = vpack.c.bf16 %v2448_v30, %v2447_v5  ;;  %v2236_v5 = vld [vmem:[#allocation12 + $0x258] sm:$0xff] }
 0x4b9   : > { %v7158_v54 = vadd.f32 %v1325_v63, %v1181_v49  ;;  %5480 = vmatpush1.bf16.msra.mxu1 %v5479_v4  ;;  %v5501_v49 = vpack.c.bf16 %v2208_v42, %v2206_v39  ;;  %v2212_v63 = vld [vmem:[#allocation12 + $0x198] sm:$0xff]  ;;  %v2218_v4 = vld [vmem:[#allocation12 + $0x1c8] sm:$0xff]  ;;  %v2449_v42 = vld [vmem:[#allocation13 + $0x20] sm:$0xff] }
 0x4ba   : > { %v2807_v56 = vmul.f32 %v7147_v34, %v7156_v53  ;;  %5482 = vmatprep.subr.bf16.mxu1 %v5481_v7  ;;  %v5513_v7 = vpack.c.bf16 %v2220_v31, %v2218_v4  ;;  %v2455_v31 = vld [vmem:[#allocation13 + $0x50] sm:$0xff] }
 0x4bb   : > { %v2808_v59 = vmul.f32 %v7154_v52, %v7158_v54 }
 0x4bc   : > { %v2810_v60 = vadd.f32 %v2809_v57, %v2807_v56  ;;  %v5503_v56 = vpack.c.bf16 %v2207_v51, %v2205_v50  ;;  %v5505_v57 = vpack.c.bf16 %v2212_v63, %v2210_v11  ;;  %v2468_v50 = vld [vmem:[#allocation13 + $0xb8] sm:$0xff]  ;;  %v2451_v63 = vld [vmem:[#allocation13 + $0x30] sm:$0xff] }
 0x4bd   : > { %5484 = vmatpush1.bf16.msra.mxu1 %v5483_v12  ;;  %v5515_v12 = vpack.c.bf16 %v2219_v10, %v2217_v9  ;;  %v2474_v9 = vld [vmem:[#allocation13 + $0xe8] sm:$0xff] }
 0x4be   : > { %v2811_v61 = vadd.f32 %v2810_v60, %v2808_v59  ;;  %5486 = vmatprep.subr.bf16.mxu1 %v5485_v15  ;;  %v2209_v59 = vld [vmem:[#allocation12 + $0x180] sm:$0xff]  ;;  %v2211_v60 = vld [vmem:[#allocation12 + $0x190] sm:$0xff]  ;;  %v5517_v15 = vpack.c.bf16 %v2224_v14, %v2222_v13 }
 0x4bf   : > { %v5507_v0 = vpack.c.bf16 %v2211_v60, %v2209_v59  ;;  %v2470_v59 = vld [vmem:[#allocation13 + $0xc8] sm:$0xff] }
 0x4c0   : > { %2812 = vadd.xlane.f32.xlu0 %v2811_v61  ;;  %v2214_v61 = vld [vmem:[#allocation12 + $0x1a8] sm:$0xff] }
 0x4c1   : > { %5488 = vmatpush1.bf16.msra.mxu1 %v5487_v19  ;;  %v5509_v1 = vpack.c.bf16 %v2216_v62, %v2214_v61  ;;  %v5519_v19 = vpack.c.bf16 %v2223_v18, %v2221_v17  ;;  %v2453_v62 = vld [vmem:[#allocation13 + $0x40] sm:$0xff]  ;;  %v2227_v18 = vld [vmem:[#allocation12 + $0x210] sm:$0xff] }
 0x4c2   : > { %5490 = vmatprep.subr.bf16.mxu1 %v5489_v20  ;;  %v5521_v20 = vpack.c.bf16 %v2228_v16, %v2226_v8  ;;  %v7168_v13 = vld [vmem:[#allocation21 + $0x7] sm:$0xf] }
 0x4c3   : > { %v1721_v14 = vrot.slane %v7168_v13, %v7083_v37  ;;  %v2225_v17 = vld [vmem:[#allocation12 + $0x200] sm:$0xff]  ;;  %v2230_v16 = vld [vmem:[#allocation12 + $0x228] sm:$0xff] }
 0x4c5   : > { %5492 = vmatpush1.bf16.msra.mxu1 %v5491_v22  ;;  %v2445_v22 = vld [vmem:[#allocation13] sm:$0xff] }
 0x4c6   : > { %5494 = vmatprep.subr.bf16.mxu1 %v5493_v25  ;;  %v2463_v25 = vld [vmem:[#allocation13 + $0x90] sm:$0xff]  ;;  %v5587_v28 = vpack.c.bf16 %v2446_v24, %v2445_v22  ;;  %v5523_v22 = vpack.c.bf16 %v2227_v18, %v2225_v17  ;;  %v2253_v17 = vld [vmem:[#allocation12 + $0x2e0] sm:$0xff] }
 0x4c7   : > { %v2255_v18 = vld [vmem:[#allocation12 + $0x2f0] sm:$0xff] }
 0x4c8   : > { %5588 = vmatpush3.bf16.msra.mxu0 %v5587_v28 }
 0x4c9   : > { %5496 = vmatpush1.bf16.msra.mxu1 %v5495_v29  ;;  %v5589_v29 = vpack.c.bf16 %v2464_v26, %v2463_v25  ;;  %v2229_v25 = vld [vmem:[#allocation12 + $0x220] sm:$0xff]  ;;  %v2231_v26 = vld [vmem:[#allocation12 + $0x230] sm:$0xff] }
 0x4ca   : > { %5498 = vmatprep.subr.bf16.mxu1 %v5497_v36  ;;  %v2466_v36 = vld [vmem:[#allocation13 + $0xa8] sm:$0xff]  ;;  %v5527_v30 = vpack.c.bf16 %v2231_v26, %v2229_v25  ;;  %v2264_v25 = vld [vmem:[#allocation12 + $0x338] sm:$0xff] }
 0x4cb   : > { %5590 = vmatprep.subr.bf16.mxu0 %v5589_v29  ;;  %v5593_v39 = vpack.c.bf16 %v2466_v36, %v2465_v32  ;;  %v2234_v29 = vld [vmem:[#allocation12 + $0x248] sm:$0xff]  ;;  %v2233_v36 = vld [vmem:[#allocation12 + $0x240] sm:$0xff] }
 0x4cc   : > { %5592 = vmatpush3.bf16.msra.mxu0 %v5591_v38  ;;  %v5529_v32 = vpack.c.bf16 %v2236_v5, %v2234_v29  ;;  %v2235_v38 = vld [vmem:[#allocation12 + $0x250] sm:$0xff]  ;;  %v2261_v5 = vld [vmem:[#allocation12 + $0x320] sm:$0xff] }
 0x4cd   : > { %5500 = vmatpush1.bf16.msra.mxu1 %v5499_v48  ;;  %v2450_v48 = vld [vmem:[#allocation13 + $0x28] sm:$0xff]  ;;  %5594 = vmatprep.subr.bf16.mxu0 %v5593_v39 }
 0x4ce   : > { %5502 = vmatprep.subr.bf16.mxu1 %v5501_v49  ;;  %v2467_v49 = vld [vmem:[#allocation13 + $0xb0] sm:$0xff]  ;;  %v5595_v51 = vpack.c.bf16 %v2450_v48, %v2449_v42  ;;  %v2238_v39 = vld [vmem:[#allocation12 + $0x268] sm:$0xff]  ;;  %v2240_v42 = vld [vmem:[#allocation12 + $0x278] sm:$0xff]  ;;  %v5531_v48 = vpack.c.bf16 %v2235_v38, %v2233_v36 }
 0x4cf   : > { %v5597_v11 = vpack.c.bf16 %v2468_v50, %v2467_v49  ;;  %v2237_v49 = vld [vmem:[#allocation12 + $0x260] sm:$0xff]  ;;  %v2239_v50 = vld [vmem:[#allocation12 + $0x270] sm:$0xff]  ;;  %v2268_v36 = vld [vmem:[#allocation12 + $0x358] sm:$0xff] }
 0x4d0   : > { %5596 = vmatpush3.bf16.msra.mxu0 %v5595_v51  ;;  %v2242_v51 = vld [vmem:[#allocation12 + $0x288] sm:$0xff] }
 0x4d1   : > { %5504 = vmatpush1.bf16.msra.mxu1 %v5503_v56  ;;  %v2452_v56 = vld [vmem:[#allocation13 + $0x38] sm:$0xff]  ;;  %5598 = vmatprep.subr.bf16.mxu0 %v5597_v11 }
 0x4d2   : > { %5506 = vmatprep.subr.bf16.mxu1 %v5505_v57  ;;  %v2469_v57 = vld [vmem:[#allocation13 + $0xc0] sm:$0xff]  ;;  %v5599_v60 = vpack.c.bf16 %v2452_v56, %v2451_v63  ;;  %v2244_v11 = vld [vmem:[#allocation12 + $0x298] sm:$0xff]  ;;  %v5535_v63 = vpack.c.bf16 %v2239_v50, %v2237_v49 }
 0x4d3   : > { %v5601_v61 = vpack.c.bf16 %v2470_v59, %v2469_v57  ;;  %v5537_v56 = vpack.c.bf16 %v2244_v11, %v2242_v51  ;;  %v2241_v57 = vld [vmem:[#allocation12 + $0x280] sm:$0xff]  ;;  %v2243_v59 = vld [vmem:[#allocation12 + $0x290] sm:$0xff]  ;;  %v2272_v49 = vld [vmem:[#allocation12 + $0x378] sm:$0xff] }
 0x4d4   : > { %5600 = vmatpush3.bf16.msra.mxu0 %v5599_v60  ;;  %v2246_v60 = vld [vmem:[#allocation12 + $0x2a8] sm:$0xff]  ;;  %v2269_v11 = vld [vmem:[#allocation12 + $0x360] sm:$0xff] }
 0x4d5   : > { %5508 = vmatpush1.bf16.msra.mxu1 %v5507_v0  ;;  %v2454_v0 = vld [vmem:[#allocation13 + $0x48] sm:$0xff]  ;;  %5602 = vmatprep.subr.bf16.mxu0 %v5601_v61  ;;  %v2248_v61 = vld [vmem:[#allocation12 + $0x2b8] sm:$0xff] }
 0x4d6   : > { %5510 = vmatprep.subr.bf16.mxu1 %v5509_v1  ;;  %v2471_v1 = vld [vmem:[#allocation13 + $0xd0] sm:$0xff]  ;;  %v5603_v3 = vpack.c.bf16 %v2454_v0, %v2453_v62  ;;  %v5539_v62 = vpack.c.bf16 %v2243_v59, %v2241_v57  ;;  %v5541_v0 = vpack.c.bf16 %v2248_v61, %v2246_v60  ;;  %v2276_v57 = vld [vmem:[#allocation12 + $0x398] sm:$0xff]  ;;  %v2273_v61 = vld [vmem:[#allocation12 + $0x380] sm:$0xff] }
 0x4d7   : > { %v5605_v4 = vpack.c.bf16 %v2472_v2, %v2471_v1  ;;  %v2245_v1 = vld [vmem:[#allocation12 + $0x2a0] sm:$0xff]  ;;  %v2247_v2 = vld [vmem:[#allocation12 + $0x2b0] sm:$0xff] }
 0x4d8   : > { %5604 = vmatpush3.bf16.msra.mxu0 %v5603_v3  ;;  %v2250_v3 = vld [vmem:[#allocation12 + $0x2c8] sm:$0xff] }
 0x4d9   : > { %5512 = vmatpush1.bf16.msra.mxu1 %v5511_v6  ;;  %v2456_v6 = vld [vmem:[#allocation13 + $0x58] sm:$0xff]  ;;  %5606 = vmatprep.subr.bf16.mxu0 %v5605_v4 }
 0x4da   : > { %5514 = vmatprep.subr.bf16.mxu1 %v5513_v7  ;;  %v2473_v7 = vld [vmem:[#allocation13 + $0xe0] sm:$0xff]  ;;  %v5607_v10 = vpack.c.bf16 %v2456_v6, %v2455_v31  ;;  %v2252_v4 = vld [vmem:[#allocation12 + $0x2d8] sm:$0xff]  ;;  %v5543_v31 = vpack.c.bf16 %v2247_v2, %v2245_v1 }
 0x4db   : > { %v5545_v6 = vpack.c.bf16 %v2252_v4, %v2250_v3  ;;  %v2280_v1 = vld [vmem:[#allocation12 + $0x3b8] sm:$0xff]  ;;  %v2277_v4 = vld [vmem:[#allocation12 + $0x3a0] sm:$0xff] }
 0x4dc   : > { %5608 = vmatpush3.bf16.msra.mxu0 %v5607_v10  ;;  %v2254_v10 = vld [vmem:[#allocation12 + $0x2e8] sm:$0xff] }
 0x4dd   : > { %5516 = vmatpush1.bf16.msra.mxu1 %v5515_v12  ;;  %v5609_v12 = vpack.c.bf16 %v2474_v9, %v2473_v7  ;;  %v2249_v7 = vld [vmem:[#allocation12 + $0x2c0] sm:$0xff]  ;;  %v2251_v9 = vld [vmem:[#allocation12 + $0x2d0] sm:$0xff] }
 0x4de   : > { %5518 = vmatprep.subr.bf16.mxu1 %v5517_v15  ;;  %v1717_v15 = vrot.slane %v7168_v13, %v7080_v35 }
 0x4df   : > { %5610 = vmatprep.subr.bf16.mxu0 %v5609_v12  ;;  %v2256_v12 = vld [vmem:[#allocation12 + $0x2f8] sm:$0xff] }
 0x4e1   : > { %5520 = vmatpush1.bf16.msra.mxu1 %v5519_v19  ;;  %v1729_v19 = vrot.slane %v7168_v13, %v7132_v41 }
 0x4e2   : > { %5522 = vmatprep.subr.bf16.mxu1 %v5521_v20  ;;  %v2232_v20 = vld [vmem:[#allocation12 + $0x238] sm:$0xff] }
 0x4e3   : > { %v5525_v24 = vpack.c.bf16 %v2232_v20, %v2230_v16  ;;  %v7181_v28 = vadd.f32 %v7164_v58, %v1729_v19  ;;  %v5533_v58 = vpack.c.bf16 %v2240_v42, %v2238_v39  ;;  %v2258_v19 = vld [vmem:[#allocation12 + $0x308] sm:$0xff]  ;;  %v5551_v16 = vpack.c.bf16 %v2255_v18, %v2253_v17  ;;  %v2265_v42 = vld [vmem:[#allocation12 + $0x340] sm:$0xff]  ;;  %v2288_v17 = vld [vmem:[#allocation12 + $0x3f8] sm:$0xff] }
 0x577   : > { %v1942_v8 = vpop.f32.mrb[6].mxu1 }
 0x578   : > { %v1944_v27 = vpop.f32.mrb[7].mxu1  ;;  %v7178_v23 = vadd.f32 %v1942_v8, %v1717_v15  ;;  %v5549_v15 = vpack.c.bf16 %v2256_v12, %v2254_v10  ;;  %v2260_v8 = vld [vmem:[#allocation12 + $0x318] sm:$0xff]  ;;  %v2281_v12 = vld [vmem:[#allocation12 + $0x3c0] sm:$0xff] }
 0x579   : > { %v7176_v21 = vadd.f32 %v1944_v27, %v1721_v14  ;;  %v5547_v14 = vpack.c.bf16 %v2251_v9, %v2249_v7  ;;  %v5553_v20 = vpack.c.bf16 %v2260_v8, %v2258_v19  ;;  %v2257_v27 = vld [vmem:[#allocation12 + $0x300] sm:$0xff]  ;;  %v2284_v7 = vld [vmem:[#allocation12 + $0x3d8] sm:$0xff] }
 0x57a   : > { %v2285_v8 = vld [vmem:[#allocation12 + $0x3e0] sm:$0xff] }
 0x57b   : > { %2364 = vmatprep.mubr.f32.mxu1 %v7176_v21 }
 0x57c   : > { %2365 = vmatmul.mubr.f32.vlgmr.msra.gmra.mrb[8].mxu1 %v7178_v23 }
 0x57d   : > { %5524 = vmatpush1.bf16.msra.mxu1 %v5523_v22  ;;  %2435 = vmatprep.mubr.f32.mxu1 %v7181_v28  ;;  %v2259_v22 = vld [vmem:[#allocation12 + $0x310] sm:$0xff] }
 0x57e   : > { %5526 = vmatprep.subr.bf16.mxu1 %v5525_v24  ;;  %v2262_v24 = vld [vmem:[#allocation12 + $0x328] sm:$0xff]  ;;  %v5555_v26 = vpack.c.bf16 %v2259_v22, %v2257_v27  ;;  %v1725_v27 = vrot.slane %v7168_v13, %v7129_v40 }
 0x57f   : > { %v5557_v29 = vpack.c.bf16 %v2264_v25, %v2262_v24  ;;  %v2457_v24 = vld [vmem:[#allocation13 + $0x60] sm:$0xff]  ;;  %v2458_v25 = vld [vmem:[#allocation13 + $0x68] sm:$0xff] }
 0x580   : > { %v7189_v22 = vadd.f32 %v7160_v55, %v1725_v27  ;;  %v2556_v13 = vld [vmem:[#allocation15 + $0x8] sm:$0xff]  ;;  %v2587_v27 = vld [vmem:[#allocation15 + $0x100] sm:$0xff] }
 0x581   : > { %5528 = vmatpush1.bf16.msra.mxu1 %v5527_v30  ;;  %v2263_v30 = vld [vmem:[#allocation12 + $0x330] sm:$0xff]  ;;  %v2160_v55 = vld [vmem:[#allocation21 + $0xb] sm:$0x3] }
 0x582   : > { %5530 = vmatprep.subr.bf16.mxu1 %v5529_v32  ;;  %v2266_v32 = vld [vmem:[#allocation12 + $0x348] sm:$0xff]  ;;  %v5559_v38 = vpack.c.bf16 %v2263_v30, %v2261_v5  ;;  %v2476_v5 = vld [vmem:[#allocation13 + $0xf8] sm:$0xff] }
 0x583   : > { %v5561_v39 = vpack.c.bf16 %v2268_v36, %v2266_v32  ;;  %v2459_v32 = vld [vmem:[#allocation13 + $0x70] sm:$0xff]  ;;  %v2460_v36 = vld [vmem:[#allocation13 + $0x78] sm:$0xff] }
 0x585   : > { %5532 = vmatpush1.bf16.msra.mxu1 %v5531_v48  ;;  %v2267_v48 = vld [vmem:[#allocation12 + $0x350] sm:$0xff] }
 0x586   : > { %5534 = vmatprep.subr.bf16.mxu1 %v5533_v58  ;;  %v2270_v58 = vld [vmem:[#allocation12 + $0x368] sm:$0xff]  ;;  %v5563_v50 = vpack.c.bf16 %v2267_v48, %v2265_v42  ;;  %v2293_v48 = vrot.slane %v2160_v55, %v7080_v35 }
 0x587   : > { %v5565_v51 = vpack.c.bf16 %v2272_v49, %v2270_v58  ;;  %v2297_v58 = vrot.slane %v2160_v55, %v7083_v37  ;;  %v2607_v55 = vld [vmem:[#allocation15 + $0x1a0] sm:$0xff] }
 0x589   : > { %5536 = vmatpush1.bf16.msra.mxu1 %v5535_v63  ;;  %v2271_v63 = vld [vmem:[#allocation12 + $0x370] sm:$0xff] }
 0x58a   : > { %5538 = vmatprep.subr.bf16.mxu1 %v5537_v56  ;;  %v2274_v56 = vld [vmem:[#allocation12 + $0x388] sm:$0xff]  ;;  %v5567_v59 = vpack.c.bf16 %v2271_v63, %v2269_v11  ;;  %v2555_v11 = vld [vmem:[#allocation15] sm:$0xff] }
 0x58b   : > { %v5569_v60 = vpack.c.bf16 %v2276_v57, %v2274_v56  ;;  %v2559_v63 = vld [vmem:[#allocation15 + $0x20] sm:$0xff]  ;;  %v2564_v57 = vld [vmem:[#allocation15 + $0x48] sm:$0xff] }
 0x58d   : > { %5540 = vmatpush1.bf16.msra.mxu1 %v5539_v62  ;;  %v2275_v62 = vld [vmem:[#allocation12 + $0x390] sm:$0xff] }
 0x58e   : > { %5542 = vmatprep.subr.bf16.mxu1 %v5541_v0  ;;  %v2278_v0 = vld [vmem:[#allocation12 + $0x3a8] sm:$0xff]  ;;  %v5571_v2 = vpack.c.bf16 %v2275_v62, %v2273_v61  ;;  %v5619_v61 = vpack.c.bf16 %v2559_v63, %v2555_v11  ;;  %v2615_v11 = vld [vmem:[#allocation15 + $0x1e0] sm:$0xff] }
 0x58f   : > { %v5573_v3 = vpack.c.bf16 %v2280_v1, %v2278_v0  ;;  %v2563_v1 = vld [vmem:[#allocation15 + $0x40] sm:$0xff] }
 0x591   : > { %5544 = vmatpush1.bf16.msra.mxu1 %v5543_v31  ;;  %v2279_v31 = vld [vmem:[#allocation12 + $0x3b0] sm:$0xff] }
 0x592   : > { %5546 = vmatprep.subr.bf16.mxu1 %v5545_v6  ;;  %v2282_v6 = vld [vmem:[#allocation12 + $0x3c8] sm:$0xff]  ;;  %v5575_v9 = vpack.c.bf16 %v2279_v31, %v2277_v4 }
 0x593   : > { %v5577_v10 = vpack.c.bf16 %v2284_v7, %v2282_v6  ;;  %v2576_v4 = vld [vmem:[#allocation15 + $0xa8] sm:$0xff]  ;;  %v2571_v7 = vld [vmem:[#allocation15 + $0x80] sm:$0xff] }
 0x595   : > { %5548 = vmatpush1.bf16.msra.mxu1 %v5547_v14  ;;  %v2283_v14 = vld [vmem:[#allocation12 + $0x3d0] sm:$0xff] }
 0x596   : > { %5550 = vmatprep.subr.bf16.mxu1 %v5549_v15  ;;  %v2286_v15 = vld [vmem:[#allocation12 + $0x3e8] sm:$0xff]  ;;  %v5579_v18 = vpack.c.bf16 %v2283_v14, %v2281_v12 }
 0x597   : > { %v5581_v19 = vpack.c.bf16 %v2288_v17, %v2286_v15  ;;  %v2584_v12 = vld [vmem:[#allocation15 + $0xe8] sm:$0xff]  ;;  %v2579_v17 = vld [vmem:[#allocation15 + $0xc0] sm:$0xff] }
 0x599   : > { %5552 = vmatpush1.bf16.msra.mxu1 %v5551_v16  ;;  %v2287_v16 = vld [vmem:[#allocation12 + $0x3f0] sm:$0xff] }
 0x59a   : > { %5554 = vmatprep.subr.bf16.mxu1 %v5553_v20  ;;  %v5583_v20 = vpack.c.bf16 %v2287_v16, %v2285_v8  ;;  %v2592_v8 = vld [vmem:[#allocation15 + $0x128] sm:$0xff] }
 0x59d   : > { %5556 = vmatpush1.bf16.msra.mxu1 %v5555_v26  ;;  %v5611_v26 = vpack.c.bf16 %v2458_v25, %v2457_v24  ;;  %v2591_v24 = vld [vmem:[#allocation15 + $0x120] sm:$0xff]  ;;  %v2596_v25 = vld [vmem:[#allocation15 + $0x148] sm:$0xff] }
 0x59e   : > { %5558 = vmatprep.subr.bf16.mxu1 %v5557_v29  ;;  %v2475_v29 = vld [vmem:[#allocation13 + $0xf0] sm:$0xff] }
 0x59f   : > { %5612 = vmatpush3.bf16.msra.mxu0 %v5611_v26  ;;  %v5613_v30 = vpack.c.bf16 %v2476_v5, %v2475_v29  ;;  %v2600_v26 = vld [vmem:[#allocation15 + $0x168] sm:$0xff]  ;;  %v5635_v29 = vpack.c.bf16 %v2591_v24, %v2587_v27 }
 0x5a0   : > { %v5637_v5 = vpack.c.bf16 %v2600_v26, %v2596_v25  ;;  %v2581_v25 = vld [vmem:[#allocation15 + $0xd0] sm:$0xff] }
 0x5a1   : > { %5560 = vmatpush1.bf16.msra.mxu1 %v5559_v38  ;;  %v5615_v38 = vpack.c.bf16 %v2460_v36, %v2459_v32  ;;  %5614 = vmatprep.subr.bf16.mxu0 %v5613_v30  ;;  %v2595_v30 = vld [vmem:[#allocation15 + $0x140] sm:$0xff]  ;;  %v2604_v36 = vld [vmem:[#allocation15 + $0x188] sm:$0xff]  ;;  %v2585_v26 = vld [vmem:[#allocation15 + $0xf0] sm:$0xff] }
 0x5a2   : > { %5562 = vmatprep.subr.bf16.mxu1 %v5561_v39  ;;  %v2560_v39 = vld [vmem:[#allocation15 + $0x28] sm:$0xff]  ;;  %v2599_v32 = vld [vmem:[#allocation15 + $0x160] sm:$0xff] }
 0x5a3   : > { %5616 = vmatpush3.bf16.msra.mxu0 %v5615_v38  ;;  %v5617_v42 = vpack.c.bf16 %v2560_v39, %v2556_v13  ;;  %v2608_v38 = vld [vmem:[#allocation15 + $0x1a8] sm:$0xff]  ;;  %v5639_v13 = vpack.c.bf16 %v2599_v32, %v2595_v30  ;;  %v5663_v30 = vpack.c.bf16 %v2585_v26, %v2581_v25 }
 0x5a4   : > { %v5641_v39 = vpack.c.bf16 %v2608_v38, %v2604_v36  ;;  %v2589_v36 = vld [vmem:[#allocation15 + $0x110] sm:$0xff] }
 0x5a5   : > { %5564 = vmatpush1.bf16.msra.mxu1 %v5563_v50  ;;  %5618 = vmatprep.subr.bf16.mxu0 %v5617_v42  ;;  %v2603_v42 = vld [vmem:[#allocation15 + $0x180] sm:$0xff]  ;;  %v2593_v38 = vld [vmem:[#allocation15 + $0x130] sm:$0xff] }
 0x5a6   : > { %5566 = vmatprep.subr.bf16.mxu1 %v5565_v51 }
 0x5a9   : > { %5568 = vmatpush1.bf16.msra.mxu1 %v5567_v59  ;;  %v2568_v59 = vld [vmem:[#allocation15 + $0x68] sm:$0xff] }
 0x5aa   : > { %5570 = vmatprep.subr.bf16.mxu1 %v5569_v60  ;;  %v5621_v0 = vpack.c.bf16 %v2568_v59, %v2564_v57  ;;  %v2562_v57 = vld [vmem:[#allocation15 + $0x38] sm:$0xff] }
 0x5ad   : > { %5572 = vmatpush1.bf16.msra.mxu1 %v5571_v2  ;;  %v2567_v2 = vld [vmem:[#allocation15 + $0x60] sm:$0xff] }
 0x5ae   : > { %5574 = vmatprep.subr.bf16.mxu1 %v5573_v3  ;;  %v2572_v3 = vld [vmem:[#allocation15 + $0x88] sm:$0xff]  ;;  %v5623_v31 = vpack.c.bf16 %v2567_v2, %v2563_v1  ;;  %v2557_v1 = vld [vmem:[#allocation15 + $0x10] sm:$0xff] }
 0x5af   : > { %v5625_v6 = vpack.c.bf16 %v2576_v4, %v2572_v3  ;;  %v2561_v2 = vld [vmem:[#allocation15 + $0x30] sm:$0xff]  ;;  %v2566_v3 = vld [vmem:[#allocation15 + $0x58] sm:$0xff] }
 0x5b0   : > { %v2570_v4 = vld [vmem:[#allocation15 + $0x78] sm:$0xff] }
 0x5b1   : > { %5576 = vmatpush1.bf16.msra.mxu1 %v5575_v9  ;;  %v2575_v9 = vld [vmem:[#allocation15 + $0xa0] sm:$0xff] }
 0x5b2   : > { %5578 = vmatprep.subr.bf16.mxu1 %v5577_v10  ;;  %v2580_v10 = vld [vmem:[#allocation15 + $0xc8] sm:$0xff]  ;;  %v5627_v14 = vpack.c.bf16 %v2575_v9, %v2571_v7  ;;  %v5653_v9 = vpack.c.bf16 %v2570_v4, %v2566_v3 }
 0x5b3   : > { %v5629_v15 = vpack.c.bf16 %v2584_v12, %v2580_v10  ;;  %v2565_v10 = vld [vmem:[#allocation15 + $0x50] sm:$0xff] }
 0x5b4   : > { %v2569_v12 = vld [vmem:[#allocation15 + $0x70] sm:$0xff] }
 0x5b5   : > { %5580 = vmatpush1.bf16.msra.mxu1 %v5579_v18  ;;  %v2583_v18 = vld [vmem:[#allocation15 + $0xe0] sm:$0xff]  ;;  %v2554_v4 = vld [vmem:[#allocation21 + $0xe] sm:$0xf] }
 0x5b6   : > { %5582 = vmatprep.subr.bf16.mxu1 %v5581_v19  ;;  %v2588_v19 = vld [vmem:[#allocation15 + $0x108] sm:$0xff]  ;;  %v5631_v16 = vpack.c.bf16 %v2583_v18, %v2579_v17  ;;  %v5655_v17 = vpack.c.bf16 %v2569_v12, %v2565_v10  ;;  %v2631_v12 = vrot.slane %v2554_v4, %v7129_v40 }
 0x5b9   : > { %5584 = vmatpush1.bf16.msra.mxu1 %v5583_v20  ;;  %v5633_v20 = vpack.c.bf16 %v2592_v8, %v2588_v19  ;;  %v2573_v19 = vld [vmem:[#allocation15 + $0x90] sm:$0xff] }
 0x5ba   : > { %v2577_v8 = vld [vmem:[#allocation15 + $0xb0] sm:$0xff] }
 0x5bb   : > { %v5659_v27 = vpack.c.bf16 %v2577_v8, %v2573_v19 }
 0x5bc   : > { %2436 = vmatmul.mubr.f32.vlgmr.msra.gmra.mrb[8].mxu1 %v7189_v22 }
 0x68f   : > { %v2437_v49 = vpop.f32.mrb[8].mxu1 }
 0x690   : > { %v5799_v50 = vadd.f32 %v2437_v49, %v2293_v48  ;;  %v2439_v51 = vpop.f32.mrb[9].mxu1  ;;  %v5643_v48 = vpack.c.bf16 %v2607_v55, %v2603_v42  ;;  %v2616_v49 = vld [vmem:[#allocation15 + $0x1e8] sm:$0xff]  ;;  %v5667_v42 = vpack.c.bf16 %v2593_v38, %v2589_v36 }
 0x691   : > { %v5800_v56 = vadd.f32 %v2439_v51, %v2297_v58  ;;  %v2612_v58 = vld [vmem:[#allocation15 + $0x1c8] sm:$0xff]  ;;  %v2611_v51 = vld [vmem:[#allocation15 + $0x1c0] sm:$0xff] }
 0x692   : > { %v2442_v62 = vmax.f32 %v5799_v50, 0.0  ;;  %v5645_v50 = vpack.c.bf16 %v2616_v49, %v2612_v58  ;;  %v5647_v63 = vpack.c.bf16 %v2615_v11, %v2611_v51  ;;  %v2601_v58 = vld [vmem:[#allocation15 + $0x170] sm:$0xff]  ;;  %v2606_v49 = vld [vmem:[#allocation15 + $0x198] sm:$0xff] }
 0x693   : > { %v2443_v60 = vmax.f32 %v5800_v56, 0.0  ;;  %v2558_v56 = vld [vmem:[#allocation15 + $0x18] sm:$0xff] }
 0x694   : > { %v5649_v59 = vpack.c.bf16 %v2562_v57, %v2558_v56  ;;  %v2609_v56 = vld [vmem:[#allocation15 + $0x1b0] sm:$0xff]  ;;  %v2614_v57 = vld [vmem:[#allocation15 + $0x1d8] sm:$0xff] }
 0x695   : > { %2547 = vmatprep.mubr.f32.mxu0 %v2443_v60 }
 0x696   : > { %2548 = vmatmul.mubr.f32.vlgmr.msra.gmra.mrb[4].mxu0 %v2442_v62 }
 0x697   : > { %5620 = vmatpush1.bf16.msra.mxu0 %v5619_v61  ;;  %2704 = vmatprep.mubr.f32.mxu0 %v6545_v46  ;;  %v4593_v61 = vld [vmem:[#allocation21 + $0xd] ss:$0 sm:$0xff] }
 0x698   : > { %5622 = vmatprep.subr.bf16.mxu0 %v5621_v0 }
 0x69b   : > { %5624 = vmatpush1.bf16.msra.mxu0 %v5623_v31 }
 0x69c   : > { %5626 = vmatprep.subr.bf16.mxu0 %v5625_v6  ;;  %v5651_v6 = vpack.c.bf16 %v2561_v2, %v2557_v1 }
 0x69f   : > { %5628 = vmatpush1.bf16.msra.mxu0 %v5627_v14  ;;  %v2574_v14 = vld [vmem:[#allocation15 + $0x98] sm:$0xff] }
 0x6a0   : > { %5630 = vmatprep.subr.bf16.mxu0 %v5629_v15  ;;  %v2578_v15 = vld [vmem:[#allocation15 + $0xb8] sm:$0xff] }
 0x6a1   : > { %v5657_v18 = vpack.c.bf16 %v2578_v15, %v2574_v14  ;;  %v7204_v14 = vld [vmem:[%s7035_s29] sm:$0xff] }
 0x6a2   : > { %v3276_v15 = vmul.f32 %v7204_v14, %v7204_v14 }
 0x6a3   : > { %5632 = vmatpush1.bf16.msra.mxu0 %v5631_v16  ;;  %v2582_v16 = vld [vmem:[#allocation15 + $0xd8] sm:$0xff] }
 0x6a4   : > { %5634 = vmatprep.subr.bf16.mxu0 %v5633_v20  ;;  %v2586_v20 = vld [vmem:[#allocation15 + $0xf8] sm:$0xff] }
 0x6a5   : > { %v5661_v24 = vpack.c.bf16 %v2586_v20, %v2582_v16  ;;  %v7221_v16 = vld [vmem:[%s7035_s29 + $0x10] sm:$0xff] }
 0x6a6   : > { %v3278_v20 = vmul.f32 %v7221_v16, %v7221_v16 }
 0x6a7   : > { %5636 = vmatpush1.bf16.msra.mxu0 %v5635_v29  ;;  %v2590_v29 = vld [vmem:[#allocation15 + $0x118] sm:$0xff] }
 0x6a8   : > { %5638 = vmatprep.subr.bf16.mxu0 %v5637_v5  ;;  %v2594_v5 = vld [vmem:[#allocation15 + $0x138] sm:$0xff] }
 0x6a9   : > { %v5665_v32 = vpack.c.bf16 %v2594_v5, %v2590_v29  ;;  %v7234_v29 = vld [vmem:[%s7035_s29 + $0x18] sm:$0xff] }
 0x6aa   : > { %v3279_v5 = vmul.f32 %v7234_v29, %v7234_v29 }
 0x6ab   : > { %5640 = vmatpush1.bf16.msra.mxu0 %v5639_v13  ;;  %v2598_v13 = vld [vmem:[#allocation15 + $0x158] sm:$0xff] }
 0x6ac   : > { %5642 = vmatprep.subr.bf16.mxu0 %v5641_v39  ;;  %v2602_v39 = vld [vmem:[#allocation15 + $0x178] sm:$0xff] }
 0x6ad   : > { %v5669_v55 = vpack.c.bf16 %v2602_v39, %v2598_v13 }
 0x6af   : > { %5644 = vmatpush1.bf16.msra.mxu0 %v5643_v48  ;;  %v2597_v48 = vld [vmem:[#allocation15 + $0x150] sm:$0xff] }
 0x6b0   : > { %5646 = vmatprep.subr.bf16.mxu0 %v5645_v50  ;;  %v2610_v50 = vld [vmem:[#allocation15 + $0x1b8] sm:$0xff]  ;;  %v5671_v51 = vpack.c.bf16 %v2601_v58, %v2597_v48 }
 0x6b1   : > { %v5673_v11 = vpack.c.bf16 %v2610_v50, %v2606_v49 }
 0x6b3   : > { %5648 = vmatpush1.bf16.msra.mxu0 %v5647_v63  ;;  %v2605_v63 = vld [vmem:[#allocation15 + $0x190] sm:$0xff] }
 0x6b4   : > { %5650 = vmatprep.subr.bf16.mxu0 %v5649_v59  ;;  %v2618_v59 = vld [vmem:[#allocation15 + $0x1f8] sm:$0xff] }
 0x769   : > { %v4672_v60 = vpop.f32.mrb[4].mxu0 }
 0x76a   : > { %v4673_v62 = vpop.f32.mrb[5].mxu0 }
 0x76b   : > { %v4674_v0 = vadd.f32 %v4673_v62, %v4672_v60  ;;  %v5675_v60 = vpack.c.bf16 %v2609_v56, %v2605_v63  ;;  %v2613_v62 = vld [vmem:[#allocation15 + $0x1d0] sm:$0xff]  ;;  %v6546_v63 = vmov 0   ;;  %v2894_v56 = vld [vmem:[#allocation16 + $0x80] sm:$0xff] }
 0x76c   : > { %5990 = vset.pattern.permute.xlu1 %v6546_v63  ;;  %5991 = vset.pattern.permute.xlu0 %v6546_v63  ;;  %v2917_v63 = vld [vmem:[#allocation16 + $0x138] sm:$0xff] }
 0x76d   : > { %v2550_v31 = vadd.f32 %v4674_v0, %v4593_v61  ;;  %v5677_v61 = vpack.c.bf16 %v2618_v59, %v2614_v57  ;;  %v2617_v0 = vld [vmem:[#allocation15 + $0x1f0] sm:$0xff]  ;;  %v2895_v57 = vld [vmem:[#allocation16 + $0x88] sm:$0xff]  ;;  %v2926_v59 = vld [vmem:[#allocation16 + $0x180] sm:$0xff] }
 0x76e   : > { %v5679_v1 = vpack.c.bf16 %v2617_v0, %v2613_v62  ;;  %v2878_v62 = vld [vmem:[#allocation16] sm:$0xff]  ;;  %v2879_v0 = vld [vmem:[#allocation16 + $0x8] sm:$0xff] }
 0x76f   : > { %v2553_v7 = vmax.f32 %v2550_v31, 0.0  ;;  %v2623_v31 = vrot.slane %v2554_v4, %v7080_v35  ;;  %v2635_v35 = vrot.slane %v2554_v4, %v7132_v41 }
 0x771   : > { %2705 = vmatmul.mubr.f32.vlgmr.msra.gmra.mrb[6].mxu0 %v2553_v7 }
 0x772   : > { %5652 = vmatpush1.bf16.msra.mxu0 %v5651_v6  ;;  %2775 = vmatprep.mubr.f32.mxu0 %v6545_v46  ;;  %v2627_v6 = vrot.slane %v2554_v4, %v7083_v37  ;;  %v2911_v4 = vld [vmem:[#allocation16 + $0x108] sm:$0xff] }
 0x773   : > { %5654 = vmatprep.subr.bf16.mxu0 %v5653_v9 }
 0x776   : > { %5656 = vmatpush1.bf16.msra.mxu0 %v5655_v17 }
 0x777   : > { %5658 = vmatprep.subr.bf16.mxu0 %v5657_v18 }
 0x77a   : > { %5660 = vmatpush1.bf16.msra.mxu0 %v5659_v27 }
 0x77b   : > { %5662 = vmatprep.subr.bf16.mxu0 %v5661_v24 }
 0x77e   : > { %5664 = vmatpush1.bf16.msra.mxu0 %v5663_v30 }
 0x77f   : > { %5666 = vmatprep.subr.bf16.mxu0 %v5665_v32  ;;  %v3601_v32 = vmul.f32 %v7136_v44, %v7136_v44 }
 0x782   : > { %5668 = vmatpush1.bf16.msra.mxu0 %v5667_v42  ;;  %v3603_v42 = vmul.f32 %v7158_v54, %v7158_v54 }
 0x783   : > { %5670 = vmatprep.subr.bf16.mxu0 %v5669_v55 }
 0x786   : > { %5672 = vmatpush1.bf16.msra.mxu0 %v5671_v51 }
 0x787   : > { %5674 = vmatprep.subr.bf16.mxu0 %v5673_v11 }
 0x78a   : > { %5676 = vmatpush1.bf16.msra.mxu0 %v5675_v60  ;;  %v5681_v60 = vpack.c.bf16 %v2895_v57, %v2894_v56  ;;  %v2902_v56 = vld [vmem:[#allocation16 + $0xc0] sm:$0xff]  ;;  %v2903_v57 = vld [vmem:[#allocation16 + $0xc8] sm:$0xff] }
 0x78b   : > { %5678 = vmatprep.subr.bf16.mxu0 %v5677_v61  ;;  %v2927_v61 = vld [vmem:[#allocation16 + $0x188] sm:$0xff] }
 0x78e   : > { %5680 = vmatpush1.bf16.msra.mxu0 %v5679_v1  ;;  %v5713_v1 = vpack.c.bf16 %v2927_v61, %v2926_v59  ;;  %v2934_v59 = vld [vmem:[#allocation16 + $0x1c0] sm:$0xff] }
 0x78f   : > { %5682 = vmatprep.subr.bf16.mxu0 %v5681_v60  ;;  %v2935_v60 = vld [vmem:[#allocation16 + $0x1c8] sm:$0xff] }
 0x790   : > { %5714 = vmatprep.subr.bf16.mxu1 %v5713_v1  ;;  %v2886_v1 = vld [vmem:[#allocation16 + $0x40] sm:$0xff] }
 0x791   : > { %2776 = vmatmul.mubr.f32.vlgmr.msra.gmra.mrb[8].mxu0 %v2553_v7  ;;  %v7209_v7 = vld [vmem:[%s7035_s29 + $0x8] sm:$0xff] }
 0x792   : > { %v3277_v17 = vmul.f32 %v7209_v7, %v7209_v7 }
 0x794   : > { %v3280_v27 = vadd.f32 %v3277_v17, %v3276_v15  ;;  %v2928_v15 = vld [vmem:[#allocation16 + $0x190] sm:$0xff]  ;;  %v2929_v17 = vld [vmem:[#allocation16 + $0x198] sm:$0xff] }
 0x796   : > { %v3281_v30 = vadd.f32 %v3280_v27, %v3278_v20  ;;  %v2913_v27 = vld [vmem:[#allocation16 + $0x118] sm:$0xff] }
 0x798   : > { %v3282_v38 = vadd.f32 %v3281_v30, %v3279_v5  ;;  %v2931_v5 = vld [vmem:[#allocation16 + $0x1a8] sm:$0xff]  ;;  %v2882_v30 = vld [vmem:[#allocation16 + $0x20] sm:$0xff] }
 0x844   : > { %v2706_v2 = vpop.f32.mrb[6].mxu0 }
 0x845   : > { %v2708_v3 = vpop.f32.mrb[7].mxu0  ;;  %v7198_v9 = vadd.f32 %v2706_v2, %v2623_v31  ;;  %v5683_v2 = vpack.c.bf16 %v2879_v0, %v2878_v62  ;;  %v2896_v31 = vld [vmem:[#allocation16 + $0x90] sm:$0xff]  ;;  %v5697_v0 = vpack.c.bf16 %v2903_v57, %v2902_v56 }
 0x846   : > { %v7200_v10 = vadd.f32 %v2708_v3, %v2627_v6  ;;  %v2910_v3 = vld [vmem:[#allocation16 + $0x100] sm:$0xff] }
 0x847   : > { %v2827_v37 = vmul.f32 %v7139_v45, %v7198_v9  ;;  %v3762_v13 = vmul.f32 %v7198_v9, %v7198_v9  ;;  %v5715_v6 = vpack.c.bf16 %v2911_v4, %v2910_v3  ;;  %5684 = vmatpush3.bf16.msra.mxu0 %v5683_v2  ;;  %v2887_v2 = vld [vmem:[#allocation16 + $0x48] sm:$0xff]  ;;  %v2918_v3 = vld [vmem:[#allocation16 + $0x140] sm:$0xff]  ;;  %v5729_v4 = vpack.c.bf16 %v2935_v60, %v2934_v59 }
 0x848   : > { %v2828_v18 = vmul.f32 %v7142_v47, %v7200_v10  ;;  %v3600_v47 = vmul.f32 %v7134_v43, %v7134_v43  ;;  %v3763_v39 = vmul.f32 %v7200_v10, %v7200_v10  ;;  %v2906_v60 = vld [vmem:[#allocation16 + $0xe0] sm:$0xff] }
 0x849   : > { %5716 = vmatpush3.bf16.msra.mxu1 %v5715_v6  ;;  %v2904_v6 = vld [vmem:[#allocation16 + $0xd0] sm:$0xff] }
 0x84a   : > { %v2831_v25 = vadd.f32 %v2828_v18, %v2827_v37  ;;  %v3766_v58 = vadd.f32 %v3763_v39, %v3762_v13  ;;  %v5717_v37 = vpack.c.bf16 %v2929_v17, %v2928_v15  ;;  %v2880_v18 = vld [vmem:[#allocation16 + $0x10] sm:$0xff]  ;;  %v2901_v39 = vld [vmem:[#allocation16 + $0xb8] sm:$0xff]  ;;  %v2813_v17 = vpop.xlane.xlu0 %2812 }
 0x84b   : > { %v2900_v13 = vld [vmem:[#allocation16 + $0xb0] sm:$0xff] }
 0x84c   : > { %5718 = vmatprep.subr.bf16.mxu1 %v5717_v37  ;;  %v4594_v15 = vld [vmem:[#allocation21 + $0x16] ss:$0 sm:$0xff]  ;;  %v2937_v37 = vld [vmem:[#allocation16 + $0x1d8] sm:$0xff] }
 0x864   : > { %v2777_v40 = vpop.f32.mrb[8].mxu0 }
 0x865   : > { %v7218_v19 = vadd.f32 %v2777_v40, %v2631_v12  ;;  %v2779_v8 = vpop.f32.mrb[9].mxu0  ;;  %v2897_v12 = vld [vmem:[#allocation16 + $0x98] sm:$0xff] }
 0x866   : > { %v7225_v24 = vadd.f32 %v2779_v8, %v2635_v35  ;;  %v5685_v35 = vpack.c.bf16 %v2897_v12, %v2896_v31  ;;  %v2881_v40 = vld [vmem:[#allocation16 + $0x18] sm:$0xff]  ;;  %v2912_v8 = vld [vmem:[#allocation16 + $0x110] sm:$0xff]  ;;  %v2919_v31 = vld [vmem:[#allocation16 + $0x148] sm:$0xff] }
 0x867   : > { %v2829_v41 = vmul.f32 %v7147_v34, %v7218_v19  ;;  %v3602_v34 = vmul.f32 %v7156_v53, %v7156_v53  ;;  %v3764_v48 = vmul.f32 %v7218_v19, %v7218_v19  ;;  %v5687_v20 = vpack.c.bf16 %v2881_v40, %v2880_v18  ;;  %v2905_v12 = vld [vmem:[#allocation16 + $0xd8] sm:$0xff] }
 0x868   : > { %v2830_v45 = vmul.f32 %v7154_v52, %v7225_v24  ;;  %v3604_v52 = vadd.f32 %v3601_v32, %v3600_v47  ;;  %v3765_v50 = vmul.f32 %v7225_v24, %v7225_v24  ;;  %5686 = vmatprep.subr.bf16.mxu0 %v5685_v35  ;;  %v2936_v35 = vld [vmem:[#allocation16 + $0x1d0] sm:$0xff]  ;;  %v5699_v18 = vpack.c.bf16 %v2887_v2, %v2886_v1  ;;  %v2939_v1 = vld [vmem:[#allocation16 + $0x1e8] sm:$0xff]  ;;  %v2890_v2 = vld [vmem:[#allocation16 + $0x60] sm:$0xff] }
 0x869   : > { %v2832_v26 = vadd.f32 %v2831_v25, %v2829_v41  ;;  %v3767_v51 = vadd.f32 %v3766_v58, %v3764_v48  ;;  %v2898_v41 = vld [vmem:[#allocation16 + $0xa0] sm:$0xff]  ;;  %v2899_v25 = vld [vmem:[#allocation16 + $0xa8] sm:$0xff]  ;;  %5688 = vmatpush3.bf16.msra.mxu0 %v5687_v20  ;;  %v5693_v48 = vpack.c.bf16 %v2901_v39, %v2900_v13  ;;  %v2933_v58 = vld [vmem:[#allocation16 + $0x1b8] sm:$0xff]  ;;  %v5731_v40 = vpack.c.bf16 %v2919_v31, %v2918_v3 }
 0x86a   : > { %v3605_v55 = vadd.f32 %v3604_v52, %v3602_v34  ;;  %v5689_v47 = vpack.c.bf16 %v2899_v25, %v2898_v41  ;;  %v2914_v34 = vld [vmem:[#allocation16 + $0x120] sm:$0xff]  ;;  %v2888_v20 = vld [vmem:[#allocation16 + $0x50] sm:$0xff]  ;;  %v2820_v41 = vadd.f32 %v4594_v15, %v2813_v17  ;;  %v5733_v25 = vpack.c.bf16 %v2937_v37, %v2936_v35  ;;  %v2891_v3 = vld [vmem:[#allocation16 + $0x68] sm:$0xff] }
 0x86b   : > { %v2833_v36 = vadd.f32 %v2832_v26, %v2830_v45  ;;  %v3768_v11 = vadd.f32 %v3767_v51, %v3765_v50  ;;  %v5719_v45 = vpack.c.bf16 %v2913_v27, %v2912_v8  ;;  %v2930_v26 = vld [vmem:[#allocation16 + $0x1a0] sm:$0xff]  ;;  %v2885_v50 = vld [vmem:[#allocation16 + $0x38] sm:$0xff]  ;;  %v5701_v8 = vpack.c.bf16 %v2905_v12, %v2904_v6  ;;  %v2923_v12 = vld [vmem:[#allocation16 + $0x168] sm:$0xff] }
 0x86c   : > { %v3606_v49 = vadd.f32 %v3605_v55, %v3603_v42  ;;  %v5721_v32 = vpack.c.bf16 %v2931_v5, %v2930_v26  ;;  %v2932_v42 = vld [vmem:[#allocation16 + $0x1b0] sm:$0xff]  ;;  %5690 = vmatprep.subr.bf16.mxu0 %v5689_v47  ;;  %v2889_v27 = vld [vmem:[#allocation16 + $0x58] sm:$0xff]  ;;  %v5707_v31 = vpack.c.bf16 %v2891_v3, %v2890_v2  ;;  %v2922_v6 = vld [vmem:[#allocation16 + $0x160] sm:$0xff] }
 0x86d   : > { %2834 = vadd.xlane.f32.xlu0 %v2833_v36  ;;  %v2883_v36 = vld [vmem:[#allocation16 + $0x28] sm:$0xff]  ;;  %5720 = vmatpush3.bf16.msra.mxu1 %v5719_v45  ;;  %v5725_v51 = vpack.c.bf16 %v2933_v58, %v2932_v42  ;;  %v2920_v45 = vld [vmem:[#allocation16 + $0x150] sm:$0xff]  ;;  %v2921_v47 = vld [vmem:[#allocation16 + $0x158] sm:$0xff]  ;;  %v5703_v26 = vpack.c.bf16 %v2889_v27, %v2888_v20 }
 0x86e   : > { %v5691_v52 = vpack.c.bf16 %v2883_v36, %v2882_v30  ;;  %5722 = vmatprep.subr.bf16.mxu1 %v5721_v32  ;;  %v5735_v5 = vpack.c.bf16 %v2921_v47, %v2920_v45  ;;  %v4595_v30 = vmul.f32 -1.442695, %v2820_v41  ;;  %v2908_v35 = vld [vmem:[#allocation16 + $0xf0] sm:$0xff]  ;;  %v2909_v37 = vld [vmem:[#allocation16 + $0xf8] sm:$0xff] }
 0x86f   : > { %v2892_v20 = vld [vmem:[#allocation16 + $0x70] sm:$0xff]  ;;  %v2893_v27 = vld [vmem:[#allocation16 + $0x78] sm:$0xff] }
 0x870   : > { %5692 = vmatpush3.bf16.msra.mxu0 %v5691_v52  ;;  %5992 = vpow2.f32 %v4595_v30  ;;  %v2924_v45 = vld [vmem:[#allocation16 + $0x170] sm:$0xff]  ;;  %v2925_v47 = vld [vmem:[#allocation16 + $0x178] sm:$0xff]  ;;  %v3439_v30 = vmul.f32 %v7176_v21, %v7176_v21 }
 0x871   : > { %3283 = vadd.xlane.f32.xlu0 %v3282_v38  ;;  %v2915_v38 = vld [vmem:[#allocation16 + $0x128] sm:$0xff]  ;;  %5694 = vmatprep.subr.bf16.mxu0 %v5693_v48 }
 0x872   : > { %v5723_v55 = vpack.c.bf16 %v2915_v38, %v2914_v34 }
 0x874   : > { %5724 = vmatpush3.bf16.msra.mxu1 %v5723_v55 }
 0x875   : > { %3607 = vadd.xlane.f32.xlu0 %v3606_v49  ;;  %v2884_v49 = vld [vmem:[#allocation16 + $0x30] sm:$0xff]  ;;  %5726 = vmatprep.subr.bf16.mxu1 %v5725_v51 }
 0x876   : > { %v5695_v61 = vpack.c.bf16 %v2885_v50, %v2884_v49 }
 0x878   : > { %5696 = vmatpush3.bf16.msra.mxu0 %v5695_v61  ;;  %v2907_v61 = vld [vmem:[#allocation16 + $0xe8] sm:$0xff] }
 0x879   : > { %3769 = vadd.xlane.f32.xlu0 %v3768_v11  ;;  %v2916_v11 = vld [vmem:[#allocation16 + $0x130] sm:$0xff]  ;;  %5698 = vmatprep.subr.bf16.mxu0 %v5697_v0  ;;  %v5705_v0 = vpack.c.bf16 %v2907_v61, %v2906_v60 }
 0x87a   : > { %v5727_v62 = vpack.c.bf16 %v2917_v63, %v2916_v11  ;;  %v5993_v38 = vpop.eup %5992 }
 0x87b   : > { %v2824_v52 = vadd.f32 1.0, %v5993_v38  ;;  %v3441_v38 = vmul.f32 %v7181_v28, %v7181_v28 }
 0x87c   : > { %5728 = vmatpush3.bf16.msra.mxu1 %v5727_v62  ;;  %5700 = vmatpush3.bf16.msra.mxu0 %v5699_v18  ;;  %v2938_v62 = vld [vmem:[#allocation16 + $0x1e0] sm:$0xff]  ;;  %v2940_v18 = vld [vmem:[#allocation16 + $0x1f0] sm:$0xff] }
 0x87d   : > { %5730 = vmatprep.subr.bf16.mxu1 %v5729_v4  ;;  %5702 = vmatprep.subr.bf16.mxu0 %v5701_v8  ;;  %v5737_v4 = vpack.c.bf16 %v2939_v1, %v2938_v62  ;;  %v2941_v8 = vld [vmem:[#allocation16 + $0x1f8] sm:$0xff] }
 0x87e   : > { %v5741_v41 = vpack.c.bf16 %v2941_v8, %v2940_v18  ;;  %v4209_v8 = vmax.f32 %v7189_v22, %v7181_v28 }
 0x880   : > { %5732 = vmatpush3.bf16.msra.mxu1 %v5731_v40  ;;  %5704 = vmatpush3.bf16.msra.mxu0 %v5703_v26  ;;  %v5709_v40 = vpack.c.bf16 %v2909_v37, %v2908_v35  ;;  %v5743_v26 = vpack.c.bf16 %v2925_v47, %v2924_v45  ;;  %v4126_v35 = vmax.f32 %v7221_v16, %v7234_v29  ;;  %v6547_v45 = vmov 0.0|0.0  }
 0x881   : > { %5734 = vmatprep.subr.bf16.mxu1 %v5733_v25  ;;  %5706 = vmatprep.subr.bf16.mxu0 %v5705_v0  ;;  %v5711_v25 = vpack.c.bf16 %v2893_v27, %v2892_v20 }
 0x884   : > { %5736 = vmatpush3.bf16.msra.mxu1 %v5735_v5  ;;  %5708 = vmatpush3.bf16.msra.mxu0 %v5707_v31  ;;  %v3438_v5 = vmul.f32 %v7178_v23, %v7178_v23  ;;  %v4152_v31 = vmax.f32 %v7134_v43, %v7136_v44 }
 0x885   : > { %5738 = vmatprep.subr.bf16.mxu1 %v5737_v4  ;;  %5710 = vmatprep.subr.bf16.mxu0 %v5709_v40  ;;  %v4153_v4 = vmax.f32 %v7156_v53, %v7158_v54  ;;  %v4208_v40 = vmax.f32 %v7178_v23, %v7176_v21 }
 0x887   : > { %v4210_v20 = vmax.f32 %v4208_v40, %v4209_v8 }
 0x888   : > { %5712 = vmatpush3.bf16.msra.mxu0 %v5711_v25  ;;  %v3091_v25 = vld [vmem:[#allocation18 + $0x8] sm:$0xff] }
 0x889   : > { %5745 = vmatprep.subr.bf16.mxu0 %v6547_v45 }
 0x8fa   : > { %v2835_v32 = vpop.xlane.xlu0 %2834 }
 0x8fb   : > { %v2836_v36 = vadd.f32 %v4594_v15, %v2835_v32  ;;  %v5739_v15 = vpack.c.bf16 %v2923_v12, %v2922_v6  ;;  %v3442_v32 = vadd.f32 %v3439_v30, %v3438_v5  ;;  %v4154_v6 = vmax.f32 %v4152_v31, %v4153_v4  ;;  %v3093_v5 = vld [vmem:[#allocation18 + $0x18] sm:$0xff]  ;;  %v3094_v30 = vld [vmem:[#allocation18 + $0x20] sm:$0xff] }
 0x8fc   : > { %v4236_v12 = vmax.f32 %v7218_v19, %v7225_v24  ;;  %v3105_v4 = vld [vmem:[#allocation18 + $0x78] sm:$0xff] }
 0x8fd   : > { %v4596_v34 = vmul.f32 -1.442695, %v2836_v36  ;;  %5740 = vmatpush3.bf16.msra.mxu1 %v5739_v15  ;;  %v3440_v36 = vmul.f32 %v7189_v22, %v7189_v22  ;;  %v4235_v15 = vmax.f32 %v7198_v9, %v7200_v10 }
 0x8fe   : > { %5742 = vmatprep.subr.bf16.mxu1 %v5741_v41  ;;  %v3284_v27 = vpop.xlane.xlu0 %3283  ;;  %v3090_v41 = vld [vmem:[#allocation18] sm:$0xff] }
 0x8ff   : > { %5994 = vpow2.f32 %v4596_v34  ;;  %v3443_v34 = vadd.f32 %v3442_v32, %v3440_v36  ;;  %v4237_v37 = vmax.f32 %v4235_v15, %v4236_v12  ;;  %v5746_v47 = vpack.c.bf16 %v3091_v25, %v3090_v41 }
 0x900   : > { %5996 = vrcp.f32 %v2824_v52  ;;  %vm3287_vm0 = vcmp.eq.f32.partialorder %v3284_v27, inf  ;;  %vm3289_vm1 = vcmp.eq.f32.partialorder %v3284_v27, 0.0 }
 0x901   : > { %5744 = vmatpush3.bf16.msra.mxu1 %v5743_v26  ;;  %v3444_v52 = vadd.f32 %v3443_v34, %v3441_v38  ;;  %v3092_v26 = vld [vmem:[#allocation18 + $0x10] sm:$0xff]  ;;  %v3095_v34 = vld [vmem:[#allocation18 + $0x28] sm:$0xff] }
 0x902   : > { %5769 = vmatprep.subr.bf16.mxu1 %v6547_v45  ;;  %v5749_v36 = vpack.c.bf16 %v3093_v5, %v3092_v26  ;;  %v5752_v38 = vpack.c.bf16 %v3095_v34, %v3094_v30  ;;  %v3608_v15 = vpop.xlane.xlu0 %3607 }
 0x903   : > { %vm3611_vm3 = vcmp.eq.f32.partialorder %v3608_v15, inf  ;;  %vm3613_vm4 = vcmp.eq.f32.partialorder %v3608_v15, 0.0 }
 0x909   : > { %v5995_v13 = vpop.eup %5994 }
 0x90a   : > { %v2840_v39 = vadd.f32 1.0, %v5995_v13  ;;  %v5997_v42 = vpop.eup %5996 }
 0x90c   : > { %5998 = vrcp.f32 %v2840_v39 }
 0x916   : > { %v5999_v55 = vpop.eup %5998 }
 0x917   : > { %v2843_v48 = vmax.f32 %v5997_v42, %v5999_v55 }
 0x919   : > { %v2844_v58 = vsub.f32 %v5997_v42, %v2843_v48  ;;  %v2847_v49 = vsub.f32 %v5999_v55, %v2843_v48 }
 0x91b   : > { %v2845_v50 = vmul.f32 1.442695, %v2844_v58  ;;  %v2848_v51 = vmul.f32 1.442695, %v2847_v49 }
 0x91d   : > { %6000 = vpow2.f32 %v2845_v50 }
 0x91e   : > { %6002 = vpow2.f32 %v2848_v51 }
 0x927   : > { %v6001_v11 = vpop.eup %6000 }
 0x928   : > { %v6003_v63 = vpop.eup %6002 }
 0x929   : > { %v2850_v56 = vadd.f32 %v6003_v63, %v6001_v11 }
 0x92b   : > { %6004 = vrcp.f32 %v2850_v56 }
 0x92c   : > { %6006 = vrsqrt.f32 %v3284_v27 }
 0x935   : > { %v6005_v57 = vpop.eup %6004 }
 0x936   : > { %v2853_v59 = vmul.f32 %v6005_v57, %v6001_v11  ;;  %v2863_v17 = vmul.f32 %v6005_v57, %v6003_v63  ;;  %v6007_v32 = vpop.eup %6006 }
 0x938   : > { %2856 = vperm.xlu1 %5990, %v2853_v59  }
 0x93c   : > { %2866 = vperm.xlu1 %5990, %v2863_v17   ;;  %v4125_v17 = vmax.f32 %v7204_v14, %v7209_v7 }
 0x93e   : > { %v4127_v18 = vmax.f32 %v4125_v17, %v4126_v35  ;;  %v7322_v17 = vpop.xlane.xlu0 %3769 }
 0x93f   : > { %vm3773_vm9 = vcmp.eq.f32.partialorder %v7322_v17, inf  ;;  %vm3775_vm10 = vcmp.eq.f32.partialorder %v7322_v17, 0.0 }
 0x960   : > { %3445 = vadd.xlane.f32.xlu1 %v3444_v52  ;;  %v3286_v52 = vmul.f32 %v6007_v32, %v3284_v27 }
 0x9b7   : > { %v2857_v13 = vpop.permute.xlu1 %2856 }
 0x9b8   : > { %v2859_v39 = vmul.f32 %v2857_v13, %v7134_v43  ;;  %v2860_v42 = vmul.f32 %v2857_v13, %v7136_v44  ;;  %v2861_v55 = vmul.f32 %v2857_v13, %v7156_v53  ;;  %v2862_v48 = vmul.f32 %v2857_v13, %v7158_v54  ;;  %v3096_v13 = vld [vmem:[#allocation18 + $0x30] sm:$0xff] }
 0x9bb   : > { %v2867_v58 = vpop.permute.xlu1 %2866 }
 0x9bc   : > { %v2869_v49 = vmul.f32 %v2867_v58, %v7198_v9  ;;  %v2870_v50 = vmul.f32 %v2867_v58, %v7200_v10  ;;  %v2871_v51 = vmul.f32 %v2867_v58, %v7218_v19  ;;  %v2872_v11 = vmul.f32 %v2867_v58, %v7225_v24  ;;  %v3098_v58 = vld [vmem:[#allocation18 + $0x40] sm:$0xff] }
 0x9be   : > { %v7268_v63 = vadd.f32 %v2870_v50, %v2860_v42  ;;  %v7270_v56 = vadd.f32 %v2872_v11, %v2862_v48  ;;  %v7272_v57 = vadd.f32 %v2869_v49, %v2859_v39  ;;  %v7274_v59 = vadd.f32 %v2871_v51, %v2861_v55  ;;  %v3097_v39 = vld [vmem:[#allocation18 + $0x38] sm:$0xff]  ;;  %v3099_v49 = vld [vmem:[#allocation18 + $0x48] sm:$0xff] }
 0x9bf   : > { %v3290_v42 = vand.u32 2147483648, %v3284_v27  ;;  %v5755_v55 = vpack.c.bf16 %v3097_v39, %v3096_v13  ;;  %v3288_v48 = vsel %vm3287_vm0, %v3284_v27, %v3286_v52  ;;  %v5758_v51 = vpack.c.bf16 %v3099_v49, %v3098_v58 }
 0x9c0   : > { %3012 = vmatprep.mubr.f32.mxu0 %v7268_v63  ;;  %3082 = vmatprep.mubr.f32.mxu1 %v7270_v56  ;;  %v3924_v60 = vmul.f32 %v7272_v57, %v7272_v57  ;;  %v3925_v61 = vmul.f32 %v7268_v63, %v7268_v63  ;;  %v3926_v62 = vmul.f32 %v7274_v59, %v7274_v59 }
 0x9c1   : > { %3013 = vmatmul.mubr.f32.vlgmr.msra.gmra.mrb[10].mxu0 %v7272_v57  ;;  %3083 = vmatmul.mubr.f32.vlgmr.msra.gmra.mrb[10].mxu1 %v7274_v59  ;;  %v3927_v1 = vmul.f32 %v7270_v56, %v7270_v56  ;;  %v3291_v50 = vsel %vm3289_vm1, %v3290_v42, %v3288_v48 }
 0x9c2   : > { %v3928_v0 = vadd.f32 %v3925_v61, %v3924_v60  ;;  %5747 = vmatpush3.bf16.msra.mxu0 %v5746_v47  ;;  %v3292_v11 = vmax.f32 %v3291_v50, 1e-12  ;;  %v3100_v60 = vld [vmem:[#allocation18 + $0x50] sm:$0xff]  ;;  %v3101_v61 = vld [vmem:[#allocation18 + $0x58] sm:$0xff]  ;;  %4811 = vmatprep.mubr.msk.f32.mxu0 %vm6548_vm2, %v6545_v46 }
 0x9c3   : > { %5748 = vmatprep.subr.bf16.mxu0 %v6547_v45  ;;  %4846 = vmatprep.mubr.msk.f32.mxu1 %vm6548_vm2, %v6545_v46 }
 0x9c4   : > { %v3929_v2 = vadd.f32 %v3928_v0, %v3926_v62  ;;  %v3102_v62 = vld [vmem:[#allocation18 + $0x60] sm:$0xff]  ;;  %6008 = vrcp.f32 %v3292_v11  ;;  %v5761_v0 = vpack.c.bf16 %v3101_v61, %v3100_v60 }
 0x9c6   : > { %v3930_v3 = vadd.f32 %v3929_v2, %v3927_v1  ;;  %5750 = vmatpush3.bf16.msra.mxu0 %v5749_v36  ;;  %v3103_v1 = vld [vmem:[#allocation18 + $0x68] sm:$0xff] }
 0x9c7   : > { %5751 = vmatprep.subr.bf16.mxu0 %v6547_v45  ;;  %v5764_v2 = vpack.c.bf16 %v3103_v1, %v3102_v62 }
 0x9c8   : > { %3931 = vadd.xlane.f32.xlu0 %v3930_v3  ;;  %v3104_v3 = vld [vmem:[#allocation18 + $0x70] sm:$0xff] }
 0x9c9   : > { %v5767_v31 = vpack.c.bf16 %v3105_v4, %v3104_v3 }
 0x9ca   : > { %5753 = vmatpush3.bf16.msra.mxu0 %v5752_v38 }
 0x9cb   : > { %5754 = vmatprep.subr.bf16.mxu0 %v6547_v45 }
 0x9cc   : > { %4155 = vmax.xlane.f32.xlu0 %v4154_v6 }
 0x9ce   : > { %5756 = vmatpush3.bf16.msra.mxu0 %v5755_v55  ;;  %v7313_v6 = vpop.eup %6008 }
 0x9cf   : > { %5757 = vmatprep.subr.bf16.mxu0 %v6547_v45  ;;  %v7317_v12 = vmul.f32 %v7234_v29, %v7313_v6 }
 0x9d0   : > { %4238 = vmax.xlane.f32.xlu0 %v4237_v37 }
 0x9d2   : > { %5759 = vmatpush3.bf16.msra.mxu0 %v5758_v51 }
 0x9d3   : > { %5760 = vmatprep.subr.bf16.mxu0 %v6547_v45 }
 0x9d4   : > { %4128 = vmax.xlane.f32.xlu0 %v4127_v18 }
 0x9d6   : > { %5762 = vmatpush3.bf16.msra.mxu0 %v5761_v0 }
 0x9d7   : > { %5763 = vmatprep.subr.bf16.mxu0 %v6547_v45 }
 0x9d8   : > { %4211 = vmax.xlane.f32.xlu0 %v4210_v20 }
 0x9da   : > { %5765 = vmatpush3.bf16.msra.mxu0 %v5764_v2 }
 0x9db   : > { %5766 = vmatprep.subr.bf16.mxu0 %v6547_v45 }
 0x9de   : > { %5768 = vmatpush3.bf16.msra.mxu0 %v5767_v31 }
 0x9df   : > { %3368 = vmatprep.subr.mxu0 %v7317_v12 }
 0xa55   : > { %v7324_v35 = vpop.xlane.xlu0 %3931 }
 0xa56   : > { %vm3935_vm5 = vcmp.eq.f32.partialorder %v7324_v35, inf  ;;  %vm3937_vm6 = vcmp.eq.f32.partialorder %v7324_v35, 0.0 }
 0xa59   : > { %v7326_v37 = vpop.xlane.xlu0 %4155 }
 0xa5d   : > { %v4239_v18 = vpop.xlane.xlu0 %4238 }
 0xa5e   : > { %v4240_v40 = vsub.f32 %v7198_v9, %v4239_v18  ;;  %v4241_v29 = vsub.f32 %v7200_v10, %v4239_v18  ;;  %v4242_v8 = vsub.f32 %v7218_v19, %v4239_v18  ;;  %v4243_v20 = vsub.f32 %v7225_v24, %v4239_v18 }
 0xa60   : > { %v4244_v27 = vmul.f32 1.442695, %v4240_v40  ;;  %v4246_v41 = vmul.f32 1.442695, %v4241_v29  ;;  %v4248_v25 = vmul.f32 1.442695, %v4242_v8 }
 0xa61   : > { %v7332_v47 = vpop.xlane.xlu0 %4128  ;;  %v4250_v26 = vmul.f32 1.442695, %v4243_v20  ;;  %v3614_v40 = vand.u32 2147483648, %v3608_v15  ;;  %v4089_v20 = vld [vmem:[%s691_s16] sm:$0xff] }
 0xa62   : > { %6010 = vpow2.f32 %v4244_v27 }
 0xa63   : > { %6012 = vpow2.f32 %v4246_v41 }
 0xa64   : > { %6014 = vpow2.f32 %v4248_v25  ;;  %v3938_v25 = vand.u32 2147483648, %v7324_v35 }
 0xa65   : > { %v4212_v5 = vpop.xlane.xlu0 %4211  ;;  %6016 = vpow2.f32 %v4250_v26  ;;  %v3184_v26 = vld [vmem:[#allocation19] sm:$0xff] }
 0xa66   : > { %v4213_v30 = vsub.f32 %v7178_v23, %v4212_v5  ;;  %v4214_v32 = vsub.f32 %v7176_v21, %v4212_v5  ;;  %v4215_v36 = vsub.f32 %v7189_v22, %v4212_v5  ;;  %v4216_v34 = vsub.f32 %v7181_v28, %v4212_v5  ;;  %v3185_v5 = vld [vmem:[#allocation19 + $0x8] sm:$0xff] }
 0xa68   : > { %v4217_v38 = vmul.f32 1.442695, %v4213_v30  ;;  %v4219_v52 = vmul.f32 1.442695, %v4214_v32  ;;  %v4221_v13 = vmul.f32 1.442695, %v4215_v36  ;;  %v5770_v32 = vpack.c.bf16 %v3185_v5, %v3184_v26 }
 0xa69   : > { %v4223_v42 = vmul.f32 1.442695, %v4216_v34  ;;  %v3186_v30 = vld [vmem:[#allocation19 + $0x10] sm:$0xff] }
 0xa6a   : > { %6018 = vpow2.f32 %v4217_v38  ;;  %5771 = vmatpush3.bf16.msra.mxu1 %v5770_v32 }
 0xa6b   : > { %6020 = vpow2.f32 %v4219_v52  ;;  %5772 = vmatprep.subr.bf16.mxu1 %v6547_v45 }
 0xa6c   : > { %v7338_v39 = vpop.eup %6010  ;;  %6022 = vpow2.f32 %v4221_v13  ;;  %v3188_v13 = vld [vmem:[#allocation19 + $0x20] sm:$0xff] }
 0xa6d   : > { %v7340_v55 = vpop.eup %6012  ;;  %6024 = vpow2.f32 %v4223_v42  ;;  %v3189_v42 = vld [vmem:[#allocation19 + $0x28] sm:$0xff] }
 0xa6e   : > { %v4252_v48 = vadd.f32 %v7340_v55, %v7338_v39  ;;  %v7344_v58 = vpop.eup %6014  ;;  %6026 = vrsqrt.f32 %v3608_v15 }
 0xa6f   : > { %v7347_v50 = vpop.eup %6016  ;;  %6028 = vrsqrt.f32 %v7324_v35 }
 0xa70   : > { %v4253_v49 = vadd.f32 %v7344_v58, %v4252_v48 }
 0xa72   : > { %v4254_v51 = vadd.f32 %v7347_v50, %v4253_v49  ;;  %v4597_v49 = vld [vmem:[#allocation21 + $0x17] ss:$0 sm:$0xff] }
 0xa74   : > { %4255 = vadd.xlane.f32.xlu1 %v4254_v51  ;;  %v7350_v11 = vpop.eup %6018 }
 0xa75   : > { %v7352_v60 = vpop.eup %6020 }
 0xa76   : > { %v4225_v61 = vadd.f32 %v7352_v60, %v7350_v11  ;;  %v7356_v62 = vpop.eup %6022 }
 0xa77   : > { %v7359_v1 = vpop.eup %6024 }
 0xa78   : > { %v4226_v0 = vadd.f32 %v7356_v62, %v4225_v61  ;;  %v6027_v3 = vpop.eup %6026 }
 0xa79   : > { %v3610_v4 = vmul.f32 %v6027_v3, %v3608_v15  ;;  %v6029_v18 = vpop.eup %6028  ;;  %v5776_v3 = vpack.c.bf16 %v3189_v42, %v3188_v13  ;;  %v3198_v42 = vld [vmem:[#allocation19 + $0x70] sm:$0xff] }
 0xa7a   : > { %v4227_v2 = vadd.f32 %v7359_v1, %v4226_v0  ;;  %v3934_v8 = vmul.f32 %v6029_v18, %v7324_v35 }
 0xa7b   : > { %v3612_v31 = vsel %vm3611_vm3, %v3608_v15, %v3610_v4  ;;  %v3187_v15 = vld [vmem:[#allocation19 + $0x18] sm:$0xff]  ;;  %v3190_v4 = vld [vmem:[#allocation19 + $0x30] sm:$0xff] }
 0xa7c   : > { %4228 = vadd.xlane.f32.xlu1 %v4227_v2  ;;  %v3615_v29 = vsel %vm3613_vm4, %v3614_v40, %v3612_v31  ;;  %v3936_v41 = vsel %vm3935_vm5, %v7324_v35, %v3934_v8  ;;  %v5773_v34 = vpack.c.bf16 %v3187_v15, %v3186_v30  ;;  %v3191_v31 = vld [vmem:[#allocation19 + $0x38] sm:$0xff] }
 0xa7d   : > { %v3616_v27 = vmax.f32 %v3615_v29, 1e-12  ;;  %v3939_v36 = vsel %vm3937_vm6, %v3938_v25, %v3936_v41  ;;  %v3296_v29 = vmul.f32 %v7221_v16, %v7313_v6  ;;  %v3193_v41 = vld [vmem:[#allocation19 + $0x48] sm:$0xff]  ;;  %v3194_v16 = vld [vmem:[#allocation19 + $0x50] sm:$0xff]  ;;  %v3195_v30 = vld [vmem:[#allocation19 + $0x58] sm:$0xff] }
 0xa7e   : > { %v3940_v48 = vmax.f32 %v3939_v36, 1e-12  ;;  %5774 = vmatpush3.bf16.msra.mxu1 %v5773_v34  ;;  %v5785_v36 = vpack.c.bf16 %v3195_v30, %v3194_v16  ;;  %v3196_v34 = vld [vmem:[#allocation19 + $0x60] sm:$0xff] }
 0xa7f   : > { %6030 = vrcp.f32 %v3616_v27  ;;  %5775 = vmatprep.subr.bf16.mxu1 %v6547_v45  ;;  %v3192_v27 = vld [vmem:[#allocation19 + $0x40] sm:$0xff] }
 0xa80   : > { %6032 = vrcp.f32 %v3940_v48  ;;  %v5782_v26 = vpack.c.bf16 %v3193_v41, %v3192_v27  ;;  %v3199_v48 = vld [vmem:[#allocation19 + $0x78] sm:$0xff] }
 0xa82   : > { %5777 = vmatpush3.bf16.msra.mxu1 %v5776_v3 }
 0xa83   : > { %5778 = vmatprep.subr.bf16.mxu1 %v6547_v45 }
 0xa89   : > { %v6031_v40 = vpop.eup %6030 }
 0xa8a   : > { %v3619_v25 = vmul.f32 %v6031_v40, %v7136_v44  ;;  %v3618_v5 = vmul.f32 %v6031_v40, %v7134_v43  ;;  %v3621_v32 = vmul.f32 %v6031_v40, %v7158_v54  ;;  %v6033_v15 = vpop.eup %6032 }
 0xa8d   : > { %4093 = vperm.xlu1 %5990, %v4089_v20   ;;  %v5779_v20 = vpack.c.bf16 %v3191_v31, %v3190_v4 }
 0xa8f   : > { %5780 = vmatpush3.bf16.msra.mxu1 %v5779_v20 }
 0xa90   : > { %5781 = vmatprep.subr.bf16.mxu1 %v6547_v45 }
 0xa93   : > { %5783 = vmatpush3.bf16.msra.mxu1 %v5782_v26  ;;  %v3294_v26 = vmul.f32 %v7204_v14, %v7313_v6 }
 0xa94   : > { %v4707_v38 = vpop.f32.mrb[10].mxu0  ;;  %v4742_v52 = vpop.f32.mrb[10].mxu1  ;;  %5784 = vmatprep.subr.bf16.mxu1 %v6547_v45 }
 0xa95   : > { %v4708_v51 = vpop.f32.mrb[11].mxu0  ;;  %v4743_v61 = vpop.f32.mrb[11].mxu1 }
 0xa96   : > { %v4709_v0 = vadd.f32 %v4708_v51, %v4707_v38  ;;  %v4744_v2 = vadd.f32 %v4743_v61, %v4742_v52  ;;  %v3197_v38 = vld [vmem:[#allocation19 + $0x68] sm:$0xff]  ;;  %v3943_v52 = vmul.f32 %v6033_v15, %v7268_v63  ;;  %v3942_v51 = vmul.f32 %v6033_v15, %v7272_v57  ;;  %v3446_v57 = vpop.xlane.xlu1 %3445 }
 0xa97   : > { %5786 = vmatpush3.bf16.msra.mxu1 %v5785_v36  ;;  %v5788_v13 = vpack.c.bf16 %v3197_v38, %v3196_v34  ;;  %v3945_v61 = vmul.f32 %v6033_v15, %v7270_v56  ;;  %v3944_v63 = vmul.f32 %v6033_v15, %v7274_v59  ;;  %6034 = vrsqrt.f32 %v3446_v57 }
 0xa98   : > { %v3015_v35 = vadd.f32 %v4709_v0, %v4597_v49  ;;  %5787 = vmatprep.subr.bf16.mxu1 %v6547_v45  ;;  %v5791_v49 = vpack.c.bf16 %v3199_v48, %v3198_v42  ;;  %v3295_v0 = vmul.f32 %v7209_v7, %v7313_v6  ;;  %6036 = vrsqrt.f32 %v7322_v17 }
 0xa99   : > { %vm3449_vm7 = vcmp.eq.f32.partialorder %v3446_v57, inf  ;;  %vm3451_vm8 = vcmp.eq.f32.partialorder %v3446_v57, 0.0  ;;  %v4158_v38 = vsub.f32 %v7136_v44, %v7326_v37  ;;  %v4160_v44 = vsub.f32 %v7158_v54, %v7326_v37 }
 0xa9a   : > { %v3085_v18 = vadd.f32 %v4744_v2, %v3015_v35  ;;  %v3452_v35 = vand.u32 2147483648, %v3446_v57 }
 0xa9b   : > { %5789 = vmatpush3.bf16.msra.mxu1 %v5788_v13  ;;  %v6091_v13 = vld [vmem:[%s7035_s29 + $0x8] sm:$0xff]  ;;  %v4163_v48 = vmul.f32 1.442695, %v4158_v38 }
 0xa9c   : > { %v3088_v8 = vmax.f32 %v3085_v18, 0.0  ;;  %5790 = vmatprep.subr.bf16.mxu1 %v6547_v45  ;;  %v3776_v18 = vand.u32 2147483648, %v7322_v17 }
 0xa9e   : > { %4812 = vmatmul.mubr.f32.vlgmr.msra.gmra.mrb[12].mxu0 %v3088_v8  ;;  %v4598_v8 = vld [vmem:[#allocation21 + $0x18] ss:$0 sm:$0xff] }
 0xa9f   : > { %3369 = vmatpush1.xpose.msra.mxu0 %v3296_v29  ;;  %3432 = vmatprep.mubr.f32.mxu0 %v7317_v12  ;;  %v3620_v12 = vmul.f32 %v6031_v40, %v7156_v53 }
 0xaa0   : > { %3622 = vmatprep.subr.mxu0 %v3619_v25  ;;  %5792 = vmatpush3.bf16.msra.mxu1 %v5791_v49  ;;  %v4159_v49 = vsub.f32 %v7156_v53, %v7326_v37 }
 0xaa1   : > { %3298 = vmatprep.subr.mxu1 %v3295_v0  ;;  %v6035_v45 = vpop.eup %6034 }
 0xaa2   : > { %3433 = vmatmul.mubr.f32.vlgmr.msra.gmra.mrb[14].mxu0 %v3296_v29  ;;  %v3448_v56 = vmul.f32 %v6035_v45, %v3446_v57  ;;  %v6037_v3 = vpop.eup %6036 }
 0xaa3   : > { %3623 = vmatpush1.xpose.msra.mxu0 %v3618_v5  ;;  %3686 = vmatprep.mubr.f32.mxu0 %v3619_v25  ;;  %v3772_v4 = vmul.f32 %v6037_v3, %v7322_v17 }
 0xaa4   : > { %3692 = vmatprep.subr.mxu0 %v3621_v32  ;;  %v3450_v2 = vsel %vm3449_vm7, %v3446_v57, %v3448_v56  ;;  %v6093_v57 = vld [vmem:[%s7035_s29 + $0x18] sm:$0xff] }
 0xaa5   : > { %v3453_v59 = vsel %vm3451_vm8, %v3452_v35, %v3450_v2  ;;  %v3774_v7 = vsel %vm3773_vm9, %v7322_v17, %v3772_v4  ;;  %v4133_v45 = vsub.f32 %v6093_v57, %v7332_v47  ;;  %v4167_v2 = vmul.f32 1.442695, %v4160_v44 }
 0xaa6   : > { %3687 = vmatmul.mubr.f32.vlgmr.msra.gmra.mrb[16].mxu0 %v3618_v5  ;;  %v3454_v31 = vmax.f32 %v3453_v59, 1e-12  ;;  %v3777_v40 = vsel %vm3775_vm10, %v3776_v18, %v3774_v7 }
 0xaa7   : > { %3693 = vmatpush1.xpose.msra.mxu0 %v3620_v12  ;;  %3756 = vmatprep.mubr.f32.mxu0 %v3621_v32  ;;  %v3778_v29 = vmax.f32 %v3777_v40, 1e-12  ;;  %v4140_v53 = vmul.f32 1.442695, %v4133_v45 }
 0xaa8   : > { %3946 = vmatprep.subr.mxu0 %v3943_v52  ;;  %6038 = vrcp.f32 %v3454_v31 }
 0xaa9   : > { %6040 = vrcp.f32 %v3778_v29 }
 0xaae   : > { %3757 = vmatmul.mubr.f32.vlgmr.msra.gmra.mrb[16].mxu0 %v3620_v12 }
 0xaaf   : > { %3947 = vmatpush1.xpose.msra.mxu0 %v3942_v51  ;;  %4010 = vmatprep.mubr.f32.mxu0 %v3943_v52 }
 0xab0   : > { %4016 = vmatprep.subr.mxu0 %v3945_v61 }
 0xab2   : > { %4011 = vmatmul.mubr.f32.vlgmr.msra.gmra.mrb[18].mxu0 %v3942_v51  ;;  %v6039_v25 = vpop.eup %6038 }
 0xab3   : > { %4017 = vmatpush1.xpose.msra.mxu0 %v3944_v63  ;;  %4080 = vmatprep.mubr.f32.mxu0 %v3945_v61  ;;  %v3457_v30 = vmul.f32 %v6039_v25, %v7176_v21  ;;  %v3456_v17 = vmul.f32 %v6039_v25, %v7178_v23  ;;  %v3459_v15 = vmul.f32 %v6039_v25, %v7181_v28  ;;  %v6041_v36 = vpop.eup %6040  ;;  %v6092_v61 = vld [vmem:[%s7035_s29 + $0x10] sm:$0xff] }
 0xab4   : > { %v3458_v14 = vmul.f32 %v6039_v25, %v7189_v22  ;;  %v3781_v6 = vmul.f32 %v6041_v36, %v7200_v10  ;;  %v3780_v23 = vmul.f32 %v6041_v36, %v7198_v9  ;;  %v3783_v28 = vmul.f32 %v6041_v36, %v7225_v24  ;;  %v6090_v24 = vld [vmem:[%s7035_s29] sm:$0xff] }
 0xab5   : > { %v3782_v22 = vmul.f32 %v6041_v36, %v7218_v19  ;;  %v4157_v9 = vsub.f32 %v7134_v43, %v7326_v37  ;;  %v4130_v52 = vsub.f32 %v6090_v24, %v7332_v47  ;;  %v4131_v19 = vsub.f32 %v6091_v13, %v7332_v47  ;;  %v4599_v37 = vld [vmem:[#allocation21 + $0x19] ss:$0 sm:$0xff] }
 0xab7   : > { %v4161_v42 = vmul.f32 1.442695, %v4157_v9  ;;  %v4134_v51 = vmul.f32 1.442695, %v4130_v52  ;;  %v4136_v43 = vmul.f32 1.442695, %v4131_v19 }
 0xab9   : > { %6042 = vpow2.f32 %v4161_v42 }
 0xaba   : > { %4081 = vmatmul.mubr.f32.vlgmr.msra.gmra.mrb[18].mxu0 %v3944_v63  ;;  %v4132_v63 = vsub.f32 %v6092_v61, %v7332_v47  ;;  %6044 = vpow2.f32 %v4163_v48 }
 0xabb   : > { %6046 = vpow2.f32 %v4134_v51 }
 0xabc   : > { %6048 = vpow2.f32 %v4136_v43  ;;  %v4138_v56 = vmul.f32 1.442695, %v4132_v63 }
 0xac3   : > { %v7436_v3 = vpop.eup %6042 }
 0xac4   : > { %v7438_v35 = vpop.eup %6044 }
 0xac5   : > { %v7440_v59 = vpop.eup %6046  ;;  %v4169_v47 = vadd.f32 %v7438_v35, %v7436_v3 }
 0xac6   : > { %v7442_v54 = vpop.eup %6048 }
 0xac7   : > { %v4142_v7 = vadd.f32 %v7442_v54, %v7440_v59 }
 0xb01   : > { %v4256_v63 = vpop.xlane.xlu1 %4255 }
 0xb71   : > { %v3178_v20 = vpop.f32.mrb[12].mxu0 }
 0xb72   : > { %v3179_v27 = vadd.f32 %v4598_v8, %v3178_v20  ;;  %v4813_v41 = vpop.f32.mrb[13].mxu0 }
 0xb74   : > { %v3182_v5 = vmax.f32 %v3179_v27, 0.0 }
 0xb75   : > { %v7406_v16 = vpop.f32.mrb[14].mxu0 }
 0xb76   : > { %4847 = vmatmul.mubr.f32.vlgmr.msra.gmra.mrb[12].mxu1 %v3182_v5  ;;  %v3436_v32 = vpop.f32.mrb[15].mxu0 }
 0xb77   : > { %3299 = vmatpush1.xpose.msra.mxu1 %v3294_v26  ;;  %3362 = vmatprep.mubr.f32.mxu1 %v3295_v0  ;;  %v4165_v0 = vmul.f32 1.442695, %v4159_v49 }
 0xb78   : > { %3460 = vmatprep.subr.mxu1 %v3457_v30 }
 0xb79   : > { %6050 = vpow2.f32 %v4165_v0 }
 0xb7a   : > { %3363 = vmatmul.mubr.f32.vlgmr.msra.gmra.mrb[14].mxu1 %v3294_v26  ;;  %6052 = vpow2.f32 %v4138_v56  ;;  %v4229_v56 = vpop.xlane.xlu1 %4228 }
 0xb7b   : > { %3461 = vmatpush1.xpose.msra.mxu1 %v3456_v17  ;;  %3524 = vmatprep.mubr.f32.mxu1 %v3457_v30  ;;  %6054 = vpow2.f32 %v4167_v2 }
 0xb7c   : > { %3530 = vmatprep.subr.mxu1 %v3459_v15  ;;  %6056 = vpow2.f32 %v4140_v53 }
 0xb7d   : > { %6058 = vrcp.f32 %v4256_v63 }
 0xb7e   : > { %3525 = vmatmul.mubr.f32.vlgmr.msra.gmra.mrb[16].mxu1 %v3456_v17 }
 0xb7f   : > { %3531 = vmatpush1.xpose.msra.mxu1 %v3458_v14  ;;  %3594 = vmatprep.mubr.f32.mxu1 %v3459_v15 }
 0xb80   : > { %3784 = vmatprep.subr.mxu1 %v3781_v6 }
 0xb81   : > { %v7413_v21 = vpop.f32.mrb[16].mxu0 }
 0xb82   : > { %v3760_v12 = vpop.f32.mrb[17].mxu0 }
 0xb83   : > { %v7446_v4 = vpop.eup %6050 }
 0xb84   : > { %v7450_v18 = vpop.eup %6052  ;;  %v4170_v8 = vadd.f32 %v7446_v4, %v4169_v47 }
 0xb85   : > { %v6055_v27 = vpop.eup %6054  ;;  %v4143_v25 = vadd.f32 %v7450_v18, %v4142_v7 }
 0xb86   : > { %3595 = vmatmul.mubr.f32.vlgmr.msra.gmra.mrb[16].mxu1 %v3458_v14  ;;  %v7458_v26 = vpop.eup %6056  ;;  %v4171_v32 = vadd.f32 %v6055_v27, %v4170_v8 }
 0xb87   : > { %3785 = vmatpush1.xpose.msra.mxu1 %v3780_v23  ;;  %3848 = vmatprep.mubr.f32.mxu1 %v3781_v6  ;;  %v4144_v15 = vadd.f32 %v7458_v26, %v4143_v25  ;;  %v6059_v0 = vpop.eup %6058 }
 0xb88   : > { %3854 = vmatprep.subr.mxu1 %v3783_v28  ;;  %v4259_v45 = vmul.f32 %v6059_v0, %v7340_v55  ;;  %v4260_v53 = vmul.f32 %v6059_v0, %v7344_v58  ;;  %v4261_v7 = vmul.f32 %v6059_v0, %v7347_v50 }
 0xb8a   : > { %3849 = vmatmul.mubr.f32.vlgmr.msra.gmra.mrb[18].mxu1 %v3780_v23 }
 0xb8b   : > { %3855 = vmatpush1.xpose.msra.mxu1 %v3782_v22  ;;  %3918 = vmatprep.mubr.f32.mxu1 %v3783_v28 }
 0xb8d   : > { %v7418_v10 = vpop.f32.mrb[18].mxu0 }
 0xb8e   : > { %v4084_v34 = vpop.f32.mrb[19].mxu0 }
 0xb92   : > { %3919 = vmatmul.mubr.f32.vlgmr.msra.gmra.mrb[18].mxu1 %v3782_v22 }
 0xc49   : > { %v3272_v31 = vpop.f32.mrb[12].mxu1 }
 0xc4a   : > { %v7452_v40 = vadd.f32 %v4599_v37, %v3272_v31  ;;  %v4848_v29 = vpop.f32.mrb[13].mxu1 }
 0xc4c   : > { %v4099_v20 = vsel %vm4098_vm11, %v7452_v40, -inf }
 0xc4d   : > { %4100 = vmax.xlane.f32.xlu0 %v4099_v20  ;;  %v3364_v41 = vpop.f32.mrb[14].mxu1 }
 0xc4e   : > { %v3435_v5 = vadd.f32 %v7406_v16, %v3364_v41  ;;  %v3366_v30 = vpop.f32.mrb[15].mxu1 }
 0xc50   : > { %v4305_v17 = vmul.f32 1.5, %v3435_v5  ;;  %v4086_v12 = vmul.f32 0.9, %v3435_v5 }
 0xc51   : > { %4172 = vadd.xlane.f32.xlu0 %v4171_v32 }
 0xc52   : > { %v4306_v36 = vsub.f32 %v7413_v21, %v4305_v17 }
 0xc54   : > { %v4307_v14 = vmul.f32 %v4306_v36, %v4306_v36 }
 0xc55   : > { %4145 = vadd.xlane.f32.xlu0 %v4144_v15 }
 0xc56   : > { %v4308_v6 = vsel %vm4293_vm12, %v4307_v14, 0.0 }
 0xc57   : > { %4309 = vadd.xlane.f32.xlu1 %v4308_v6 }
 0xc59   : > { %v3596_v23 = vpop.f32.mrb[16].mxu1 }
 0xc5a   : > { %v4087_v28 = vmul.f32 0.1, %v3596_v23  ;;  %v3598_v22 = vpop.f32.mrb[17].mxu1  ;;  %v4318_v24 = vmul.f32 1.5, %v3596_v23 }
 0xc5c   : > { %v4088_v34 = vadd.f32 %v4087_v28, %v4086_v12 }
 0xc5e   : > { %v4291_v16 = vsub.f32 %v7418_v10, %v4088_v34 }
 0xc60   : > { %v4292_v9 = vmul.f32 %v4291_v16, %v4291_v16 }
 0xc62   : > { %v7466_v38 = vsel %vm4293_vm12, %v4292_v9, 0.0 }
 0xc65   : > { %v3920_v52 = vpop.f32.mrb[18].mxu1 }
 0xc66   : > { %v4319_v13 = vsub.f32 %v3920_v52, %v4318_v24  ;;  %v4331_v19 = vsub.f32 %v7413_v21, %v3920_v52  ;;  %v3922_v42 = vpop.f32.mrb[19].mxu1  ;;  %v4258_v21 = vmul.f32 %v6059_v0, %v7338_v39 }
 0xc68   : > { %v4320_v48 = vmul.f32 %v4319_v13, %v4319_v13  ;;  %v4332_v49 = vmul.f32 %v4331_v19, %v4331_v19 }
 0xc6a   : > { %v7470_v51 = vsel %vm4293_vm12, %v4320_v48, 0.0  ;;  %v7473_v61 = vsel %vm4293_vm12, %v4332_v49, 0.0 }
 0xcda   : > { %v4101_v10 = vpop.xlane.xlu0 %4100 }
 0xcdb   : > { %v7476_v43 = vsub.f32 %v7452_v40, %v4101_v10 }
 0xcdd   : > { %v4103_v44 = vmul.f32 1.442695, %v7476_v43 }
 0xcde   : > { %v4173_v57 = vpop.xlane.xlu0 %4172 }
 0xcdf   : > { %6060 = vpow2.f32 %v4103_v44 }
 0xce0   : > { %6062 = vrcp.f32 %v4173_v57 }
 0xce1   : > { %6064 = vlog2.f32 %v4258_v21 }
 0xce2   : > { %6066 = vlog2.f32 %v4259_v45  ;;  %v4146_v2 = vpop.xlane.xlu0 %4145 }
 0xce3   : > { %6068 = vrcp.f32 %v4229_v56 }
 0xce4   : > { %6070 = vrcp.f32 %v4146_v2 }
 0xce5   : > { %6072 = vlog2.f32 %v4260_v53 }
 0xce9   : > { %v6061_v37 = vpop.eup %6060 }
 0xcea   : > { %v6063_v47 = vpop.eup %6062  ;;  %v4105_v31 = vsel %vm4098_vm11, %v6061_v37, 0.0 }
 0xceb   : > { %4106 = vadd.xlane.f32.xlu0 %v4105_v31  ;;  %v4175_v29 = vmul.f32 %v6063_v47, %v7436_v3  ;;  %v4176_v39 = vmul.f32 %v6063_v47, %v7438_v35  ;;  %v4177_v55 = vmul.f32 %v6063_v47, %v7446_v4  ;;  %v4178_v8 = vmul.f32 %v6063_v47, %v6055_v27  ;;  %v6065_v20 = vpop.eup %6064 }
 0xcec   : > { %v6067_v58 = vpop.eup %6066  ;;  %v4263_v25 = vmul.f32 0.6931472, %v6065_v20  ;;  %v7497_v31 = vand.u32 127, %v836_v33 }
 0xced   : > { %6074 = vlog2.f32 %v4175_v29  ;;  %v6069_v41 = vpop.eup %6068  ;;  %v4265_v50 = vmul.f32 0.6931472, %v6067_v58 }
 0xcee   : > { %6076 = vlog2.f32 %v4261_v7  ;;  %v6071_v5 = vpop.eup %6070  ;;  %v4231_v30 = vmul.f32 %v6069_v41, %v7350_v11  ;;  %v4232_v3 = vmul.f32 %v6069_v41, %v7352_v60  ;;  %v4233_v6 = vmul.f32 %v6069_v41, %v7356_v62 }
 0xcef   : > { %6078 = vlog2.f32 %v4176_v39  ;;  %v6073_v35 = vpop.eup %6072  ;;  %v4148_v15 = vmul.f32 %v6071_v5, %v7440_v59  ;;  %v4149_v23 = vmul.f32 %v6071_v5, %v7442_v54  ;;  %v4150_v60 = vmul.f32 %v6071_v5, %v7450_v18 }
 0xcf0   : > { %6080 = vlog2.f32 %v4177_v55  ;;  %v4270_v4 = vsub.f32 %v4263_v25, %v4231_v30  ;;  %v4271_v17 = vsub.f32 %v4265_v50, %v4232_v3  ;;  %v4267_v34 = vmul.f32 0.6931472, %v6073_v35 }
 0xcf1   : > { %6082 = vlog2.f32 %v4178_v8  ;;  %v4151_v52 = vmul.f32 %v6071_v5, %v7458_v26  ;;  %v4234_v44 = vmul.f32 %v6069_v41, %v7359_v1  ;;  %vm4349_vm14 = vcmp.eq.s32.totalorder %v7497_v31, 2 }
 0xcf2   : > { %v4274_v9 = vmul.f32 %v4270_v4, %v4258_v21  ;;  %v4275_v24 = vmul.f32 %v4271_v17, %v4259_v45  ;;  %v4272_v63 = vsub.f32 %v4267_v34, %v4233_v6 }
 0xcf4   : > { %v4278_v0 = vadd.f32 %v4275_v24, %v4274_v9  ;;  %v4276_v21 = vmul.f32 %v4272_v63, %v4260_v53 }
 0xcf6   : > { %v4279_v2 = vadd.f32 %v4278_v0, %v4276_v21 }
 0xcf7   : > { %v6075_v32 = vpop.eup %6074 }
 0xcf8   : > { %v6077_v27 = vpop.eup %6076  ;;  %v4180_v36 = vmul.f32 0.6931472, %v6075_v32 }
 0xcf9   : > { %v6079_v14 = vpop.eup %6078  ;;  %v4269_v49 = vmul.f32 0.6931472, %v6077_v27 }
 0xcfa   : > { %v6081_v12 = vpop.eup %6080  ;;  %v4182_v28 = vmul.f32 0.6931472, %v6079_v14  ;;  %v4187_v22 = vsub.f32 %v4180_v36, %v4148_v15 }
 0xcfb   : > { %v6083_v11 = vpop.eup %6082  ;;  %v4184_v16 = vmul.f32 0.6931472, %v6081_v12  ;;  %v4273_v56 = vsub.f32 %v4269_v49, %v4234_v44 }
 0xcfc   : > { %v4186_v13 = vmul.f32 0.6931472, %v6083_v11  ;;  %v4188_v59 = vsub.f32 %v4182_v28, %v4149_v23  ;;  %v4191_v19 = vmul.f32 %v4187_v22, %v4175_v29  ;;  %v4094_v29 = vpop.permute.xlu1 %4093 }
 0xcfd   : > { %v4189_v42 = vsub.f32 %v4184_v16, %v4150_v60  ;;  %v4277_v26 = vmul.f32 %v4273_v56, %v4261_v7  ;;  %vm4095_vm13 = vcmp.eq.s32.totalorder %v7497_v31, %v4094_v29 }
 0xcfe   : > { %v4190_v48 = vsub.f32 %v4186_v13, %v4151_v52  ;;  %v4192_v62 = vmul.f32 %v4188_v59, %v4176_v39 }
 0xcff   : > { %v4193_v54 = vmul.f32 %v4189_v42, %v4177_v55  ;;  %v4280_v37 = vadd.f32 %v4279_v2, %v4277_v26  ;;  %v4600_v55 = vsel %vm4095_vm13, 1.0, %v6545_v46 }
 0xd00   : > { %v4195_v10 = vadd.f32 %v4192_v62, %v4191_v19  ;;  %v4194_v57 = vmul.f32 %v4190_v48, %v4178_v8  ;;  %v4310_v41 = vpop.xlane.xlu1 %4309 }
 0xd01   : > { %v4311_v30 = vrot.slane %v4310_v41, 4 }
 0xd02   : > { %v4196_v18 = vadd.f32 %v4195_v10, %v4193_v54 }
 0xd03   : > { %v4312_v32 = vadd.f32 %v4311_v30, %v4310_v41 }
 0xd04   : > { %v4197_v45 = vadd.f32 %v4196_v18, %v4194_v57 }
 0xd06   : > { %4198 = vadd.xlane.f32.xlu0 %v4197_v45 }
 0xd0a   : > { %4281 = vadd.xlane.f32.xlu0 %v4280_v37 }
 0xd0e   : > { %4295 = vadd.xlane.f32.xlu0 %v7466_v38 }
 0xd78   : > { %v4107_v47 = vpop.xlane.xlu0 %4106 }
 0xd79   : > { %6084 = vlog2.f32 %v4107_v47 }
 0xd83   : > { %v6085_v1 = vpop.eup %6084 }
 0xd84   : > { %v4109_v39 = vmul.f32 0.6931472, %v6085_v1 }
 0xd86   : > { %v4110_v53 = vsub.f32 %v7476_v43, %v4109_v39 }
 0xd88   : > { %v4111_v8 = vmul.f32 %v4600_v55, %v4110_v53 }
 0xd8a   : > { %v4112_v7 = vsel %vm4098_vm11, %v4111_v8, 0.0 }
 0xd8b   : > { %4113 = vadd.xlane.f32.xlu0 %v4112_v7 }
 0xd8f   : > { %4322 = vadd.xlane.f32.xlu0 %v7470_v51  ;;  %v4313_v51 = vrot.slane %v4312_v32, 2 }
 0xd91   : > { %v4314_v28 = vadd.f32 %v4313_v51, %v4312_v32 }
 0xd93   : > { %4334 = vadd.xlane.f32.xlu0 %v7473_v61  ;;  %v4199_v38 = vpop.xlane.xlu0 %4198  ;;  %v4315_v13 = vrot.slane %v4314_v28, 1 }
 0xd94   : > { %v4200_v58 = vrot.slane %v4199_v38, 4 }
 0xd95   : > { %v4316_v44 = vadd.f32 %v4315_v13, %v4314_v28 }
 0xd96   : > { %v4201_v50 = vadd.f32 %v4200_v58, %v4199_v38 }
 0xd97   : > { %v4282_v33 = vpop.xlane.xlu0 %4281  ;;  %v4317_v37 = vmul.f32 0.015625, %v4316_v44 }
 0xd98   : > { %v4283_v20 = vrot.slane %v4282_v33, 4  ;;  %v4202_v35 = vrot.slane %v4201_v50, 2 }
 0xd9a   : > { %v4284_v25 = vadd.f32 %v4283_v20, %v4282_v33  ;;  %v4203_v27 = vadd.f32 %v4202_v35, %v4201_v50  ;;  %v4601_v20 = vsel %vm4349_vm14, 1.0, %v6545_v46 }
 0xd9b   : > { %v4296_v5 = vpop.xlane.xlu0 %4295 }
 0xd9c   : > { %v4285_v43 = vrot.slane %v4284_v25, 2  ;;  %v4297_v3 = vrot.slane %v4296_v5, 4  ;;  %v4204_v12 = vrot.slane %v4203_v27, 1 }
 0xd9e   : > { %v4286_v4 = vadd.f32 %v4285_v43, %v4284_v25  ;;  %v4298_v17 = vadd.f32 %v4297_v3, %v4296_v5  ;;  %v4205_v24 = vadd.f32 %v4204_v12, %v4203_v27 }
 0xda0   : > { %v4287_v61 = vrot.slane %v4286_v4, 1  ;;  %v4299_v14 = vrot.slane %v4298_v17, 2  ;;  %v4207_v10 = vmul.f32 0.00024414063, %v4205_v24 }
 0xda2   : > { %v4288_v11 = vadd.f32 %v4287_v61, %v4286_v4  ;;  %v4300_v60 = vadd.f32 %v4299_v14, %v4298_v17 }
 0xda4   : > { %v4289_v48 = vmul.f32 0.00024414063, %v4288_v11  ;;  %v4301_v62 = vrot.slane %v4300_v60, 1 }
 0xda6   : > { %v4290_v56 = vadd.f32 %v4289_v48, %v4207_v10  ;;  %v4302_v21 = vadd.f32 %v4301_v62, %v4300_v60 }
 0xda8   : > { %v4304_v39 = vmul.f32 0.015625, %v4302_v21 }
 0xe18   : > { %v4114_v15 = vpop.xlane.xlu0 %4113 }
 0xe19   : > { %v4115_v36 = vsub.f32 0.0, %v4114_v15 }
 0xe1b   : > { %v4117_v6 = vrot.slane %v4115_v36, 4 }
 0xe1c   : > { %v4323_v23 = vpop.xlane.xlu0 %4322 }
 0xe1d   : > { %v4118_v22 = vadd.f32 %v4117_v6, %v4115_v36  ;;  %v4324_v34 = vrot.slane %v4323_v23, 4 }
 0xe1f   : > { %v4119_v16 = vrot.slane %v4118_v22, 2  ;;  %v4325_v9 = vadd.f32 %v4324_v34, %v4323_v23 }
 0xe20   : > { %v4335_v52 = vpop.xlane.xlu0 %4334 }
 0xe21   : > { %v4120_v59 = vadd.f32 %v4119_v16, %v4118_v22  ;;  %v4326_v19 = vrot.slane %v4325_v9, 2  ;;  %v4336_v42 = vrot.slane %v4335_v52, 4 }
 0xe23   : > { %v4121_v49 = vrot.slane %v4120_v59, 1  ;;  %v4327_v63 = vadd.f32 %v4326_v19, %v4325_v9  ;;  %v4337_v54 = vadd.f32 %v4336_v42, %v4335_v52 }
 0xe25   : > { %v4122_v0 = vadd.f32 %v4121_v49, %v4120_v59  ;;  %v4328_v57 = vrot.slane %v4327_v63, 1  ;;  %v4338_v18 = vrot.slane %v4337_v54, 2 }
 0xe27   : > { %v4124_v45 = vmul.f32 0.125, %v4122_v0  ;;  %v4329_v2 = vadd.f32 %v4328_v57, %v4327_v63  ;;  %v4339_v26 = vadd.f32 %v4338_v18, %v4337_v54 }
 0xe29   : > { %v4343_v47 = vadd.f32 %v4290_v56, %v4124_v45  ;;  %v4330_v29 = vmul.f32 0.015625, %v4329_v2  ;;  %v4340_v1 = vrot.slane %v4339_v26, 1 }
 0xe2b   : > { %v4346_v53 = vadd.f32 %v4330_v29, %v4317_v37  ;;  %v4341_v55 = vadd.f32 %v4340_v1, %v4339_v26  ;;  %v4344_v8 = vadd.f32 %v4343_v47, %v4304_v39 }
 0xe2d   : > { %v4342_v7 = vmul.f32 0.015625, %v4341_v55  ;;  %v4347_v38 = vmul.f32 0.1, %v4346_v53 }
 0xe2f   : > { %v4345_v33 = vadd.f32 %v4344_v8, %v4342_v7 }
 0xe31   : > { %v4348_v58 = vadd.f32 %v4347_v38, %v4345_v33 }
 0xe33   : > { %v4352_v41 = vmul.f32 %v4601_v20, %v4348_v58 }
 0xe35   : > { %v4353_v25 = vadd.f32 %v4352_v41, %v7452_v40 }
 0xe37   : > { %4354 = vst [vmem:[%s695_s27] sm:$0xff] %v4353_v25 }
 0xe38 PF: > { %p32_p6 = scmp.ge.s32.totalorder %s6939_s17, 6   ;;  %s7600_s29 = smov %s6516_s30 }
 0xe39   : > { %s7601_s30 = smov %s6520_s15  ;;  %s7602_s15 = smov %s6950_s14 }
 0xe3a   : > { %s7603_s16 = smov %s6939_s17  ;;  %34 = sbr.rel (!%p32_p6) target bundleno = 19 (0x13), region = 176 }
 0xe41   :  { %4374 = vsyncpa [#allocation3], 1 }
 0xe42   :  { %4376 = vsyncpa [#allocation3 + $0x1], 1 }
 0xe43   :  { %4377 = vsyncpa [#allocation5], 1 }
 0xe44   :  { %4379 = vsyncpa [#allocation5 + $0x1], 1 }
 0xe45   :  { %4380 = vsyncpa [#allocation8], 1 }
 0xe46   :  { %4381 = vsyncpa [#allocation11], 1 }
 0xe47   :  { %4382 = vsyncpa [#allocation14], 1 }
 0xe48   :  { %4383 = vsyncpa [#allocation17], 1 }
 0xe49   :  { %4384 = vsyncpa [#allocation20], 1 }

</bundles_post_ra>
